<compile_context>
chip_gen: v7x
topology: tpu7x:2x2x1
jax: 0.10.0
libtpu: 0.0.40
codegen_flags: <defaults>
</compile_context>

<pallas_src>
import jax
import jax.numpy as jnp
from jax.experimental import pallas as pl
from jax.experimental.pallas import tpu as pltpu


_VMEM_LIMIT_BYTES = 32 * 1024 * 1024  # well under v7x physical, > v5e default


def _round_up(x, m):
    return ((x + m - 1) // m) * m


# -----------------------------------------------------------------------------
# Pallas kernels
# -----------------------------------------------------------------------------
def conv_pool_relu_kernel(p0_ref, p1_ref, p2_ref, p3_ref, w_ref, b_ref, o_ref):
    """Fused conv(as im2col matmul) + bias + ReLU + 2x2 maxpool, one row tile.

    p{k}_ref : (tile_n, 9*Cin) bf16 patches for pool-window position k
               (tile_n rows out of N = B*Ho*Wo pooled pixels).
    w_ref    : (9*Cin, Cout) bf16 flattened conv weight (VMEM-resident).
    b_ref    : (1, Cout) f32 bias (VMEM-resident).
    o_ref    : (tile_n, Cout) bf16 pooled + ReLU'd output.

    Uses relu(max_k(z_k) + bias) == maxpool(relu(conv_k + bias)) since the
    bias is constant over the 2x2 pooling window.
    """
    w = w_ref[...]
    acc = jnp.dot(p0_ref[...], w, preferred_element_type=jnp.float32)
    for p_ref in (p1_ref, p2_ref, p3_ref):
        acc = jnp.maximum(
            acc, jnp.dot(p_ref[...], w, preferred_element_type=jnp.float32)
        )
    o_ref[...] = jnp.maximum(acc + b_ref[...], 0.0).astype(o_ref.dtype)


def mlp_kernel(x_ref, w1_ref, b1_ref, w2_ref, b2_ref, o_ref):
    """Fused fc1 + ReLU + fc2 on one batch tile (bf16 MXU, f32 epilogues)."""
    h = jnp.dot(x_ref[...], w1_ref[...], preferred_element_type=jnp.float32)
    h = jnp.maximum(h + b1_ref[...], 0.0).astype(jnp.bfloat16)
    o_ref[...] = (
        jnp.dot(h, w2_ref[...], preferred_element_type=jnp.float32) + b2_ref[...]
    )


# -----------------------------------------------------------------------------
# Wrappers (glue: padding, im2col, pallas_call plumbing)
# -----------------------------------------------------------------------------
def _im2col_pool_quads(x_nhwc):
    """3x3 same-padded im2col, split into the 4 positions of a 2x2 pool window.

    Returns 4 arrays of shape (B*Ho*Wo, 9*Cin); column order is (dy, dx, cin),
    matching the flattened conv weight layout.
    """
    B, H, W, Cin = x_nhwc.shape
    Ho, Wo = H // 2, W // 2
    xp = jnp.pad(x_nhwc, ((0, 0), (1, 1), (1, 1), (0, 0)))
    shifts = [xp[:, dy:dy + H, dx:dx + W, :] for dy in range(3) for dx in range(3)]
    patches = jnp.concatenate(shifts, axis=-1)  # (B, H, W, 9*Cin)
    quads = []
    for pi in range(2):
        for pj in range(2):
            q = patches[:, pi::2, pj::2, :]     # (B, Ho, Wo, 9*Cin)
            quads.append(q.reshape(B * Ho * Wo, 9 * Cin))
    return quads, (B, Ho, Wo)


def conv_relu_pool(x_nhwc, w_flat, b, *, tile_n=512):
    """conv3x3(pad=1) -> ReLU -> maxpool2x2 for one layer (row-tiled grid)."""
    quads, (B, Ho, Wo) = _im2col_pool_quads(x_nhwc.astype(jnp.bfloat16))
    K, Cout = w_flat.shape
    N = B * Ho * Wo

    tile_n = min(tile_n, _round_up(N, 8))
    n_pad = _round_up(N, tile_n)
    if n_pad != N:
        quads = [jnp.pad(q, ((0, n_pad - N), (0, 0))) for q in quads]
    grid = (n_pad // tile_n,)

    row_spec = pl.BlockSpec((tile_n, K), lambda i: (i, 0))
    w_spec = pl.BlockSpec((K, Cout), lambda i: (0, 0))     # resident across grid
    b_spec = pl.BlockSpec((1, Cout), lambda i: (0, 0))     # resident across grid

    out = pl.pallas_call(
        conv_pool_relu_kernel,
        out_shape=jax.ShapeDtypeStruct((n_pad, Cout), jnp.bfloat16),
        grid=grid,
        in_specs=[row_spec] * 4 + [w_spec, b_spec],
        out_specs=pl.BlockSpec((tile_n, Cout), lambda i: (i, 0)),
        compiler_params=pltpu.CompilerParams(
            dimension_semantics=("parallel",),
            vmem_limit_bytes=_VMEM_LIMIT_BYTES,
        ),
    )(*quads, w_flat, b.reshape(1, Cout))
    return out[:N].reshape(B, Ho, Wo, Cout)


def mlp(x, w1, b1, w2, b2, *, tile_b=256):
    """fc1 -> ReLU -> fc2, tiled over the batch dimension."""
    B, D = x.shape
    H1 = w1.shape[1]
    D2 = w2.shape[1]

    tile_b = min(tile_b, _round_up(B, 8))
    b_pad = _round_up(B, tile_b)
    xb = x.astype(jnp.bfloat16)
    if b_pad != B:
        xb = jnp.pad(xb, ((0, b_pad - B), (0, 0)))
    grid = (b_pad // tile_b,)

    out = pl.pallas_call(
        mlp_kernel,
        out_shape=jax.ShapeDtypeStruct((b_pad, D2), jnp.float32),
        grid=grid,
        in_specs=[
            pl.BlockSpec((tile_b, D), lambda i: (i, 0)),
            pl.BlockSpec((D, H1), lambda i: (0, 0)),       # resident
            pl.BlockSpec((1, H1), lambda i: (0, 0)),       # resident
            pl.BlockSpec((H1, D2), lambda i: (0, 0)),      # resident
            pl.BlockSpec((1, D2), lambda i: (0, 0)),       # resident
        ],
        out_specs=pl.BlockSpec((tile_b, D2), lambda i: (i, 0)),
        compiler_params=pltpu.CompilerParams(
            dimension_semantics=("parallel",),
            vmem_limit_bytes=_VMEM_LIMIT_BYTES,
        ),
    )(xb, w1, b1.reshape(1, H1), w2, b2.reshape(1, D2))
    return out[:B]


# -----------------------------------------------------------------------------
# Parameter init (deterministic, PyTorch-shaped, rearranged for the kernels)
# -----------------------------------------------------------------------------
def init_params(key):
    ks = jax.random.split(key, 8)
    scale = 0.05
    # PyTorch shapes: conv (Cout, Cin, 3, 3); linear (out, in)
    conv1_w = scale * jax.random.normal(ks[0], (32, 1, 3, 3), jnp.float32)
    conv1_b = scale * jax.random.normal(ks[1], (32,), jnp.float32)
    conv2_w = scale * jax.random.normal(ks[2], (64, 32, 3, 3), jnp.float32)
    conv2_b = scale * jax.random.normal(ks[3], (64,), jnp.float32)
    fc1_w = scale * jax.random.normal(ks[4], (128, 64 * 7 * 7), jnp.float32)
    fc1_b = scale * jax.random.normal(ks[5], (128,), jnp.float32)
    fc2_w = scale * jax.random.normal(ks[6], (10, 128), jnp.float32)
    fc2_b = scale * jax.random.normal(ks[7], (10,), jnp.float32)

    def flatten_conv_w(w_oihw):
        # (Cout, Cin, 3, 3) -> (dy, dx, cin, cout) -> (9*Cin, Cout), bf16
        cout, cin = w_oihw.shape[0], w_oihw.shape[1]
        return jnp.transpose(w_oihw, (2, 3, 1, 0)).reshape(9 * cin, cout)

    # Fold PyTorch's NCHW flatten (c*49 + h*7 + w) into the fc1 weight so the
    # forward pass can consume the natural NHWC-flattened order (h, w, c).
    w1 = fc1_w.T                                   # (3136, 128), rows (c,h,w)
    w1 = (w1.reshape(64, 7, 7, 128)
            .transpose(1, 2, 0, 3)
            .reshape(64 * 7 * 7, 128))             # rows (h,w,c)

    return dict(
        conv1_w=flatten_conv_w(conv1_w).astype(jnp.bfloat16), conv1_b=conv1_b,
        conv2_w=flatten_conv_w(conv2_w).astype(jnp.bfloat16), conv2_b=conv2_b,
        fc1_w=w1.astype(jnp.bfloat16), fc1_b=fc1_b,            # (3136, 128)
        fc2_w=fc2_w.T.astype(jnp.bfloat16), fc2_b=fc2_b,       # (128, 10)
    )


# -----------------------------------------------------------------------------
# Forward pass (matches SimpleCNN.forward)
# -----------------------------------------------------------------------------
@jax.jit
def simple_cnn_forward(x_nchw, params):
    # NCHW (PyTorch) -> NHWC for the conv pipeline.
    x = jnp.transpose(x_nchw, (0, 2, 3, 1)).astype(jnp.float32)  # (B,28,28,1)
    x = conv_relu_pool(x, params["conv1_w"], params["conv1_b"])  # (B,14,14,32)
    x = conv_relu_pool(x, params["conv2_w"], params["conv2_b"])  # (B,7,7,64)
    # Flatten in NHWC order; the permutation to PyTorch's NCHW .view() order
    # is already folded into fc1_w at init (no per-forward transpose).
    B = x.shape[0]
    x = x.reshape(B, 64 * 7 * 7)
    return mlp(x, params["fc1_w"], params["fc1_b"],
               params["fc2_w"], params["fc2_b"])                  # (B, 10)


if __name__ == "__main__":
    key = jax.random.PRNGKey(0)
    k_x, k_p = jax.random.split(key)
    # fc1 expects 64*7*7 features, which pins the input to 1x28x28.
    x = jax.random.normal(k_x, (2, 1, 28, 28), jnp.float32)
    params = init_params(k_p)

    out = simple_cnn_forward(x, params)
    out = jax.block_until_ready(out)
    assert out.shape == (2, 10) and out.dtype == jnp.float32
    print("KERNEL_OK")
</pallas_src>

<mosaic_0001>
module attributes {stable_mosaic.version = 11 : i64} {
  func.func @conv_pool_relu_kernel(%arg0: i32, %arg1: memref<392x9xbf16, #tpu.memory_space<vmem>>, %arg2: memref<392x9xbf16, #tpu.memory_space<vmem>>, %arg3: memref<392x9xbf16, #tpu.memory_space<vmem>>, %arg4: memref<392x9xbf16, #tpu.memory_space<vmem>>, %arg5: memref<9x32xbf16, #tpu.memory_space<vmem>>, %arg6: memref<1x32xf32, #tpu.memory_space<vmem>>, %arg7: memref<392x32xbf16, #tpu.memory_space<vmem>>) attributes {dimension_semantics = [#tpu.dimension_semantics<parallel>], iteration_bounds = array<i64: 1>, scalar_prefetch = 0 : i64, scratch_operands = 0 : i64, tpu.core_type = #tpu.core_type<tc>, window_params = [{transform_indices = @transform_0, window_bounds = array<i64: 392, 9>}, {transform_indices = @transform_1, window_bounds = array<i64: 392, 9>}, {transform_indices = @transform_2, window_bounds = array<i64: 392, 9>}, {transform_indices = @transform_3, window_bounds = array<i64: 392, 9>}, {pipeline_mode = #tpu.pipeline_mode<synchronous>, transform_indices = @transform_4, window_bounds = array<i64: 9, 32>}, {pipeline_mode = #tpu.pipeline_mode<synchronous>, transform_indices = @transform_5, window_bounds = array<i64: 1, 32>}, {transform_indices = @transform_6, window_bounds = array<i64: 392, 32>}]} {
    %c0 = arith.constant 0 : index
    %c0_0 = arith.constant 0 : index
    %0 = vector.load %arg5[%c0, %c0_0] : memref<9x32xbf16, #tpu.memory_space<vmem>>, vector<9x32xbf16>
    %c0_1 = arith.constant 0 : index
    %c0_2 = arith.constant 0 : index
    %1 = vector.load %arg1[%c0_1, %c0_2] : memref<392x9xbf16, #tpu.memory_space<vmem>>, vector<392x9xbf16>
    %cst = arith.constant dense<0.000000e+00> : vector<392x32xf32>
    %2 = tpu.matmul %1, %0, %cst {dimension_numbers = #tpu.dot_dimension_numbers<[1], [0], [0], [1], [0, 0, 1, 1], [], []>} : vector<392x9xbf16>, vector<9x32xbf16>, vector<392x32xf32> -> vector<392x32xf32>
    %c0_3 = arith.constant 0 : index
    %c0_4 = arith.constant 0 : index
    %3 = vector.load %arg2[%c0_3, %c0_4] : memref<392x9xbf16, #tpu.memory_space<vmem>>, vector<392x9xbf16>
    %cst_5 = arith.constant dense<0.000000e+00> : vector<392x32xf32>
    %4 = tpu.matmul %3, %0, %cst_5 {dimension_numbers = #tpu.dot_dimension_numbers<[1], [0], [0], [1], [0, 0, 1, 1], [], []>} : vector<392x9xbf16>, vector<9x32xbf16>, vector<392x32xf32> -> vector<392x32xf32>
    %5 = arith.maximumf %2, %4 : vector<392x32xf32>
    %c0_6 = arith.constant 0 : index
    %c0_7 = arith.constant 0 : index
    %6 = vector.load %arg3[%c0_6, %c0_7] : memref<392x9xbf16, #tpu.memory_space<vmem>>, vector<392x9xbf16>
    %cst_8 = arith.constant dense<0.000000e+00> : vector<392x32xf32>
    %7 = tpu.matmul %6, %0, %cst_8 {dimension_numbers = #tpu.dot_dimension_numbers<[1], [0], [0], [1], [0, 0, 1, 1], [], []>} : vector<392x9xbf16>, vector<9x32xbf16>, vector<392x32xf32> -> vector<392x32xf32>
    %8 = arith.maximumf %5, %7 : vector<392x32xf32>
    %c0_9 = arith.constant 0 : index
    %c0_10 = arith.constant 0 : index
    %9 = vector.load %arg4[%c0_9, %c0_10] : memref<392x9xbf16, #tpu.memory_space<vmem>>, vector<392x9xbf16>
    %cst_11 = arith.constant dense<0.000000e+00> : vector<392x32xf32>
    %10 = tpu.matmul %9, %0, %cst_11 {dimension_numbers = #tpu.dot_dimension_numbers<[1], [0], [0], [1], [0, 0, 1, 1], [], []>} : vector<392x9xbf16>, vector<9x32xbf16>, vector<392x32xf32> -> vector<392x32xf32>
    %11 = arith.maximumf %8, %10 : vector<392x32xf32>
    %c0_12 = arith.constant 0 : index
    %c0_13 = arith.constant 0 : index
    %12 = vector.load %arg6[%c0_12, %c0_13] : memref<1x32xf32, #tpu.memory_space<vmem>>, vector<1x32xf32>
    %13 = vector.broadcast %12 : vector<1x32xf32> to vector<392x32xf32>
    %14 = arith.addf %11, %13 : vector<392x32xf32>
    %cst_14 = arith.constant 0.000000e+00 : f32
    %15 = vector.broadcast %cst_14 : f32 to vector<392x32xf32>
    %16 = arith.maximumf %14, %15 : vector<392x32xf32>
    %17 = arith.truncf %16 : vector<392x32xf32> to vector<392x32xbf16>
    %c0_15 = arith.constant 0 : index
    %c0_16 = arith.constant 0 : index
    %18 = vector.load %arg7[%c0_15, %c0_16] : memref<392x32xbf16, #tpu.memory_space<vmem>>, vector<392x32xbf16>
    tpu.vector_store %arg7[%c0_15, %c0_16], %17 {strides = array<i32>} : memref<392x32xbf16, #tpu.memory_space<vmem>>, vector<392x32xbf16>,
    return
  }
  func.func @transform_0(%arg0: i32) -> (i32, i32) {
    %c0_i32 = arith.constant 0 : i32
    %c0_i32_0 = arith.constant 0 : i32
    return %arg0, %c0_i32 : i32, i32
  }
  func.func @transform_1(%arg0: i32) -> (i32, i32) {
    %c0_i32 = arith.constant 0 : i32
    %c0_i32_0 = arith.constant 0 : i32
    return %arg0, %c0_i32 : i32, i32
  }
  func.func @transform_2(%arg0: i32) -> (i32, i32) {
    %c0_i32 = arith.constant 0 : i32
    %c0_i32_0 = arith.constant 0 : i32
    return %arg0, %c0_i32 : i32, i32
  }
  func.func @transform_3(%arg0: i32) -> (i32, i32) {
    %c0_i32 = arith.constant 0 : i32
    %c0_i32_0 = arith.constant 0 : i32
    return %arg0, %c0_i32 : i32, i32
  }
  func.func @transform_4(%arg0: i32) -> (i32, i32) {
    %c0_i32 = arith.constant 0 : i32
    %c0_i32_0 = arith.constant 0 : i32
    %c0_i32_1 = arith.constant 0 : i32
    return %c0_i32, %c0_i32_0 : i32, i32
  }
  func.func @transform_5(%arg0: i32) -> (i32, i32) {
    %c0_i32 = arith.constant 0 : i32
    %c0_i32_0 = arith.constant 0 : i32
    %c0_i32_1 = arith.constant 0 : i32
    return %c0_i32, %c0_i32_0 : i32, i32
  }
  func.func @transform_6(%arg0: i32) -> (i32, i32) {
    %c0_i32 = arith.constant 0 : i32
    %c0_i32_0 = arith.constant 0 : i32
    return %arg0, %c0_i32 : i32, i32
  }
}

module attributes {stable_mosaic.version = 11 : i64} {
  func.func @conv_pool_relu_kernel(%arg0: i32, %arg1: memref<104x288xbf16, #tpu.memory_space<vmem>>, %arg2: memref<104x288xbf16, #tpu.memory_space<vmem>>, %arg3: memref<104x288xbf16, #tpu.memory_space<vmem>>, %arg4: memref<104x288xbf16, #tpu.memory_space<vmem>>, %arg5: memref<288x64xbf16, #tpu.memory_space<vmem>>, %arg6: memref<1x64xf32, #tpu.memory_space<vmem>>, %arg7: memref<104x64xbf16, #tpu.memory_space<vmem>>) attributes {dimension_semantics = [#tpu.dimension_semantics<parallel>], iteration_bounds = array<i64: 1>, scalar_prefetch = 0 : i64, scratch_operands = 0 : i64, tpu.core_type = #tpu.core_type<tc>, window_params = [{transform_indices = @transform_0, window_bounds = array<i64: 104, 288>}, {transform_indices = @transform_1, window_bounds = array<i64: 104, 288>}, {transform_indices = @transform_2, window_bounds = array<i64: 104, 288>}, {transform_indices = @transform_3, window_bounds = array<i64: 104, 288>}, {pipeline_mode = #tpu.pipeline_mode<synchronous>, transform_indices = @transform_4, window_bounds = array<i64: 288, 64>}, {pipeline_mode = #tpu.pipeline_mode<synchronous>, transform_indices = @transform_5, window_bounds = array<i64: 1, 64>}, {transform_indices = @transform_6, window_bounds = array<i64: 104, 64>}]} {
    %c0 = arith.constant 0 : index
    %c0_0 = arith.constant 0 : index
    %0 = vector.load %arg5[%c0, %c0_0] : memref<288x64xbf16, #tpu.memory_space<vmem>>, vector<288x64xbf16>
    %c0_1 = arith.constant 0 : index
    %c0_2 = arith.constant 0 : index
    %1 = vector.load %arg1[%c0_1, %c0_2] : memref<104x288xbf16, #tpu.memory_space<vmem>>, vector<104x288xbf16>
    %cst = arith.constant dense<0.000000e+00> : vector<104x64xf32>
    %2 = tpu.matmul %1, %0, %cst {dimension_numbers = #tpu.dot_dimension_numbers<[1], [0], [0], [1], [0, 0, 1, 1], [], []>} : vector<104x288xbf16>, vector<288x64xbf16>, vector<104x64xf32> -> vector<104x64xf32>
    %c0_3 = arith.constant 0 : index
    %c0_4 = arith.constant 0 : index
    %3 = vector.load %arg2[%c0_3, %c0_4] : memref<104x288xbf16, #tpu.memory_space<vmem>>, vector<104x288xbf16>
    %cst_5 = arith.constant dense<0.000000e+00> : vector<104x64xf32>
    %4 = tpu.matmul %3, %0, %cst_5 {dimension_numbers = #tpu.dot_dimension_numbers<[1], [0], [0], [1], [0, 0, 1, 1], [], []>} : vector<104x288xbf16>, vector<288x64xbf16>, vector<104x64xf32> -> vector<104x64xf32>
    %5 = arith.maximumf %2, %4 : vector<104x64xf32>
    %c0_6 = arith.constant 0 : index
    %c0_7 = arith.constant 0 : index
    %6 = vector.load %arg3[%c0_6, %c0_7] : memref<104x288xbf16, #tpu.memory_space<vmem>>, vector<104x288xbf16>
    %cst_8 = arith.constant dense<0.000000e+00> : vector<104x64xf32>
    %7 = tpu.matmul %6, %0, %cst_8 {dimension_numbers = #tpu.dot_dimension_numbers<[1], [0], [0], [1], [0, 0, 1, 1], [], []>} : vector<104x288xbf16>, vector<288x64xbf16>, vector<104x64xf32> -> vector<104x64xf32>
    %8 = arith.maximumf %5, %7 : vector<104x64xf32>
    %c0_9 = arith.constant 0 : index
    %c0_10 = arith.constant 0 : index
    %9 = vector.load %arg4[%c0_9, %c0_10] : memref<104x288xbf16, #tpu.memory_space<vmem>>, vector<104x288xbf16>
    %cst_11 = arith.constant dense<0.000000e+00> : vector<104x64xf32>
    %10 = tpu.matmul %9, %0, %cst_11 {dimension_numbers = #tpu.dot_dimension_numbers<[1], [0], [0], [1], [0, 0, 1, 1], [], []>} : vector<104x288xbf16>, vector<288x64xbf16>, vector<104x64xf32> -> vector<104x64xf32>
    %11 = arith.maximumf %8, %10 : vector<104x64xf32>
    %c0_12 = arith.constant 0 : index
    %c0_13 = arith.constant 0 : index
    %12 = vector.load %arg6[%c0_12, %c0_13] : memref<1x64xf32, #tpu.memory_space<vmem>>, vector<1x64xf32>
    %13 = vector.broadcast %12 : vector<1x64xf32> to vector<104x64xf32>
    %14 = arith.addf %11, %13 : vector<104x64xf32>
    %cst_14 = arith.constant 0.000000e+00 : f32
    %15 = vector.broadcast %cst_14 : f32 to vector<104x64xf32>
    %16 = arith.maximumf %14, %15 : vector<104x64xf32>
    %17 = arith.truncf %16 : vector<104x64xf32> to vector<104x64xbf16>
    %c0_15 = arith.constant 0 : index
    %c0_16 = arith.constant 0 : index
    %18 = vector.load %arg7[%c0_15, %c0_16] : memref<104x64xbf16, #tpu.memory_space<vmem>>, vector<104x64xbf16>
    tpu.vector_store %arg7[%c0_15, %c0_16], %17 {strides = array<i32>} : memref<104x64xbf16, #tpu.memory_space<vmem>>, vector<104x64xbf16>,
    return
  }
  func.func @transform_0(%arg0: i32) -> (i32, i32) {
    %c0_i32 = arith.constant 0 : i32
    %c0_i32_0 = arith.constant 0 : i32
    return %arg0, %c0_i32 : i32, i32
  }
  func.func @transform_1(%arg0: i32) -> (i32, i32) {
    %c0_i32 = arith.constant 0 : i32
    %c0_i32_0 = arith.constant 0 : i32
    return %arg0, %c0_i32 : i32, i32
  }
  func.func @transform_2(%arg0: i32) -> (i32, i32) {
    %c0_i32 = arith.constant 0 : i32
    %c0_i32_0 = arith.constant 0 : i32
    return %arg0, %c0_i32 : i32, i32
  }
  func.func @transform_3(%arg0: i32) -> (i32, i32) {
    %c0_i32 = arith.constant 0 : i32
    %c0_i32_0 = arith.constant 0 : i32
    return %arg0, %c0_i32 : i32, i32
  }
  func.func @transform_4(%arg0: i32) -> (i32, i32) {
    %c0_i32 = arith.constant 0 : i32
    %c0_i32_0 = arith.constant 0 : i32
    %c0_i32_1 = arith.constant 0 : i32
    return %c0_i32, %c0_i32_0 : i32, i32
  }
  func.func @transform_5(%arg0: i32) -> (i32, i32) {
    %c0_i32 = arith.constant 0 : i32
    %c0_i32_0 = arith.constant 0 : i32
    %c0_i32_1 = arith.constant 0 : i32
    return %c0_i32, %c0_i32_0 : i32, i32
  }
  func.func @transform_6(%arg0: i32) -> (i32, i32) {
    %c0_i32 = arith.constant 0 : i32
    %c0_i32_0 = arith.constant 0 : i32
    return %arg0, %c0_i32 : i32, i32
  }
}

module attributes {stable_mosaic.version = 11 : i64} {
  func.func @mlp_kernel(%arg0: i32, %arg1: memref<8x3136xbf16, #tpu.memory_space<vmem>>, %arg2: memref<3136x128xbf16, #tpu.memory_space<vmem>>, %arg3: memref<1x128xf32, #tpu.memory_space<vmem>>, %arg4: memref<128x10xbf16, #tpu.memory_space<vmem>>, %arg5: memref<1x10xf32, #tpu.memory_space<vmem>>, %arg6: memref<8x10xf32, #tpu.memory_space<vmem>>) attributes {dimension_semantics = [#tpu.dimension_semantics<parallel>], iteration_bounds = array<i64: 1>, scalar_prefetch = 0 : i64, scratch_operands = 0 : i64, tpu.core_type = #tpu.core_type<tc>, window_params = [{transform_indices = @transform_0, window_bounds = array<i64: 8, 3136>}, {pipeline_mode = #tpu.pipeline_mode<synchronous>, transform_indices = @transform_1, window_bounds = array<i64: 3136, 128>}, {pipeline_mode = #tpu.pipeline_mode<synchronous>, transform_indices = @transform_2, window_bounds = array<i64: 1, 128>}, {pipeline_mode = #tpu.pipeline_mode<synchronous>, transform_indices = @transform_3, window_bounds = array<i64: 128, 10>}, {pipeline_mode = #tpu.pipeline_mode<synchronous>, transform_indices = @transform_4, window_bounds = array<i64: 1, 10>}, {transform_indices = @transform_5, window_bounds = array<i64: 8, 10>}]} {
    %c0 = arith.constant 0 : index
    %c0_0 = arith.constant 0 : index
    %0 = vector.load %arg1[%c0, %c0_0] : memref<8x3136xbf16, #tpu.memory_space<vmem>>, vector<8x3136xbf16>
    %c0_1 = arith.constant 0 : index
    %c0_2 = arith.constant 0 : index
    %1 = vector.load %arg2[%c0_1, %c0_2] : memref<3136x128xbf16, #tpu.memory_space<vmem>>, vector<3136x128xbf16>
    %cst = arith.constant dense<0.000000e+00> : vector<8x128xf32>
    %2 = tpu.matmul %0, %1, %cst {dimension_numbers = #tpu.dot_dimension_numbers<[1], [0], [0], [1], [0, 0, 1, 1], [], []>} : vector<8x3136xbf16>, vector<3136x128xbf16>, vector<8x128xf32> -> vector<8x128xf32>
    %c0_3 = arith.constant 0 : index
    %c0_4 = arith.constant 0 : index
    %3 = vector.load %arg3[%c0_3, %c0_4] : memref<1x128xf32, #tpu.memory_space<vmem>>, vector<1x128xf32>
    %4 = vector.broadcast %3 : vector<1x128xf32> to vector<8x128xf32>
    %5 = arith.addf %2, %4 : vector<8x128xf32>
    %cst_5 = arith.constant 0.000000e+00 : f32
    %6 = vector.broadcast %cst_5 : f32 to vector<8x128xf32>
    %7 = arith.maximumf %5, %6 : vector<8x128xf32>
    %8 = arith.truncf %7 : vector<8x128xf32> to vector<8x128xbf16>
    %c0_6 = arith.constant 0 : index
    %c0_7 = arith.constant 0 : index
    %9 = vector.load %arg4[%c0_6, %c0_7] : memref<128x10xbf16, #tpu.memory_space<vmem>>, vector<128x10xbf16>
    %cst_8 = arith.constant dense<0.000000e+00> : vector<8x10xf32>
    %10 = tpu.matmul %8, %9, %cst_8 {dimension_numbers = #tpu.dot_dimension_numbers<[1], [0], [0], [1], [0, 0, 1, 1], [], []>} : vector<8x128xbf16>, vector<128x10xbf16>, vector<8x10xf32> -> vector<8x10xf32>
    %c0_9 = arith.constant 0 : index
    %c0_10 = arith.constant 0 : index
    %11 = vector.load %arg5[%c0_9, %c0_10] : memref<1x10xf32, #tpu.memory_space<vmem>>, vector<1x10xf32>
    %12 = vector.broadcast %11 : vector<1x10xf32> to vector<8x10xf32>
    %13 = arith.addf %10, %12 : vector<8x10xf32>
    %c0_11 = arith.constant 0 : index
    %c0_12 = arith.constant 0 : index
    %14 = vector.load %arg6[%c0_11, %c0_12] : memref<8x10xf32, #tpu.memory_space<vmem>>, vector<8x10xf32>
    tpu.vector_store %arg6[%c0_11, %c0_12], %13 {strides = array<i32>} : memref<8x10xf32, #tpu.memory_space<vmem>>, vector<8x10xf32>,
    return
  }
  func.func @transform_0(%arg0: i32) -> (i32, i32) {
    %c0_i32 = arith.constant 0 : i32
    %c0_i32_0 = arith.constant 0 : i32
    return %arg0, %c0_i32 : i32, i32
  }
  func.func @transform_1(%arg0: i32) -> (i32, i32) {
    %c0_i32 = arith.constant 0 : i32
    %c0_i32_0 = arith.constant 0 : i32
    %c0_i32_1 = arith.constant 0 : i32
    return %c0_i32, %c0_i32_0 : i32, i32
  }
  func.func @transform_2(%arg0: i32) -> (i32, i32) {
    %c0_i32 = arith.constant 0 : i32
    %c0_i32_0 = arith.constant 0 : i32
    %c0_i32_1 = arith.constant 0 : i32
    return %c0_i32, %c0_i32_0 : i32, i32
  }
  func.func @transform_3(%arg0: i32) -> (i32, i32) {
    %c0_i32 = arith.constant 0 : i32
    %c0_i32_0 = arith.constant 0 : i32
    %c0_i32_1 = arith.constant 0 : i32
    return %c0_i32, %c0_i32_0 : i32, i32
  }
  func.func @transform_4(%arg0: i32) -> (i32, i32) {
    %c0_i32 = arith.constant 0 : i32
    %c0_i32_0 = arith.constant 0 : i32
    %c0_i32_1 = arith.constant 0 : i32
    return %c0_i32, %c0_i32_0 : i32, i32
  }
  func.func @transform_5(%arg0: i32) -> (i32, i32) {
    %c0_i32 = arith.constant 0 : i32
    %c0_i32_0 = arith.constant 0 : i32
    return %arg0, %c0_i32 : i32, i32
  }
}

</mosaic_0001>

<bundles_post_ra>
// kernel: simple_cnn_forward.3
= control target key start
LH: loop header
LB: loop body
LE: loop exit
PB: predicated region body
PF: predicated region fallthrough
CT: control target
= control target key end

     0   :  { %vm279_vm0 = vcmask 1043456   ;;  %vm280_vm1 = vcmask 1044480   ;;  %v4717_v0 = vmov 0.0   ;;  %v3375_v2 = vmov 65535   ;;  %s4710_s4 = inlined_call_operand.vmem [shape: bf16[9,32], index: 4, kind: input, shape index: {}]   ;;  %s4711_s0 = inlined_call_operand.vmem [shape: bf16[392,9], index: 0, kind: input, shape index: {}]   ;;  %s4712_s1 = inlined_call_operand.vmem [shape: bf16[392,9], index: 1, kind: input, shape index: {}]   ;;  %s4713_s2 = inlined_call_operand.vmem [shape: bf16[392,9], index: 2, kind: input, shape index: {}]   ;;  %s4714_s3 = inlined_call_operand.vmem [shape: bf16[392,9], index: 3, kind: input, shape index: {}]   ;;  %s4715_s5 = inlined_call_operand.vmem [shape: f32[1,32], index: 5, kind: input, shape index: {}]   ;;  %s4716_s6 = inlined_call_operand.vmem [shape: bf16[392,32], index: 6, kind: output, shape index: {}]  }
   0x1   :  { %2862 = vmatprep.subr.bf16.mxu0 %v4717_v0  ;;  %2964 = vmatprep.subr.bf16.mxu1 %v4717_v0  ;;  %v3273_v1 = vld [vmem:[%s4710_s4] sm:$0x1f]   ;;  %v281_v3 = vsel %vm279_vm0, 4294967295, %v3375_v2  ;;  %vm3376_vm2 = vmmov 0   ;;  %vm203_vm3 = vcmask 72704   ;;  %v3276_v8 = vld [vmem:[%s4711_s0 + $0x8] sm:$0xff]  }
   0x2   :  { %v282_v4 = vsel %vm280_vm1, %v281_v3, 0  ;;  %2864 = vmatprep.mubr.msk.bf16.mxu0 %vm3376_vm2, %v4717_v0  ;;  %2966 = vmatprep.mubr.msk.bf16.mxu1 %vm3376_vm2, %v4717_v0  ;;  %v3274_v5 = vld [vmem:[%s4711_s0] sm:$0xff]   ;;  %v3277_v9 = vld [vmem:[%s4712_s1 + $0x8] sm:$0xff]   ;;  %v3278_v10 = vld [vmem:[%s4711_s0 + $0x10] sm:$0xff]   ;;  %vm2404_vm4 = vcmask 257024  }
   0x3   :  { %v284_v6 = vand.u32 %v3273_v1, %v282_v4  ;;  %v3275_v7 = vld [vmem:[%s4712_s1] sm:$0xff]   ;;  %v3279_v11 = vld [vmem:[%s4712_s1 + $0x10] sm:$0xff]   ;;  %v3280_v12 = vld [vmem:[%s4711_s0 + $0x18] sm:$0xff]  }
   0x4   :  { %v3281_v13 = vld [vmem:[%s4712_s1 + $0x18] sm:$0xff]   ;;  %v3282_v14 = vld [vmem:[%s4711_s0 + $0x20] sm:$0xff]   ;;  %v3284_v16 = vld [vmem:[%s4711_s0 + $0x28] sm:$0xff]  }
   0x5   :  { %2863 = vmatpush3.bf16.msra.mxu0 %v284_v6  ;;  %2965 = vmatpush3.bf16.msra.mxu1 %v284_v6  ;;  %v3283_v15 = vld [vmem:[%s4712_s1 + $0x20] sm:$0xff]   ;;  %v3285_v17 = vld [vmem:[%s4712_s1 + $0x28] sm:$0xff]   ;;  %v3286_v18 = vld [vmem:[%s4711_s0 + $0x30] sm:$0xff]  }
   0x6   :  { %3066 = vmatprep.subr.bf16.mxu0 %v4717_v0  ;;  %3168 = vmatprep.subr.bf16.mxu1 %v4717_v0  ;;  %v3287_v19 = vld [vmem:[%s4712_s1 + $0x30] sm:$0xff]   ;;  %v3288_v20 = vld [vmem:[%s4711_s0 + $0x38] sm:$0xff]   ;;  %v3290_v22 = vld [vmem:[%s4711_s0 + $0x40] sm:$0xff]  }
   0x7   :  { %v3289_v21 = vld [vmem:[%s4712_s1 + $0x38] sm:$0xff]   ;;  %v3291_v23 = vld [vmem:[%s4712_s1 + $0x40] sm:$0xff]   ;;  %v3292_v24 = vld [vmem:[%s4711_s0 + $0x48] sm:$0xff]  }
   0x8   :  { %2865 = vmatmul.mubr.msk.bf16.vlgmr.msra.gmra.mrb[0].mxu0 %vm203_vm3, %v3274_v5  ;;  %2967 = vmatmul.mubr.msk.bf16.vlgmr.msra.gmra.mrb[0].mxu1 %vm203_vm3, %v3275_v7  ;;  %v3293_v25 = vld [vmem:[%s4712_s1 + $0x48] sm:$0xff]   ;;  %v3294_v26 = vld [vmem:[%s4711_s0 + $0x50] sm:$0xff]   ;;  %v3296_v28 = vld [vmem:[%s4711_s0 + $0x58] sm:$0xff]  }
   0x9   :  { %3067 = vmatpush3.bf16.msra.mxu0 %v284_v6  ;;  %3169 = vmatpush3.bf16.msra.mxu1 %v284_v6  ;;  %v3295_v27 = vld [vmem:[%s4712_s1 + $0x50] sm:$0xff]   ;;  %v3297_v29 = vld [vmem:[%s4712_s1 + $0x58] sm:$0xff]   ;;  %v3298_v30 = vld [vmem:[%s4711_s0 + $0x60] sm:$0xff]  }
   0xa   :  { %2868 = vmatprep.mubr.msk.bf16.mxu0 %vm3376_vm2, %v4717_v0  ;;  %2970 = vmatprep.mubr.msk.bf16.mxu1 %vm3376_vm2, %v4717_v0  ;;  %v3299_v31 = vld [vmem:[%s4712_s1 + $0x60] sm:$0xff]   ;;  %v3300_v32 = vld [vmem:[%s4711_s0 + $0x68] sm:$0xff]   ;;  %v3302_v34 = vld [vmem:[%s4711_s0 + $0x70] sm:$0xff]  }
   0xb   :  { %v3301_v33 = vld [vmem:[%s4712_s1 + $0x68] sm:$0xff]   ;;  %v3303_v35 = vld [vmem:[%s4712_s1 + $0x70] sm:$0xff]   ;;  %v3304_v36 = vld [vmem:[%s4711_s0 + $0x78] sm:$0xff]  }
   0xc   :  { %v3305_v37 = vld [vmem:[%s4712_s1 + $0x78] sm:$0xff]   ;;  %v3306_v38 = vld [vmem:[%s4711_s0 + $0x80] sm:$0xff]   ;;  %v3308_v40 = vld [vmem:[%s4711_s0 + $0x88] sm:$0xff]  }
   0xd   :  { %v3307_v39 = vld [vmem:[%s4712_s1 + $0x80] sm:$0xff]   ;;  %v3309_v41 = vld [vmem:[%s4712_s1 + $0x88] sm:$0xff]   ;;  %v3310_v42 = vld [vmem:[%s4711_s0 + $0x90] sm:$0xff]  }
   0xe   :  { %v3311_v43 = vld [vmem:[%s4712_s1 + $0x90] sm:$0xff]   ;;  %v3312_v44 = vld [vmem:[%s4711_s0 + $0x98] sm:$0xff]   ;;  %v3314_v46 = vld [vmem:[%s4711_s0 + $0xa0] sm:$0xff]  }
   0xf   :  { %v3313_v45 = vld [vmem:[%s4712_s1 + $0x98] sm:$0xff]   ;;  %v3315_v47 = vld [vmem:[%s4712_s1 + $0xa0] sm:$0xff]   ;;  %v3316_v48 = vld [vmem:[%s4711_s0 + $0xa8] sm:$0xff]  }
  0x10   :  { %2869 = vmatmul.mubr.msk.bf16.gmra.mrb[4].mxu0 %vm203_vm3, %v3276_v8  ;;  %2971 = vmatmul.mubr.msk.bf16.gmra.mrb[4].mxu1 %vm203_vm3, %v3277_v9  ;;  %v3317_v49 = vld [vmem:[%s4712_s1 + $0xa8] sm:$0xff]   ;;  %v3318_v50 = vld [vmem:[%s4711_s0 + $0xb0] sm:$0xff]   ;;  %v3320_v52 = vld [vmem:[%s4711_s0 + $0xb8] sm:$0xff]  }
  0x11   :  { %2872 = vmatprep.mubr.msk.bf16.mxu0 %vm3376_vm2, %v4717_v0  ;;  %2974 = vmatprep.mubr.msk.bf16.mxu1 %vm3376_vm2, %v4717_v0  ;;  %v3319_v51 = vld [vmem:[%s4712_s1 + $0xb0] sm:$0xff]   ;;  %v3321_v53 = vld [vmem:[%s4712_s1 + $0xb8] sm:$0xff]   ;;  %v3322_v54 = vld [vmem:[%s4711_s0 + $0xc0] ss:$0 sps:$4 sm:$0xff]  }
  0x12   :  { %v3323_v55 = vld [vmem:[%s4712_s1 + $0xc0] ss:$0 sps:$4 sm:$0xff]   ;;  %v3326_v58 = vld [vmem:[%s4713_s2 + $0x8] sm:$0xff]   ;;  %v3328_v2 = vld [vmem:[%s4713_s2 + $0x10] sm:$0xff]  }
  0x13   :  { %v3324_v56 = vld [vmem:[%s4713_s2] sm:$0xff]   ;;  %v3327_v59 = vld [vmem:[%s4714_s3 + $0x8] sm:$0xff]   ;;  %v3329_v3 = vld [vmem:[%s4714_s3 + $0x10] sm:$0xff]  }
  0x14   :  { %v3325_v57 = vld [vmem:[%s4714_s3] sm:$0xff]  }
  0x18   :  { %2873 = vmatmul.mubr.msk.bf16.gmra.mrb[8].mxu0 %vm203_vm3, %v3278_v10  ;;  %2975 = vmatmul.mubr.msk.bf16.gmra.mrb[8].mxu1 %vm203_vm3, %v3279_v11 }
  0x19   :  { %2876 = vmatprep.mubr.msk.bf16.mxu0 %vm3376_vm2, %v4717_v0  ;;  %2978 = vmatprep.mubr.msk.bf16.mxu1 %vm3376_vm2, %v4717_v0 }
  0x20   :  { %2877 = vmatmul.mubr.msk.bf16.gmra.mrb[12].mxu0 %vm203_vm3, %v3280_v12  ;;  %2979 = vmatmul.mubr.msk.bf16.gmra.mrb[12].mxu1 %vm203_vm3, %v3281_v13 }
  0x21   :  { %2880 = vmatprep.mubr.msk.bf16.mxu0 %vm3376_vm2, %v4717_v0  ;;  %2982 = vmatprep.mubr.msk.bf16.mxu1 %vm3376_vm2, %v4717_v0 }
  0x28   :  { %2881 = vmatmul.mubr.msk.bf16.gmra.mrb[16].mxu0 %vm203_vm3, %v3282_v14  ;;  %2983 = vmatmul.mubr.msk.bf16.gmra.mrb[16].mxu1 %vm203_vm3, %v3283_v15  ;;  %v3330_v14 = vld [vmem:[%s4713_s2 + $0x18] sm:$0xff]  }
  0x29   :  { %2884 = vmatprep.mubr.msk.bf16.mxu0 %vm3376_vm2, %v4717_v0  ;;  %2986 = vmatprep.mubr.msk.bf16.mxu1 %vm3376_vm2, %v4717_v0  ;;  %v3331_v15 = vld [vmem:[%s4714_s3 + $0x18] sm:$0xff]  }
  0x30   :  { %2885 = vmatmul.mubr.msk.bf16.gmra.mrb[20].mxu0 %vm203_vm3, %v3284_v16  ;;  %2987 = vmatmul.mubr.msk.bf16.gmra.mrb[20].mxu1 %vm203_vm3, %v3285_v17 }
  0x31   :  { %2888 = vmatprep.mubr.msk.bf16.mxu0 %vm3376_vm2, %v4717_v0  ;;  %2990 = vmatprep.mubr.msk.bf16.mxu1 %vm3376_vm2, %v4717_v0 }
  0x38   :  { %2889 = vmatmul.mubr.msk.bf16.gmra.mrb[24].mxu0 %vm203_vm3, %v3286_v18  ;;  %2991 = vmatmul.mubr.msk.bf16.gmra.mrb[24].mxu1 %vm203_vm3, %v3287_v19 }
  0x39   :  { %2892 = vmatprep.mubr.msk.bf16.mxu0 %vm3376_vm2, %v4717_v0  ;;  %2994 = vmatprep.mubr.msk.bf16.mxu1 %vm3376_vm2, %v4717_v0 }
  0x40   :  { %2893 = vmatmul.mubr.msk.bf16.gmra.mrb[28].mxu0 %vm203_vm3, %v3288_v20  ;;  %2995 = vmatmul.mubr.msk.bf16.gmra.mrb[28].mxu1 %vm203_vm3, %v3289_v21 }
  0x41   :  { %2896 = vmatprep.mubr.msk.bf16.mxu0 %vm3376_vm2, %v4717_v0  ;;  %2998 = vmatprep.mubr.msk.bf16.mxu1 %vm3376_vm2, %v4717_v0 }
  0x48   :  { %2897 = vmatmul.mubr.msk.bf16.gmra.mrb[32].mxu0 %vm203_vm3, %v3290_v22  ;;  %2999 = vmatmul.mubr.msk.bf16.gmra.mrb[32].mxu1 %vm203_vm3, %v3291_v23 }
  0x49   :  { %2900 = vmatprep.mubr.msk.bf16.mxu0 %vm3376_vm2, %v4717_v0  ;;  %3002 = vmatprep.mubr.msk.bf16.mxu1 %vm3376_vm2, %v4717_v0 }
  0x50   :  { %2901 = vmatmul.mubr.msk.bf16.gmra.mrb[36].mxu0 %vm203_vm3, %v3292_v24  ;;  %3003 = vmatmul.mubr.msk.bf16.gmra.mrb[36].mxu1 %vm203_vm3, %v3293_v25 }
  0x51   :  { %2904 = vmatprep.mubr.msk.bf16.mxu0 %vm3376_vm2, %v4717_v0  ;;  %3006 = vmatprep.mubr.msk.bf16.mxu1 %vm3376_vm2, %v4717_v0 }
  0x58   :  { %2905 = vmatmul.mubr.msk.bf16.gmra.mrb[40].mxu0 %vm203_vm3, %v3294_v26  ;;  %3007 = vmatmul.mubr.msk.bf16.gmra.mrb[40].mxu1 %vm203_vm3, %v3295_v27  ;;  %v3332_v26 = vld [vmem:[%s4713_s2 + $0x20] sm:$0xff]  }
  0x59   :  { %2908 = vmatprep.mubr.msk.bf16.mxu0 %vm3376_vm2, %v4717_v0  ;;  %3010 = vmatprep.mubr.msk.bf16.mxu1 %vm3376_vm2, %v4717_v0  ;;  %v3333_v27 = vld [vmem:[%s4714_s3 + $0x20] sm:$0xff]  }
  0x60   :  { %2909 = vmatmul.mubr.msk.bf16.gmra.mrb[44].mxu0 %vm203_vm3, %v3296_v28  ;;  %3011 = vmatmul.mubr.msk.bf16.gmra.mrb[44].mxu1 %vm203_vm3, %v3297_v29 }
  0x61   :  { %2912 = vmatprep.mubr.msk.bf16.mxu0 %vm3376_vm2, %v4717_v0  ;;  %3014 = vmatprep.mubr.msk.bf16.mxu1 %vm3376_vm2, %v4717_v0 }
  0x68   :  { %2913 = vmatmul.mubr.msk.bf16.gmra.mrb[48].mxu0 %vm203_vm3, %v3298_v30  ;;  %3015 = vmatmul.mubr.msk.bf16.gmra.mrb[48].mxu1 %vm203_vm3, %v3299_v31 }
  0x69   :  { %2916 = vmatprep.mubr.msk.bf16.mxu0 %vm3376_vm2, %v4717_v0  ;;  %3018 = vmatprep.mubr.msk.bf16.mxu1 %vm3376_vm2, %v4717_v0 }
  0x70   :  { %2917 = vmatmul.mubr.msk.bf16.gmra.mrb[52].mxu0 %vm203_vm3, %v3300_v32  ;;  %3019 = vmatmul.mubr.msk.bf16.gmra.mrb[52].mxu1 %vm203_vm3, %v3301_v33 }
  0x71   :  { %2920 = vmatprep.mubr.msk.bf16.mxu0 %vm3376_vm2, %v4717_v0  ;;  %3022 = vmatprep.mubr.msk.bf16.mxu1 %vm3376_vm2, %v4717_v0 }
  0x78   :  { %2921 = vmatmul.mubr.msk.bf16.gmra.mrb[56].mxu0 %vm203_vm3, %v3302_v34  ;;  %3023 = vmatmul.mubr.msk.bf16.gmra.mrb[56].mxu1 %vm203_vm3, %v3303_v35 }
  0x79   :  { %2924 = vmatprep.mubr.msk.bf16.mxu0 %vm3376_vm2, %v4717_v0  ;;  %3026 = vmatprep.mubr.msk.bf16.mxu1 %vm3376_vm2, %v4717_v0 }
  0x80   :  { %2925 = vmatmul.mubr.msk.bf16.gmra.mrb[60].mxu0 %vm203_vm3, %v3304_v36  ;;  %3027 = vmatmul.mubr.msk.bf16.gmra.mrb[60].mxu1 %vm203_vm3, %v3305_v37 }
  0x81   :  { %2928 = vmatprep.mubr.msk.bf16.mxu0 %vm3376_vm2, %v4717_v0  ;;  %3030 = vmatprep.mubr.msk.bf16.mxu1 %vm3376_vm2, %v4717_v0 }
  0x88   :  { %2929 = vmatmul.mubr.msk.bf16.gmra.mrb[64].mxu0 %vm203_vm3, %v3306_v38  ;;  %3031 = vmatmul.mubr.msk.bf16.gmra.mrb[64].mxu1 %vm203_vm3, %v3307_v39  ;;  %v3334_v38 = vld [vmem:[%s4713_s2 + $0x28] sm:$0xff]  }
  0x89   :  { %2932 = vmatprep.mubr.msk.bf16.mxu0 %vm3376_vm2, %v4717_v0  ;;  %3034 = vmatprep.mubr.msk.bf16.mxu1 %vm3376_vm2, %v4717_v0  ;;  %v3335_v39 = vld [vmem:[%s4714_s3 + $0x28] sm:$0xff]  }
  0x90   :  { %2933 = vmatmul.mubr.msk.bf16.gmra.mrb[68].mxu0 %vm203_vm3, %v3308_v40  ;;  %3035 = vmatmul.mubr.msk.bf16.gmra.mrb[68].mxu1 %vm203_vm3, %v3309_v41 }
  0x91   :  { %2936 = vmatprep.mubr.msk.bf16.mxu0 %vm3376_vm2, %v4717_v0  ;;  %3038 = vmatprep.mubr.msk.bf16.mxu1 %vm3376_vm2, %v4717_v0 }
  0x98   :  { %2937 = vmatmul.mubr.msk.bf16.gmra.mrb[72].mxu0 %vm203_vm3, %v3310_v42  ;;  %3039 = vmatmul.mubr.msk.bf16.gmra.mrb[72].mxu1 %vm203_vm3, %v3311_v43 }
  0x99   :  { %2940 = vmatprep.mubr.msk.bf16.mxu0 %vm3376_vm2, %v4717_v0  ;;  %3042 = vmatprep.mubr.msk.bf16.mxu1 %vm3376_vm2, %v4717_v0 }
  0xa0   :  { %2941 = vmatmul.mubr.msk.bf16.gmra.mrb[76].mxu0 %vm203_vm3, %v3312_v44  ;;  %3043 = vmatmul.mubr.msk.bf16.gmra.mrb[76].mxu1 %vm203_vm3, %v3313_v45 }
  0xa1   :  { %2944 = vmatprep.mubr.msk.bf16.mxu0 %vm3376_vm2, %v4717_v0  ;;  %3046 = vmatprep.mubr.msk.bf16.mxu1 %vm3376_vm2, %v4717_v0 }
  0xa8   :  { %2945 = vmatmul.mubr.msk.bf16.gmra.mrb[80].mxu0 %vm203_vm3, %v3314_v46  ;;  %3047 = vmatmul.mubr.msk.bf16.gmra.mrb[80].mxu1 %vm203_vm3, %v3315_v47 }
  0xa9   :  { %2948 = vmatprep.mubr.msk.bf16.mxu0 %vm3376_vm2, %v4717_v0  ;;  %3050 = vmatprep.mubr.msk.bf16.mxu1 %vm3376_vm2, %v4717_v0 }
  0xb0   :  { %2949 = vmatmul.mubr.msk.bf16.gmra.mrb[84].mxu0 %vm203_vm3, %v3316_v48  ;;  %3051 = vmatmul.mubr.msk.bf16.gmra.mrb[84].mxu1 %vm203_vm3, %v3317_v49 }
  0xb1   :  { %2952 = vmatprep.mubr.msk.bf16.mxu0 %vm3376_vm2, %v4717_v0  ;;  %3054 = vmatprep.mubr.msk.bf16.mxu1 %vm3376_vm2, %v4717_v0 }
  0xb8   :  { %2953 = vmatmul.mubr.msk.bf16.gmra.mrb[88].mxu0 %vm203_vm3, %v3318_v50  ;;  %3055 = vmatmul.mubr.msk.bf16.gmra.mrb[88].mxu1 %vm203_vm3, %v3319_v51  ;;  %v3336_v50 = vld [vmem:[%s4713_s2 + $0x30] sm:$0xff]  }
  0xb9   :  { %2956 = vmatprep.mubr.msk.bf16.mxu0 %vm3376_vm2, %v4717_v0  ;;  %3058 = vmatprep.mubr.msk.bf16.mxu1 %vm3376_vm2, %v4717_v0  ;;  %v3337_v51 = vld [vmem:[%s4714_s3 + $0x30] sm:$0xff]  }
  0xc0   :  { %2957 = vmatmul.mubr.msk.bf16.gmra.mrb[92].mxu0 %vm203_vm3, %v3320_v52  ;;  %3059 = vmatmul.mubr.msk.bf16.gmra.mrb[92].mxu1 %vm203_vm3, %v3321_v53 }
  0xc1   :  { %2960 = vmatprep.mubr.msk.bf16.mxu0 %vm3376_vm2, %v4717_v0  ;;  %3062 = vmatprep.mubr.msk.bf16.mxu1 %vm3376_vm2, %v4717_v0 }
  0xc8   :  { %2961 = vmatmul.mubr.msk.bf16.gmra.mrb[96].mxu0 %vm203_vm3, %v3322_v54  ;;  %3063 = vmatmul.mubr.msk.bf16.gmra.mrb[96].mxu1 %vm203_vm3, %v3323_v55 }
  0xc9   :  { %3068 = vmatprep.mubr.msk.bf16.mxu0 %vm3376_vm2, %v4717_v0  ;;  %3170 = vmatprep.mubr.msk.bf16.mxu1 %vm3376_vm2, %v4717_v0 }
  0xd0   :  { %3069 = vmatmul.mubr.msk.bf16.vlgmr.msra.gmra.mrb[100].mxu0 %vm203_vm3, %v3324_v56  ;;  %3171 = vmatmul.mubr.msk.bf16.vlgmr.msra.gmra.mrb[100].mxu1 %vm203_vm3, %v3325_v57 }
  0xd1   :  { %3072 = vmatprep.mubr.msk.bf16.mxu0 %vm3376_vm2, %v4717_v0  ;;  %3174 = vmatprep.mubr.msk.bf16.mxu1 %vm3376_vm2, %v4717_v0 }
  0xd8   :  { %3073 = vmatmul.mubr.msk.bf16.gmra.mrb[104].mxu0 %vm203_vm3, %v3326_v58  ;;  %3175 = vmatmul.mubr.msk.bf16.gmra.mrb[104].mxu1 %vm203_vm3, %v3327_v59 }
  0xd9   :  { %3076 = vmatprep.mubr.msk.bf16.mxu0 %vm3376_vm2, %v4717_v0  ;;  %3178 = vmatprep.mubr.msk.bf16.mxu1 %vm3376_vm2, %v4717_v0 }
  0xdb   :  { %v3747_v60 = vpop.f32.mrb[0].mxu0  ;;  %v3749_v61 = vpop.f32.mrb[0].mxu1 }
  0xdc   :  { %v2866_v63 = vpop.f32.mrb[1].mxu0  ;;  %v2968_v1 = vpop.f32.mrb[1].mxu1 }
  0xdd   :  { %v3759_v4 = vpop.f32.mrb[2].mxu0  ;;  %v3761_v5 = vpop.f32.mrb[2].mxu1 }
  0xde   :  { %v2867_v7 = vpop.f32.mrb[3].mxu0  ;;  %v2969_v8 = vpop.f32.mrb[3].mxu1 }
  0xe0   :  { %3077 = vmatmul.mubr.msk.bf16.gmra.mrb[108].mxu0 %vm203_vm3, %v3328_v2  ;;  %3179 = vmatmul.mubr.msk.bf16.gmra.mrb[108].mxu1 %vm203_vm3, %v3329_v3  ;;  %v3338_v2 = vld [vmem:[%s4713_s2 + $0x38] sm:$0xff]  }
  0xe1   :  { %3080 = vmatprep.mubr.msk.bf16.mxu0 %vm3376_vm2, %v4717_v0  ;;  %3182 = vmatprep.mubr.msk.bf16.mxu1 %vm3376_vm2, %v4717_v0  ;;  %v3339_v3 = vld [vmem:[%s4714_s3 + $0x38] sm:$0xff]  }
  0xe3   :  { %v3771_v9 = vpop.f32.mrb[4].mxu0  ;;  %v3773_v10 = vpop.f32.mrb[4].mxu1 }
  0xe4   :  { %v2870_v12 = vpop.f32.mrb[5].mxu0  ;;  %v2972_v13 = vpop.f32.mrb[5].mxu1 }
  0xe5   :  { %v3783_v16 = vpop.f32.mrb[6].mxu0  ;;  %v3785_v17 = vpop.f32.mrb[6].mxu1 }
  0xe6   :  { %v2871_v19 = vpop.f32.mrb[7].mxu0  ;;  %v2973_v20 = vpop.f32.mrb[7].mxu1 }
  0xe8   :  { %3081 = vmatmul.mubr.msk.bf16.gmra.mrb[112].mxu0 %vm203_vm3, %v3330_v14  ;;  %3183 = vmatmul.mubr.msk.bf16.gmra.mrb[112].mxu1 %vm203_vm3, %v3331_v15 }
  0xe9   :  { %3084 = vmatprep.mubr.msk.bf16.mxu0 %vm3376_vm2, %v4717_v0  ;;  %3186 = vmatprep.mubr.msk.bf16.mxu1 %vm3376_vm2, %v4717_v0 }
  0xeb   :  { %v3795_v21 = vpop.f32.mrb[8].mxu0  ;;  %v3797_v22 = vpop.f32.mrb[8].mxu1 }
  0xec   :  { %v2874_v24 = vpop.f32.mrb[9].mxu0  ;;  %v2976_v25 = vpop.f32.mrb[9].mxu1 }
  0xed   :  { %v3807_v28 = vpop.f32.mrb[10].mxu0  ;;  %v3809_v29 = vpop.f32.mrb[10].mxu1 }
  0xee   :  { %v2875_v31 = vpop.f32.mrb[11].mxu0  ;;  %v2977_v32 = vpop.f32.mrb[11].mxu1 }
  0xf0   :  { %3085 = vmatmul.mubr.msk.bf16.gmra.mrb[116].mxu0 %vm203_vm3, %v3332_v26  ;;  %3187 = vmatmul.mubr.msk.bf16.gmra.mrb[116].mxu1 %vm203_vm3, %v3333_v27  ;;  %v3340_v26 = vld [vmem:[%s4713_s2 + $0x40] sm:$0xff]  }
  0xf1   :  { %3088 = vmatprep.mubr.msk.bf16.mxu0 %vm3376_vm2, %v4717_v0  ;;  %3190 = vmatprep.mubr.msk.bf16.mxu1 %vm3376_vm2, %v4717_v0  ;;  %v3341_v27 = vld [vmem:[%s4714_s3 + $0x40] sm:$0xff]  }
  0xf3   :  { %v3819_v33 = vpop.f32.mrb[12].mxu0  ;;  %v3821_v34 = vpop.f32.mrb[12].mxu1 }
  0xf4   :  { %v2878_v36 = vpop.f32.mrb[13].mxu0  ;;  %v2980_v37 = vpop.f32.mrb[13].mxu1 }
  0xf5   :  { %v3831_v40 = vpop.f32.mrb[14].mxu0  ;;  %v3833_v41 = vpop.f32.mrb[14].mxu1 }
  0xf6   :  { %v2879_v43 = vpop.f32.mrb[15].mxu0  ;;  %v2981_v44 = vpop.f32.mrb[15].mxu1 }
  0xf8   :  { %3089 = vmatmul.mubr.msk.bf16.gmra.mrb[120].mxu0 %vm203_vm3, %v3334_v38  ;;  %3191 = vmatmul.mubr.msk.bf16.gmra.mrb[120].mxu1 %vm203_vm3, %v3335_v39 }
  0xf9   :  { %3092 = vmatprep.mubr.msk.bf16.mxu0 %vm3376_vm2, %v4717_v0  ;;  %3194 = vmatprep.mubr.msk.bf16.mxu1 %vm3376_vm2, %v4717_v0 }
  0xfb   :  { %v3843_v45 = vpop.f32.mrb[16].mxu0  ;;  %v3845_v46 = vpop.f32.mrb[16].mxu1 }
  0xfc   :  { %v2882_v48 = vpop.f32.mrb[17].mxu0  ;;  %v2984_v49 = vpop.f32.mrb[17].mxu1 }
  0xfd   :  { %v3855_v52 = vpop.f32.mrb[18].mxu0  ;;  %v3857_v53 = vpop.f32.mrb[18].mxu1 }
  0xfe   :  { %v2883_v55 = vpop.f32.mrb[19].mxu0  ;;  %v2985_v56 = vpop.f32.mrb[19].mxu1 }
 0x100   :  { %3093 = vmatmul.mubr.msk.bf16.gmra.mrb[124].mxu0 %vm203_vm3, %v3336_v50  ;;  %3195 = vmatmul.mubr.msk.bf16.gmra.mrb[124].mxu1 %vm203_vm3, %v3337_v51  ;;  %v3342_v50 = vld [vmem:[%s4713_s2 + $0x48] sm:$0xff]  }
 0x101   :  { %3096 = vmatprep.mubr.msk.bf16.mxu0 %vm3376_vm2, %v4717_v0  ;;  %3198 = vmatprep.mubr.msk.bf16.mxu1 %vm3376_vm2, %v4717_v0  ;;  %v3343_v51 = vld [vmem:[%s4714_s3 + $0x48] sm:$0xff]  }
 0x103   :  { %v3867_v57 = vpop.f32.mrb[20].mxu0  ;;  %v3869_v58 = vpop.f32.mrb[20].mxu1 }
 0x104   :  { %v2886_v63 = vpop.f32.mrb[21].mxu0  ;;  %v2988_v1 = vpop.f32.mrb[21].mxu1 }
 0x105   :  { %v3879_v7 = vpop.f32.mrb[22].mxu0  ;;  %v3881_v8 = vpop.f32.mrb[22].mxu1 }
 0x106   :  { %v2887_v13 = vpop.f32.mrb[23].mxu0  ;;  %v2989_v14 = vpop.f32.mrb[23].mxu1 }
 0x108   :  { %3097 = vmatmul.mubr.msk.bf16.gmra.mrb[128].mxu0 %vm203_vm3, %v3338_v2  ;;  %3199 = vmatmul.mubr.msk.bf16.gmra.mrb[128].mxu1 %vm203_vm3, %v3339_v3 }
 0x109   :  { %3100 = vmatprep.mubr.msk.bf16.mxu0 %vm3376_vm2, %v4717_v0  ;;  %3202 = vmatprep.mubr.msk.bf16.mxu1 %vm3376_vm2, %v4717_v0 }
 0x10b   :  { %v3891_v15 = vpop.f32.mrb[24].mxu0  ;;  %v3893_v19 = vpop.f32.mrb[24].mxu1 }
 0x10c   :  { %v2890_v24 = vpop.f32.mrb[25].mxu0  ;;  %v2992_v25 = vpop.f32.mrb[25].mxu1 }
 0x10d   :  { %v3903_v31 = vpop.f32.mrb[26].mxu0  ;;  %v3905_v32 = vpop.f32.mrb[26].mxu1 }
 0x10e   :  { %v2891_v37 = vpop.f32.mrb[27].mxu0  ;;  %v2993_v38 = vpop.f32.mrb[27].mxu1 }
 0x110   :  { %3101 = vmatmul.mubr.msk.bf16.gmra.mrb[132].mxu0 %vm203_vm3, %v3340_v26  ;;  %3203 = vmatmul.mubr.msk.bf16.gmra.mrb[132].mxu1 %vm203_vm3, %v3341_v27  ;;  %v3344_v26 = vld [vmem:[%s4713_s2 + $0x50] sm:$0xff]  }
 0x111   :  { %3104 = vmatprep.mubr.msk.bf16.mxu0 %vm3376_vm2, %v4717_v0  ;;  %3206 = vmatprep.mubr.msk.bf16.mxu1 %vm3376_vm2, %v4717_v0  ;;  %v3345_v27 = vld [vmem:[%s4714_s3 + $0x50] sm:$0xff]  }
 0x113   :  { %v3915_v39 = vpop.f32.mrb[28].mxu0  ;;  %v3917_v43 = vpop.f32.mrb[28].mxu1 }
 0x114   :  { %v2894_v48 = vpop.f32.mrb[29].mxu0  ;;  %v2996_v49 = vpop.f32.mrb[29].mxu1 }
 0x115   :  { %v3927_v55 = vpop.f32.mrb[30].mxu0  ;;  %v3929_v56 = vpop.f32.mrb[30].mxu1 }
 0x116   :  { %v2895_v1 = vpop.f32.mrb[31].mxu0  ;;  %v2997_v2 = vpop.f32.mrb[31].mxu1 }
 0x118   :  { %3105 = vmatmul.mubr.msk.bf16.gmra.mrb[136].mxu0 %vm203_vm3, %v3342_v50  ;;  %3207 = vmatmul.mubr.msk.bf16.gmra.mrb[136].mxu1 %vm203_vm3, %v3343_v51 }
 0x119   :  { %3108 = vmatprep.mubr.msk.bf16.mxu0 %vm3376_vm2, %v4717_v0  ;;  %3210 = vmatprep.mubr.msk.bf16.mxu1 %vm3376_vm2, %v4717_v0 }
 0x11b   :  { %v3939_v3 = vpop.f32.mrb[32].mxu0  ;;  %v3941_v13 = vpop.f32.mrb[32].mxu1 }
 0x11c   :  { %v2898_v24 = vpop.f32.mrb[33].mxu0  ;;  %v3000_v25 = vpop.f32.mrb[33].mxu1 }
 0x11d   :  { %v3951_v37 = vpop.f32.mrb[34].mxu0  ;;  %v3953_v38 = vpop.f32.mrb[34].mxu1 }
 0x11e   :  { %v2899_v49 = vpop.f32.mrb[35].mxu0  ;;  %v3001_v50 = vpop.f32.mrb[35].mxu1 }
 0x120   :  { %3109 = vmatmul.mubr.msk.bf16.gmra.mrb[140].mxu0 %vm203_vm3, %v3344_v26  ;;  %3211 = vmatmul.mubr.msk.bf16.gmra.mrb[140].mxu1 %vm203_vm3, %v3345_v27  ;;  %v3346_v26 = vld [vmem:[%s4713_s2 + $0x58] sm:$0xff]  }
 0x121   :  { %3112 = vmatprep.mubr.msk.bf16.mxu0 %vm3376_vm2, %v4717_v0  ;;  %3214 = vmatprep.mubr.msk.bf16.mxu1 %vm3376_vm2, %v4717_v0  ;;  %v3347_v27 = vld [vmem:[%s4714_s3 + $0x58] sm:$0xff]  }
 0x123   :  { %v3963_v51 = vpop.f32.mrb[36].mxu0  ;;  %v3965_v1 = vpop.f32.mrb[36].mxu1 }
 0x124   :  { %v2902_v24 = vpop.f32.mrb[37].mxu0  ;;  %v3004_v25 = vpop.f32.mrb[37].mxu1 }
 0x125   :  { %v3975_v49 = vpop.f32.mrb[38].mxu0  ;;  %v3977_v50 = vpop.f32.mrb[38].mxu1 }
 0x126   :  { %v2903_v14 = vpop.f32.mrb[39].mxu0  ;;  %v3005_v63 = vpop.f32.mrb[39].mxu1 }
 0x127   :  { %v3348_v63 = vld [vmem:[%s4713_s2 + $0x60] sm:$0xff]  }
 0x128   :  { %3113 = vmatmul.mubr.msk.bf16.gmra.mrb[144].mxu0 %vm203_vm3, %v3346_v26  ;;  %3215 = vmatmul.mubr.msk.bf16.gmra.mrb[144].mxu1 %vm203_vm3, %v3347_v27  ;;  %v3349_v26 = vld [vmem:[%s4714_s3 + $0x60] sm:$0xff]  }
 0x129   :  { %3116 = vmatprep.mubr.msk.bf16.mxu0 %vm3376_vm2, %v4717_v0  ;;  %3218 = vmatprep.mubr.msk.bf16.mxu1 %vm3376_vm2, %v4717_v0 }
 0x12b   :  { %v3987_v24 = vpop.f32.mrb[40].mxu0  ;;  %v3989_v25 = vpop.f32.mrb[40].mxu1 }
 0x12c   :  { %v2906_v48 = vpop.f32.mrb[41].mxu0  ;;  %v3008_v14 = vpop.f32.mrb[41].mxu1 }
 0x12d   :  { %v3999_v27 = vpop.f32.mrb[42].mxu0  ;;  %v4001_v44 = vpop.f32.mrb[42].mxu1 }
 0x12e   :  { %v2907_v20 = vpop.f32.mrb[43].mxu0  ;;  %v3009_v12 = vpop.f32.mrb[43].mxu1 }
 0x12f   :  { %v3350_v12 = vld [vmem:[%s4713_s2 + $0x68] sm:$0xff]  }
 0x130   :  { %3117 = vmatmul.mubr.msk.bf16.gmra.mrb[148].mxu0 %vm203_vm3, %v3348_v63  ;;  %3219 = vmatmul.mubr.msk.bf16.gmra.mrb[148].mxu1 %vm203_vm3, %v3349_v26  ;;  %v3351_v63 = vld [vmem:[%s4714_s3 + $0x68] sm:$0xff]  }
 0x131   :  { %3120 = vmatprep.mubr.msk.bf16.mxu0 %vm3376_vm2, %v4717_v0  ;;  %3222 = vmatprep.mubr.msk.bf16.mxu1 %vm3376_vm2, %v4717_v0 }
 0x133   :  { %v4011_v48 = vpop.f32.mrb[44].mxu0  ;;  %v4013_v14 = vpop.f32.mrb[44].mxu1 }
 0x134   :  { %v2910_v36 = vpop.f32.mrb[45].mxu0  ;;  %v3012_v20 = vpop.f32.mrb[45].mxu1 }
 0x135   :  { %v4023_v26 = vpop.f32.mrb[46].mxu0  ;;  %v4025_v59 = vpop.f32.mrb[46].mxu1 }
 0x136   :  { %4770 = vst [vmem:[#allocation2_spill] sm:$0xff] %v4025_v59  ;;  %v2911_v47 = vpop.f32.mrb[47].mxu0  ;;  %v3013_v42 = vpop.f32.mrb[47].mxu1 }
 0x137   :  { %v3352_v42 = vld [vmem:[%s4713_s2 + $0x70] sm:$0xff]  }
 0x138   :  { %3121 = vmatmul.mubr.msk.bf16.gmra.mrb[152].mxu0 %vm203_vm3, %v3350_v12  ;;  %3223 = vmatmul.mubr.msk.bf16.gmra.mrb[152].mxu1 %vm203_vm3, %v3351_v63  ;;  %v3353_v12 = vld [vmem:[%s4714_s3 + $0x70] sm:$0xff]  }
 0x139   :  { %3124 = vmatprep.mubr.msk.bf16.mxu0 %vm3376_vm2, %v4717_v0  ;;  %3226 = vmatprep.mubr.msk.bf16.mxu1 %vm3376_vm2, %v4717_v0 }
 0x13b   :  { %v4035_v36 = vpop.f32.mrb[48].mxu0  ;;  %v4037_v20 = vpop.f32.mrb[48].mxu1 }
 0x13c   :  { %4771 = vst [vmem:[#allocation3_spill] sm:$0xff] %v4035_v36  ;;  %4772 = vst [vmem:[#allocation4_spill] sm:$0xff] %v4037_v20  ;;  %v2914_v54 = vpop.f32.mrb[49].mxu0  ;;  %v3016_v47 = vpop.f32.mrb[49].mxu1 }
 0x13d   :  { %v4047_v63 = vpop.f32.mrb[50].mxu0  ;;  %v4049_v35 = vpop.f32.mrb[50].mxu1 }
 0x13e   :  { %4773 = vst [vmem:[#allocation5_spill] sm:$0xff] %v4047_v63  ;;  %4774 = vst [vmem:[#allocation6_spill] sm:$0xff] %v4049_v35  ;;  %v2915_v23 = vpop.f32.mrb[51].mxu0  ;;  %v3017_v18 = vpop.f32.mrb[51].mxu1 }
 0x13f   :  { %v3354_v18 = vld [vmem:[%s4713_s2 + $0x78] sm:$0xff]  }
 0x140   :  { %3125 = vmatmul.mubr.msk.bf16.gmra.mrb[156].mxu0 %vm203_vm3, %v3352_v42  ;;  %3227 = vmatmul.mubr.msk.bf16.gmra.mrb[156].mxu1 %vm203_vm3, %v3353_v12  ;;  %v3355_v42 = vld [vmem:[%s4714_s3 + $0x78] sm:$0xff]  }
 0x141   :  { %3128 = vmatprep.mubr.msk.bf16.mxu0 %vm3376_vm2, %v4717_v0  ;;  %3230 = vmatprep.mubr.msk.bf16.mxu1 %vm3376_vm2, %v4717_v0 }
 0x143   :  { %v4059_v54 = vpop.f32.mrb[52].mxu0  ;;  %v4061_v47 = vpop.f32.mrb[52].mxu1 }
 0x144   :  { %4775 = vst [vmem:[#allocation7_spill] sm:$0xff] %v4059_v54  ;;  %4776 = vst [vmem:[#allocation8_spill] sm:$0xff] %v4061_v47  ;;  %v2918_v30 = vpop.f32.mrb[53].mxu0  ;;  %v3020_v23 = vpop.f32.mrb[53].mxu1 }
 0x145   :  { %v4071_v12 = vpop.f32.mrb[54].mxu0  ;;  %v4073_v11 = vpop.f32.mrb[54].mxu1  ;;  %v4779_v30 = vmov 0.0  }
 0x146   :  { %4777 = vst [vmem:[#allocation9_spill] sm:$0xff] %v4071_v12  ;;  %4778 = vst [vmem:[#allocation10_spill] sm:$0xff] %v4073_v11  ;;  %v2919_v62 = vpop.f32.mrb[55].mxu0  ;;  %v3021_v0 = vpop.f32.mrb[55].mxu1 }
 0x147   :  { %v3356_v0 = vld [vmem:[%s4713_s2 + $0x80] sm:$0xff]  }
 0x148   :  { %3129 = vmatmul.mubr.msk.bf16.gmra.mrb[160].mxu0 %vm203_vm3, %v3354_v18  ;;  %3231 = vmatmul.mubr.msk.bf16.gmra.mrb[160].mxu1 %vm203_vm3, %v3355_v42  ;;  %v3357_v18 = vld [vmem:[%s4714_s3 + $0x80] sm:$0xff]  }
 0x149   :  { %3132 = vmatprep.mubr.msk.bf16.mxu0 %vm3376_vm2, %v4779_v30  ;;  %3234 = vmatprep.mubr.msk.bf16.mxu1 %vm3376_vm2, %v4779_v30 }
 0x14b   :  { %v4083_v23 = vpop.f32.mrb[56].mxu0  ;;  %v4085_v2 = vpop.f32.mrb[56].mxu1 }
 0x14c   :  { %4780 = vst [vmem:[#allocation11_spill] sm:$0xff] %v4083_v23  ;;  %4781 = vst [vmem:[#allocation12_spill] sm:$0xff] %v4085_v2  ;;  %v2922_v6 = vpop.f32.mrb[57].mxu0  ;;  %v3024_v62 = vpop.f32.mrb[57].mxu1 }
 0x14d   :  { %v4095_v42 = vpop.f32.mrb[58].mxu0  ;;  %v4097_v11 = vpop.f32.mrb[58].mxu1 }
 0x14e   :  { %4782 = vst [vmem:[#allocation13_spill] sm:$0xff] %v4095_v42  ;;  %4783 = vst [vmem:[#allocation14_spill] sm:$0xff] %v4097_v11  ;;  %v2923_v54 = vpop.f32.mrb[59].mxu0  ;;  %v3025_v35 = vpop.f32.mrb[59].mxu1 }
 0x14f   :  { %v3358_v35 = vld [vmem:[%s4713_s2 + $0x88] sm:$0xff]  }
 0x150   :  { %3133 = vmatmul.mubr.msk.bf16.gmra.mrb[164].mxu0 %vm203_vm3, %v3356_v0  ;;  %3235 = vmatmul.mubr.msk.bf16.gmra.mrb[164].mxu1 %vm203_vm3, %v3357_v18  ;;  %v3359_v0 = vld [vmem:[%s4714_s3 + $0x88] sm:$0xff]  }
 0x151   :  { %3136 = vmatprep.mubr.msk.bf16.mxu0 %vm3376_vm2, %v4779_v30  ;;  %3238 = vmatprep.mubr.msk.bf16.mxu1 %vm3376_vm2, %v4779_v30 }
 0x153   :  { %v4107_v6 = vpop.f32.mrb[60].mxu0  ;;  %v4109_v62 = vpop.f32.mrb[60].mxu1 }
 0x154   :  { %4784 = vst [vmem:[#allocation15_spill] sm:$0xff] %v4107_v6  ;;  %4785 = vst [vmem:[#allocation16_spill] sm:$0xff] %v4109_v62  ;;  %v2926_v12 = vpop.f32.mrb[61].mxu0  ;;  %v3028_v54 = vpop.f32.mrb[61].mxu1 }
 0x155   :  { %v4119_v18 = vpop.f32.mrb[62].mxu0  ;;  %v4121_v11 = vpop.f32.mrb[62].mxu1 }
 0x156   :  { %4786 = vst [vmem:[#allocation17_spill] sm:$0xff] %v4119_v18  ;;  %4787 = vst [vmem:[#allocation18_spill] sm:$0xff] %v4121_v11  ;;  %v2927_v2 = vpop.f32.mrb[63].mxu0  ;;  %v3029_v23 = vpop.f32.mrb[63].mxu1 }
 0x157   :  { %v3360_v23 = vld [vmem:[%s4713_s2 + $0x90] sm:$0xff]  }
 0x158   :  { %3137 = vmatmul.mubr.msk.bf16.gmra.mrb[168].mxu0 %vm203_vm3, %v3358_v35  ;;  %3239 = vmatmul.mubr.msk.bf16.gmra.mrb[168].mxu1 %vm203_vm3, %v3359_v0  ;;  %v3361_v35 = vld [vmem:[%s4714_s3 + $0x90] sm:$0xff]  }
 0x159   :  { %3140 = vmatprep.mubr.msk.bf16.mxu0 %vm3376_vm2, %v4779_v30  ;;  %3242 = vmatprep.mubr.msk.bf16.mxu1 %vm3376_vm2, %v4779_v30 }
 0x15b   :  { %v4131_v12 = vpop.f32.mrb[64].mxu0  ;;  %v4133_v54 = vpop.f32.mrb[64].mxu1 }
 0x15c   :  { %4788 = vst [vmem:[#allocation19_spill] sm:$0xff] %v4131_v12  ;;  %4789 = vst [vmem:[#allocation20_spill] sm:$0xff] %v4133_v54  ;;  %v2930_v42 = vpop.f32.mrb[65].mxu0  ;;  %v3032_v2 = vpop.f32.mrb[65].mxu1 }
 0x15d   :  { %v4143_v0 = vpop.f32.mrb[66].mxu0  ;;  %v4145_v11 = vpop.f32.mrb[66].mxu1 }
 0x15e   :  { %4790 = vst [vmem:[#allocation21_spill] sm:$0xff] %v4143_v0  ;;  %4791 = vst [vmem:[#allocation22_spill] sm:$0xff] %v4145_v11  ;;  %v2931_v62 = vpop.f32.mrb[67].mxu0  ;;  %v3033_v6 = vpop.f32.mrb[67].mxu1 }
 0x15f   :  { %v3362_v6 = vld [vmem:[%s4713_s2 + $0x98] sm:$0xff]  }
 0x160   :  { %3141 = vmatmul.mubr.msk.bf16.gmra.mrb[172].mxu0 %vm203_vm3, %v3360_v23  ;;  %3243 = vmatmul.mubr.msk.bf16.gmra.mrb[172].mxu1 %vm203_vm3, %v3361_v35  ;;  %v3363_v23 = vld [vmem:[%s4714_s3 + $0x98] sm:$0xff]  }
 0x161   :  { %3144 = vmatprep.mubr.msk.bf16.mxu0 %vm3376_vm2, %v4779_v30  ;;  %3246 = vmatprep.mubr.msk.bf16.mxu1 %vm3376_vm2, %v4779_v30 }
 0x163   :  { %v4155_v42 = vpop.f32.mrb[68].mxu0  ;;  %v4157_v2 = vpop.f32.mrb[68].mxu1 }
 0x164   :  { %4792 = vst [vmem:[#allocation23_spill] sm:$0xff] %v4155_v42  ;;  %4793 = vst [vmem:[#allocation24_spill] sm:$0xff] %v4157_v2  ;;  %v2934_v18 = vpop.f32.mrb[69].mxu0  ;;  %v3036_v62 = vpop.f32.mrb[69].mxu1 }
 0x165   :  { %v4167_v35 = vpop.f32.mrb[70].mxu0  ;;  %v4169_v11 = vpop.f32.mrb[70].mxu1 }
 0x166   :  { %4794 = vst [vmem:[#allocation25_spill] sm:$0xff] %v4167_v35  ;;  %4795 = vst [vmem:[#allocation26_spill] sm:$0xff] %v4169_v11  ;;  %v2935_v54 = vpop.f32.mrb[71].mxu0  ;;  %v3037_v12 = vpop.f32.mrb[71].mxu1 }
 0x167   :  { %v3364_v12 = vld [vmem:[%s4713_s2 + $0xa0] sm:$0xff]  }
 0x168   :  { %3145 = vmatmul.mubr.msk.bf16.gmra.mrb[176].mxu0 %vm203_vm3, %v3362_v6  ;;  %3247 = vmatmul.mubr.msk.bf16.gmra.mrb[176].mxu1 %vm203_vm3, %v3363_v23  ;;  %v3365_v6 = vld [vmem:[%s4714_s3 + $0xa0] sm:$0xff]  }
 0x169   :  { %3148 = vmatprep.mubr.msk.bf16.mxu0 %vm3376_vm2, %v4779_v30  ;;  %3250 = vmatprep.mubr.msk.bf16.mxu1 %vm3376_vm2, %v4779_v30 }
 0x16b   :  { %v4179_v18 = vpop.f32.mrb[72].mxu0  ;;  %v4181_v62 = vpop.f32.mrb[72].mxu1 }
 0x16c   :  { %4796 = vst [vmem:[#allocation27_spill] sm:$0xff] %v4179_v18  ;;  %4797 = vst [vmem:[#allocation28_spill] sm:$0xff] %v4181_v62  ;;  %v2938_v0 = vpop.f32.mrb[73].mxu0  ;;  %v3040_v54 = vpop.f32.mrb[73].mxu1 }
 0x16d   :  { %v4191_v23 = vpop.f32.mrb[74].mxu0  ;;  %v4193_v11 = vpop.f32.mrb[74].mxu1 }
 0x16e   :  { %4798 = vst [vmem:[#allocation29_spill] sm:$0xff] %v4191_v23  ;;  %4799 = vst [vmem:[#allocation30_spill] sm:$0xff] %v4193_v11  ;;  %v2939_v2 = vpop.f32.mrb[75].mxu0  ;;  %v3041_v42 = vpop.f32.mrb[75].mxu1 }
 0x16f   :  { %v3366_v42 = vld [vmem:[%s4713_s2 + $0xa8] sm:$0xff]  }
 0x170   :  { %3149 = vmatmul.mubr.msk.bf16.gmra.mrb[180].mxu0 %vm203_vm3, %v3364_v12  ;;  %3251 = vmatmul.mubr.msk.bf16.gmra.mrb[180].mxu1 %vm203_vm3, %v3365_v6  ;;  %v3367_v12 = vld [vmem:[%s4714_s3 + $0xa8] sm:$0xff]  }
 0x171   :  { %3152 = vmatprep.mubr.msk.bf16.mxu0 %vm3376_vm2, %v4779_v30  ;;  %3254 = vmatprep.mubr.msk.bf16.mxu1 %vm3376_vm2, %v4779_v30 }
 0x173   :  { %v4203_v0 = vpop.f32.mrb[76].mxu0  ;;  %v4205_v54 = vpop.f32.mrb[76].mxu1 }
 0x174   :  { %4800 = vst [vmem:[#allocation31_spill] sm:$0xff] %v4203_v0  ;;  %4801 = vst [vmem:[#allocation32_spill] sm:$0xff] %v4205_v54  ;;  %v2942_v35 = vpop.f32.mrb[77].mxu0  ;;  %v3044_v2 = vpop.f32.mrb[77].mxu1 }
 0x175   :  { %v4215_v6 = vpop.f32.mrb[78].mxu0  ;;  %v4217_v11 = vpop.f32.mrb[78].mxu1 }
 0x176   :  { %4802 = vst [vmem:[#allocation33_spill] sm:$0xff] %v4215_v6  ;;  %4803 = vst [vmem:[#allocation34_spill] sm:$0xff] %v4217_v11  ;;  %v2943_v62 = vpop.f32.mrb[79].mxu0  ;;  %v3045_v18 = vpop.f32.mrb[79].mxu1 }
 0x177   :  { %v3368_v18 = vld [vmem:[%s4713_s2 + $0xb0] sm:$0xff]  }
 0x178   :  { %3153 = vmatmul.mubr.msk.bf16.gmra.mrb[184].mxu0 %vm203_vm3, %v3366_v42  ;;  %3255 = vmatmul.mubr.msk.bf16.gmra.mrb[184].mxu1 %vm203_vm3, %v3367_v12  ;;  %v3369_v42 = vld [vmem:[%s4714_s3 + $0xb0] sm:$0xff]  }
 0x179   :  { %3156 = vmatprep.mubr.msk.bf16.mxu0 %vm3376_vm2, %v4779_v30  ;;  %3258 = vmatprep.mubr.msk.bf16.mxu1 %vm3376_vm2, %v4779_v30 }
 0x17b   :  { %v4227_v35 = vpop.f32.mrb[80].mxu0  ;;  %v4229_v2 = vpop.f32.mrb[80].mxu1 }
 0x17c   :  { %4804 = vst [vmem:[#allocation35_spill] sm:$0xff] %v4227_v35  ;;  %4805 = vst [vmem:[#allocation36_spill] sm:$0xff] %v4229_v2  ;;  %v2946_v23 = vpop.f32.mrb[81].mxu0  ;;  %v3048_v62 = vpop.f32.mrb[81].mxu1 }
 0x17d   :  { %v4239_v12 = vpop.f32.mrb[82].mxu0  ;;  %v4241_v11 = vpop.f32.mrb[82].mxu1 }
 0x17e   :  { %4806 = vst [vmem:[#allocation37_spill] sm:$0xff] %v4239_v12  ;;  %4807 = vst [vmem:[#allocation38_spill] sm:$0xff] %v4241_v11  ;;  %v2947_v54 = vpop.f32.mrb[83].mxu0  ;;  %v3049_v0 = vpop.f32.mrb[83].mxu1 }
 0x17f   :  { %v3370_v0 = vld [vmem:[%s4713_s2 + $0xb8] sm:$0xff]  }
 0x180   :  { %3157 = vmatmul.mubr.msk.bf16.gmra.mrb[188].mxu0 %vm203_vm3, %v3368_v18  ;;  %3259 = vmatmul.mubr.msk.bf16.gmra.mrb[188].mxu1 %vm203_vm3, %v3369_v42  ;;  %v3371_v18 = vld [vmem:[%s4714_s3 + $0xb8] sm:$0xff]  }
 0x181   :  { %3160 = vmatprep.mubr.msk.bf16.mxu0 %vm3376_vm2, %v4779_v30  ;;  %3262 = vmatprep.mubr.msk.bf16.mxu1 %vm3376_vm2, %v4779_v30 }
 0x183   :  { %v4251_v23 = vpop.f32.mrb[84].mxu0  ;;  %v4253_v62 = vpop.f32.mrb[84].mxu1 }
 0x184   :  { %4808 = vst [vmem:[#allocation39_spill] sm:$0xff] %v4251_v23  ;;  %4809 = vst [vmem:[#allocation40_spill] sm:$0xff] %v4253_v62  ;;  %v2950_v6 = vpop.f32.mrb[85].mxu0  ;;  %v3052_v54 = vpop.f32.mrb[85].mxu1 }
 0x185   :  { %v4263_v42 = vpop.f32.mrb[86].mxu0  ;;  %v4265_v11 = vpop.f32.mrb[86].mxu1 }
 0x186   :  { %4810 = vst [vmem:[#allocation41_spill] sm:$0xff] %v4263_v42  ;;  %4811 = vst [vmem:[#allocation42_spill] sm:$0xff] %v4265_v11  ;;  %v2951_v2 = vpop.f32.mrb[87].mxu0  ;;  %v3053_v35 = vpop.f32.mrb[87].mxu1 }
 0x187   :  { %v3372_v35 = vld [vmem:[%s4713_s2 + $0xc0] ss:$0 sps:$4 sm:$0xff]  }
 0x188   :  { %3161 = vmatmul.mubr.msk.bf16.gmra.mrb[192].mxu0 %vm203_vm3, %v3370_v0  ;;  %3263 = vmatmul.mubr.msk.bf16.gmra.mrb[192].mxu1 %vm203_vm3, %v3371_v18  ;;  %v3373_v0 = vld [vmem:[%s4714_s3 + $0xc0] ss:$0 sps:$4 sm:$0xff]  }
 0x189   :  { %3164 = vmatprep.mubr.msk.bf16.mxu0 %vm3376_vm2, %v4779_v30  ;;  %3266 = vmatprep.mubr.msk.bf16.mxu1 %vm3376_vm2, %v4779_v30 }
 0x18b   :  { %v4275_v6 = vpop.f32.mrb[88].mxu0  ;;  %v4277_v54 = vpop.f32.mrb[88].mxu1 }
 0x18c   :  { %4812 = vst [vmem:[#allocation43_spill] sm:$0xff] %v4275_v6  ;;  %4813 = vst [vmem:[#allocation44_spill] sm:$0xff] %v4277_v54  ;;  %v2954_v12 = vpop.f32.mrb[89].mxu0  ;;  %v3056_v2 = vpop.f32.mrb[89].mxu1 }
 0x18d   :  { %v4287_v18 = vpop.f32.mrb[90].mxu0  ;;  %v4289_v30 = vpop.f32.mrb[90].mxu1 }
 0x18e   :  { %4814 = vst [vmem:[#allocation45_spill] sm:$0xff] %v4287_v18  ;;  %4815 = vst [vmem:[#allocation46_spill] sm:$0xff] %v4289_v30  ;;  %v2955_v42 = vpop.f32.mrb[91].mxu0  ;;  %v3057_v62 = vpop.f32.mrb[91].mxu1 }
 0x18f   :  { %v4822_v62 = vmax.f32 %v3747_v60, %v3749_v61 }
 0x190   :  { %3165 = vmatmul.mubr.msk.bf16.gmra.mrb[196].mxu0 %vm203_vm3, %v3372_v35  ;;  %3267 = vmatmul.mubr.msk.bf16.gmra.mrb[196].mxu1 %vm203_vm3, %v3373_v0 }
 0x193   :  { %v4295_v12 = vpop.f32.mrb[92].mxu0  ;;  %v4297_v2 = vpop.f32.mrb[92].mxu1 }
 0x194   :  { %4816 = vst [vmem:[#allocation47_spill] sm:$0xff] %v4295_v12  ;;  %4817 = vst [vmem:[#allocation48_spill] sm:$0xff] %v4297_v2  ;;  %v2958_v54 = vpop.f32.mrb[93].mxu0  ;;  %v3060_v6 = vpop.f32.mrb[93].mxu1 }
 0x195   :  { %v4301_v23 = vpop.f32.mrb[94].mxu0  ;;  %v4303_v63 = vpop.f32.mrb[94].mxu1 }
 0x196   :  { %4818 = vst [vmem:[#allocation49_spill] sm:$0xff] %v4301_v23  ;;  %4819 = vst [vmem:[#allocation50_spill] sm:$0xff] %v4303_v63  ;;  %v2959_v42 = vpop.f32.mrb[95].mxu0  ;;  %v3061_v35 = vpop.f32.mrb[95].mxu1  ;;  %v4319_v23 = vld [vmem:[%s4715_s5] ss:$0 sm:$0xff] }
 0x19b   :  { %v4307_v11 = vpop.f32.mrb[96].mxu0  ;;  %v4309_v0 = vpop.f32.mrb[96].mxu1 }
 0x19c   :  { %4820 = vst [vmem:[#allocation51_spill] sm:$0xff] %v4307_v11  ;;  %4821 = vst [vmem:[#allocation52_spill] sm:$0xff] %v4309_v0  ;;  %v2962_v18 = vpop.f32.mrb[97].mxu0  ;;  %v3064_v47 = vpop.f32.mrb[97].mxu1 }
 0x19d   :  { %v515_v54 = vpop.f32.mrb[98].mxu0  ;;  %v994_v6 = vpop.f32.mrb[98].mxu1 }
 0x19e   :  { %v2963_v2 = vpop.f32.mrb[99].mxu0  ;;  %v3065_v12 = vpop.f32.mrb[99].mxu1 }
 0x19f   :  { %v4823_v2 = vmax.f32 %v3759_v4, %v3761_v5 }
 0x1a3   :  { %v1327_v20 = vpop.f32.mrb[100].mxu0  ;;  %v1855_v36 = vpop.f32.mrb[100].mxu1 }
 0x1a4   :  { %v1525_v42 = vmax.f32 %v4822_v62, %v1327_v20  ;;  %v3070_v35 = vpop.f32.mrb[101].mxu0  ;;  %v3172_v63 = vpop.f32.mrb[101].mxu1 }
 0x1a5   :  { %v1330_v30 = vpop.f32.mrb[102].mxu0  ;;  %v1858_v18 = vpop.f32.mrb[102].mxu1 }
 0x1a6   :  { %v2053_v47 = vmax.f32 %v1525_v42, %v1855_v36  ;;  %v1526_v12 = vmax.f32 %v4823_v2, %v1330_v30  ;;  %v3071_v54 = vpop.f32.mrb[103].mxu0  ;;  %v3173_v6 = vpop.f32.mrb[103].mxu1  ;;  %v4824_v36 = vmax.f32 %v3771_v9, %v3773_v10 }
 0x1a8   :  { %v2109_v0 = vadd.f32 %v4319_v23, %v2053_v47  ;;  %v2054_v60 = vmax.f32 %v1526_v12, %v1858_v18  ;;  %v4825_v47 = vmax.f32 %v3783_v16, %v3785_v17  ;;  %v4826_v16 = vmax.f32 %v3795_v21, %v3797_v22 }
 0x1aa   :  { %v2158_v61 = vmax.f32 %v2109_v0, 0.0  ;;  %v2110_v20 = vadd.f32 %v4319_v23, %v2054_v60 }
 0x1ab   :  { %v1335_v63 = vpop.f32.mrb[104].mxu0  ;;  %v1863_v62 = vpop.f32.mrb[104].mxu1 }
 0x1ac   :  { %v2709_v35 = vpack.c.bf16 %v2158_v61, %v2158_v61  ;;  %v2159_v11 = vmax.f32 %v2110_v20, 0.0  ;;  %v1527_v42 = vmax.f32 %v4824_v36, %v1335_v63  ;;  %v3074_v59 = vpop.f32.mrb[105].mxu0  ;;  %v3176_v4 = vpop.f32.mrb[105].mxu1 }
 0x1ad   :  { %v1338_v5 = vpop.f32.mrb[106].mxu0  ;;  %v1866_v30 = vpop.f32.mrb[106].mxu1 }
 0x1ae   :  { %2405 = vst.msk [vmem:[%s4716_s6] sm:$0xf] %vm2404_vm4, %v2709_v35  ;;  %v2710_v0 = vpack.c.bf16 %v2159_v11, %v2159_v11  ;;  %v2055_v18 = vmax.f32 %v1527_v42, %v1863_v62  ;;  %v1528_v2 = vmax.f32 %v4825_v47, %v1338_v5  ;;  %v3075_v12 = vpop.f32.mrb[107].mxu0  ;;  %v3177_v54 = vpop.f32.mrb[107].mxu1  ;;  %v4827_v5 = vmax.f32 %v3807_v28, %v3809_v29 }
 0x1af   :  { %v4828_v28 = vmax.f32 %v3819_v33, %v3821_v34 }
 0x1b0   :  { %2406 = vst.msk [vmem:[%s4716_s6 + $0x4] sm:$0xf] %vm2404_vm4, %v2710_v0  ;;  %v2111_v9 = vadd.f32 %v4319_v23, %v2055_v18  ;;  %v2056_v10 = vmax.f32 %v1528_v2, %v1866_v30 }
 0x1b2   :  { %v2160_v59 = vmax.f32 %v2111_v9, 0.0  ;;  %v2112_v6 = vadd.f32 %v4319_v23, %v2056_v10 }
 0x1b3   :  { %v1343_v60 = vpop.f32.mrb[108].mxu0  ;;  %v1871_v11 = vpop.f32.mrb[108].mxu1 }
 0x1b4   :  { %v2711_v61 = vpack.c.bf16 %v2160_v59, %v2160_v59  ;;  %v2161_v20 = vmax.f32 %v2112_v6, 0.0  ;;  %v1529_v17 = vmax.f32 %v4826_v16, %v1343_v60  ;;  %v3078_v63 = vpop.f32.mrb[109].mxu0  ;;  %v3180_v62 = vpop.f32.mrb[109].mxu1  ;;  %v4829_v16 = vmax.f32 %v3831_v40, %v3833_v41 }
 0x1b5   :  { %v1346_v35 = vpop.f32.mrb[110].mxu0  ;;  %v1874_v36 = vpop.f32.mrb[110].mxu1  ;;  %v4830_v40 = vmax.f32 %v3843_v45, %v3845_v46 }
 0x1b6   :  { %2407 = vst.msk [vmem:[%s4716_s6 + $0x8] sm:$0xf] %vm2404_vm4, %v2711_v61  ;;  %v2712_v42 = vpack.c.bf16 %v2161_v20, %v2161_v20  ;;  %v2057_v4 = vmax.f32 %v1529_v17, %v1871_v11  ;;  %v1530_v30 = vmax.f32 %v4827_v5, %v1346_v35  ;;  %v3079_v0 = vpop.f32.mrb[111].mxu0  ;;  %v3181_v18 = vpop.f32.mrb[111].mxu1 }
 0x1b8   :  { %2408 = vst.msk [vmem:[%s4716_s6 + $0xc] sm:$0xf] %vm2404_vm4, %v2712_v42  ;;  %v2113_v21 = vadd.f32 %v4319_v23, %v2057_v4  ;;  %v2058_v22 = vmax.f32 %v1530_v30, %v1874_v36 }
 0x1ba   :  { %v2162_v47 = vmax.f32 %v2113_v21, 0.0  ;;  %v2114_v2 = vadd.f32 %v4319_v23, %v2058_v22 }
 0x1bb   :  { %v1351_v12 = vpop.f32.mrb[112].mxu0  ;;  %v1879_v54 = vpop.f32.mrb[112].mxu1 }
 0x1bc   :  { %v2713_v9 = vpack.c.bf16 %v2162_v47, %v2162_v47  ;;  %v2163_v10 = vmax.f32 %v2114_v2, 0.0  ;;  %v1531_v29 = vmax.f32 %v4828_v28, %v1351_v12  ;;  %v3082_v59 = vpop.f32.mrb[113].mxu0  ;;  %v3184_v6 = vpop.f32.mrb[113].mxu1  ;;  %v4831_v12 = vmax.f32 %v3855_v52, %v3857_v53 }
 0x1bd   :  { %v1354_v60 = vpop.f32.mrb[114].mxu0  ;;  %v1882_v11 = vpop.f32.mrb[114].mxu1  ;;  %v4832_v52 = vmax.f32 %v3867_v57, %v3869_v58 }
 0x1be   :  { %2409 = vst.msk [vmem:[%s4716_s6 + $0x10] sm:$0xf] %vm2404_vm4, %v2713_v9  ;;  %v2714_v61 = vpack.c.bf16 %v2163_v10, %v2163_v10  ;;  %v2059_v20 = vmax.f32 %v1531_v29, %v1879_v54  ;;  %v1532_v17 = vmax.f32 %v4829_v16, %v1354_v60  ;;  %v3083_v63 = vpop.f32.mrb[115].mxu0  ;;  %v3185_v62 = vpop.f32.mrb[115].mxu1 }
 0x1c0   :  { %2410 = vst.msk [vmem:[%s4716_s6 + $0x14] sm:$0xf] %vm2404_vm4, %v2714_v61  ;;  %v2115_v33 = vadd.f32 %v4319_v23, %v2059_v20  ;;  %v2060_v34 = vmax.f32 %v1532_v17, %v1882_v11 }
 0x1c2   :  { %v2164_v35 = vmax.f32 %v2115_v33, 0.0  ;;  %v2116_v36 = vadd.f32 %v4319_v23, %v2060_v34  ;;  %v4833_v33 = vmax.f32 %v3879_v7, %v3881_v8  ;;  %v4834_v7 = vmax.f32 %v3891_v15, %v3893_v19 }
 0x1c3   :  { %v1359_v42 = vpop.f32.mrb[116].mxu0  ;;  %v1887_v4 = vpop.f32.mrb[116].mxu1 }
 0x1c4   :  { %v2715_v5 = vpack.c.bf16 %v2164_v35, %v2164_v35  ;;  %v2165_v30 = vmax.f32 %v2116_v36, 0.0  ;;  %v1533_v41 = vmax.f32 %v4830_v40, %v1359_v42  ;;  %v3086_v0 = vpop.f32.mrb[117].mxu0  ;;  %v3188_v18 = vpop.f32.mrb[117].mxu1 }
 0x1c5   :  { %v1362_v21 = vpop.f32.mrb[118].mxu0  ;;  %v1890_v22 = vpop.f32.mrb[118].mxu1 }
 0x1c6   :  { %2411 = vst.msk [vmem:[%s4716_s6 + $0x18] sm:$0xf] %vm2404_vm4, %v2715_v5  ;;  %v2716_v47 = vpack.c.bf16 %v2165_v30, %v2165_v30  ;;  %v2061_v2 = vmax.f32 %v1533_v41, %v1887_v4  ;;  %v1534_v54 = vmax.f32 %v4831_v12, %v1362_v21  ;;  %v3087_v9 = vpop.f32.mrb[119].mxu0  ;;  %v3189_v10 = vpop.f32.mrb[119].mxu1  ;;  %v4835_v12 = vmax.f32 %v3903_v31, %v3905_v32 }
 0x1c7   :  { %v4836_v31 = vmax.f32 %v3915_v39, %v3917_v43 }
 0x1c8   :  { %2412 = vst.msk [vmem:[%s4716_s6 + $0x1c] sm:$0xf] %vm2404_vm4, %v2716_v47  ;;  %v2117_v45 = vadd.f32 %v4319_v23, %v2061_v2  ;;  %v2062_v46 = vmax.f32 %v1534_v54, %v1890_v22 }
 0x1ca   :  { %v2166_v28 = vmax.f32 %v2117_v45, 0.0  ;;  %v2118_v29 = vadd.f32 %v4319_v23, %v2062_v46 }
 0x1cb   :  { %v1367_v59 = vpop.f32.mrb[120].mxu0  ;;  %v1895_v6 = vpop.f32.mrb[120].mxu1 }
 0x1cc   :  { %v2717_v60 = vpack.c.bf16 %v2166_v28, %v2166_v28  ;;  %v2167_v11 = vmax.f32 %v2118_v29, 0.0  ;;  %v1535_v53 = vmax.f32 %v4832_v52, %v1367_v59  ;;  %v3090_v61 = vpop.f32.mrb[121].mxu0  ;;  %v3192_v20 = vpop.f32.mrb[121].mxu1 }
 0x1cd   :  { %v1370_v16 = vpop.f32.mrb[122].mxu0  ;;  %v1898_v17 = vpop.f32.mrb[122].mxu1 }
 0x1ce   :  { %2413 = vst.msk [vmem:[%s4716_s6 + $0x20] sm:$0xf] %vm2404_vm4, %v2717_v60  ;;  %v2718_v63 = vpack.c.bf16 %v2167_v11, %v2167_v11  ;;  %v2063_v62 = vmax.f32 %v1535_v53, %v1895_v6  ;;  %v1536_v34 = vmax.f32 %v4833_v33, %v1370_v16  ;;  %v3091_v35 = vpop.f32.mrb[123].mxu0  ;;  %v3193_v36 = vpop.f32.mrb[123].mxu1  ;;  %v4837_v16 = vmax.f32 %v3927_v55, %v3929_v56 }
 0x1cf   :  { %v4838_v55 = vmax.f32 %v3939_v3, %v3941_v13 }
 0x1d0   :  { %2414 = vst.msk [vmem:[%s4716_s6 + $0x24] sm:$0xf] %vm2404_vm4, %v2718_v63  ;;  %v2119_v57 = vadd.f32 %v4319_v23, %v2063_v62  ;;  %v2064_v58 = vmax.f32 %v1536_v34, %v1898_v17 }
 0x1d2   :  { %v2168_v42 = vmax.f32 %v2119_v57, 0.0  ;;  %v2120_v4 = vadd.f32 %v4319_v23, %v2064_v58 }
 0x1d3   :  { %v1375_v5 = vpop.f32.mrb[124].mxu0  ;;  %v1903_v30 = vpop.f32.mrb[124].mxu1 }
 0x1d4   :  { %v2719_v40 = vpack.c.bf16 %v2168_v42, %v2168_v42  ;;  %v2169_v41 = vmax.f32 %v2120_v4, 0.0  ;;  %v1537_v8 = vmax.f32 %v4834_v7, %v1375_v5  ;;  %v3094_v0 = vpop.f32.mrb[125].mxu0  ;;  %v3196_v18 = vpop.f32.mrb[125].mxu1  ;;  %v4839_v7 = vmax.f32 %v3951_v37, %v3953_v38 }
 0x1d5   :  { %v1378_v21 = vpop.f32.mrb[126].mxu0  ;;  %v1906_v22 = vpop.f32.mrb[126].mxu1  ;;  %v4840_v37 = vmax.f32 %v3963_v51, %v3965_v1 }
 0x1d6   :  { %2415 = vst.msk [vmem:[%s4716_s6 + $0x28] sm:$0xf] %vm2404_vm4, %v2719_v40  ;;  %v2720_v47 = vpack.c.bf16 %v2169_v41, %v2169_v41  ;;  %v2065_v2 = vmax.f32 %v1537_v8, %v1903_v30  ;;  %v1538_v54 = vmax.f32 %v4835_v12, %v1378_v21  ;;  %v3095_v9 = vpop.f32.mrb[127].mxu0  ;;  %v3197_v10 = vpop.f32.mrb[127].mxu1 }
 0x1d8   :  { %2416 = vst.msk [vmem:[%s4716_s6 + $0x2c] sm:$0xf] %vm2404_vm4, %v2720_v47  ;;  %v2121_v15 = vadd.f32 %v4319_v23, %v2065_v2  ;;  %v2066_v19 = vmax.f32 %v1538_v54, %v1906_v22 }
 0x1da   :  { %v2170_v45 = vmax.f32 %v2121_v15, 0.0  ;;  %v2122_v46 = vadd.f32 %v4319_v23, %v2066_v19 }
 0x1db   :  { %v1383_v28 = vpop.f32.mrb[128].mxu0  ;;  %v1911_v29 = vpop.f32.mrb[128].mxu1 }
 0x1dc   :  { %v2721_v59 = vpack.c.bf16 %v2170_v45, %v2170_v45  ;;  %v2171_v6 = vmax.f32 %v2122_v46, 0.0  ;;  %v1539_v32 = vmax.f32 %v4836_v31, %v1383_v28  ;;  %v3098_v60 = vpop.f32.mrb[129].mxu0  ;;  %v3200_v11 = vpop.f32.mrb[129].mxu1  ;;  %v4841_v28 = vmax.f32 %v3975_v49, %v3977_v50 }
 0x1dd   :  { %v1386_v52 = vpop.f32.mrb[130].mxu0  ;;  %v1914_v53 = vpop.f32.mrb[130].mxu1  ;;  %v4842_v49 = vmax.f32 %v3987_v24, %v3989_v25 }
 0x1de   :  { %2417 = vst.msk [vmem:[%s4716_s6 + $0x30] sm:$0xf] %vm2404_vm4, %v2721_v59  ;;  %v2722_v61 = vpack.c.bf16 %v2171_v6, %v2171_v6  ;;  %v2067_v20 = vmax.f32 %v1539_v32, %v1911_v29  ;;  %v1540_v17 = vmax.f32 %v4837_v16, %v1386_v52  ;;  %v3099_v63 = vpop.f32.mrb[131].mxu0  ;;  %v3201_v62 = vpop.f32.mrb[131].mxu1 }
 0x1e0   :  { %2418 = vst.msk [vmem:[%s4716_s6 + $0x34] sm:$0xf] %vm2404_vm4, %v2722_v61  ;;  %v2123_v39 = vadd.f32 %v4319_v23, %v2067_v20  ;;  %v2068_v43 = vmax.f32 %v1540_v17, %v1914_v53 }
 0x1e2   :  { %v2172_v33 = vmax.f32 %v2123_v39, 0.0  ;;  %v2124_v34 = vadd.f32 %v4319_v23, %v2068_v43  ;;  %v4843_v39 = vmax.f32 %v3999_v27, %v4001_v44  ;;  %v4844_v44 = vmax.f32 %v4011_v48, %v4013_v14 }
 0x1e3   :  { %v1391_v35 = vpop.f32.mrb[132].mxu0  ;;  %v1919_v36 = vpop.f32.mrb[132].mxu1 }
 0x1e4   :  { %v2723_v57 = vpack.c.bf16 %v2172_v33, %v2172_v33  ;;  %v2173_v58 = vmax.f32 %v2124_v34, 0.0  ;;  %v1541_v56 = vmax.f32 %v4838_v55, %v1391_v35  ;;  %v3102_v42 = vpop.f32.mrb[133].mxu0  ;;  %v3204_v4 = vpop.f32.mrb[133].mxu1 }
 0x1e5   :  { %v1394_v5 = vpop.f32.mrb[134].mxu0  ;;  %v1922_v30 = vpop.f32.mrb[134].mxu1 }
 0x1e6   :  { %2419 = vst.msk [vmem:[%s4716_s6 + $0x38] sm:$0xf] %vm2404_vm4, %v2723_v57  ;;  %v2724_v40 = vpack.c.bf16 %v2173_v58, %v2173_v58  ;;  %v2069_v41 = vmax.f32 %v1541_v56, %v1919_v36  ;;  %v1542_v8 = vmax.f32 %v4839_v7, %v1394_v5  ;;  %v3103_v0 = vpop.f32.mrb[135].mxu0  ;;  %v3205_v18 = vpop.f32.mrb[135].mxu1  ;;  %v4845_v7 = vld [vmem:[#allocation2_spill] sm:$0xff] }
 0x1e8   :  { %2420 = vst.msk [vmem:[%s4716_s6 + $0x3c] sm:$0xf] %vm2404_vm4, %v2724_v40  ;;  %v2125_v3 = vadd.f32 %v4319_v23, %v2069_v41  ;;  %v2070_v13 = vmax.f32 %v1542_v8, %v1922_v30  ;;  %v4846_v8 = vmax.f32 %v4023_v26, %v4845_v7  ;;  %v4848_v26 = vld [vmem:[#allocation4_spill] sm:$0xff] }
 0x1ea   :  { %v2174_v21 = vmax.f32 %v2125_v3, 0.0  ;;  %v2126_v22 = vadd.f32 %v4319_v23, %v2070_v13 }
 0x1eb   :  { %v1399_v47 = vpop.f32.mrb[136].mxu0  ;;  %v1927_v2 = vpop.f32.mrb[136].mxu1 }
 0x1ec   :  { %v2725_v12 = vpack.c.bf16 %v2174_v21, %v2174_v21  ;;  %v2175_v54 = vmax.f32 %v2126_v22, 0.0  ;;  %v1543_v38 = vmax.f32 %v4840_v37, %v1399_v47  ;;  %v3106_v9 = vpop.f32.mrb[137].mxu0  ;;  %v3208_v10 = vpop.f32.mrb[137].mxu1 }
 0x1ed   :  { %v1402_v15 = vpop.f32.mrb[138].mxu0  ;;  %v1930_v19 = vpop.f32.mrb[138].mxu1 }
 0x1ee   :  { %2421 = vst.msk [vmem:[%s4716_s6 + $0x40] sm:$0xf] %vm2404_vm4, %v2725_v12  ;;  %v2726_v45 = vpack.c.bf16 %v2175_v54, %v2175_v54  ;;  %v2071_v46 = vmax.f32 %v1543_v38, %v1927_v2  ;;  %v1544_v29 = vmax.f32 %v4841_v28, %v1402_v15  ;;  %v3107_v59 = vpop.f32.mrb[139].mxu0  ;;  %v3209_v6 = vpop.f32.mrb[139].mxu1  ;;  %v4847_v54 = vld [vmem:[#allocation3_spill] sm:$0xff]  ;;  %v4850_v28 = vld [vmem:[#allocation5_spill] sm:$0xff] }
 0x1ef   :  { %v4849_v37 = vmax.f32 %v4847_v54, %v4848_v26 }
 0x1f0   :  { %2422 = vst.msk [vmem:[%s4716_s6 + $0x44] sm:$0xf] %vm2404_vm4, %v2726_v45  ;;  %v2127_v51 = vadd.f32 %v4319_v23, %v2071_v46  ;;  %v2072_v1 = vmax.f32 %v1544_v29, %v1930_v19  ;;  %v4851_v29 = vld [vmem:[#allocation6_spill] sm:$0xff] }
 0x1f1   :  { %v4852_v59 = vmax.f32 %v4850_v28, %v4851_v29  ;;  %v4866_v28 = vld [vmem:[#allocation16_spill] sm:$0xff] }
 0x1f2   :  { %v2176_v31 = vmax.f32 %v2127_v51, 0.0  ;;  %v2128_v32 = vadd.f32 %v4319_v23, %v2072_v1 }
 0x1f3   :  { %v1407_v60 = vpop.f32.mrb[140].mxu0  ;;  %v1935_v11 = vpop.f32.mrb[140].mxu1 }
 0x1f4   :  { %v2727_v52 = vpack.c.bf16 %v2176_v31, %v2176_v31  ;;  %v2177_v53 = vmax.f32 %v2128_v32, 0.0  ;;  %v1545_v50 = vmax.f32 %v4842_v49, %v1407_v60  ;;  %v3110_v61 = vpop.f32.mrb[141].mxu0  ;;  %v3212_v20 = vpop.f32.mrb[141].mxu1 }
 0x1f5   :  { %v1410_v16 = vpop.f32.mrb[142].mxu0  ;;  %v1938_v17 = vpop.f32.mrb[142].mxu1  ;;  %v4853_v61 = vld [vmem:[#allocation7_spill] sm:$0xff]  ;;  %v4854_v20 = vld [vmem:[#allocation8_spill] sm:$0xff] }
 0x1f6   :  { %2423 = vst.msk [vmem:[%s4716_s6 + $0x48] sm:$0xf] %vm2404_vm4, %v2727_v52  ;;  %v2728_v63 = vpack.c.bf16 %v2177_v53, %v2177_v53  ;;  %v2073_v62 = vmax.f32 %v1545_v50, %v1935_v11  ;;  %v1546_v43 = vmax.f32 %v4843_v39, %v1410_v16  ;;  %v3111_v33 = vpop.f32.mrb[143].mxu0  ;;  %v3213_v34 = vpop.f32.mrb[143].mxu1  ;;  %v4855_v16 = vmax.f32 %v4853_v61, %v4854_v20 }
 0x1f8   :  { %2424 = vst.msk [vmem:[%s4716_s6 + $0x4c] sm:$0xf] %vm2404_vm4, %v2728_v63  ;;  %v2129_v24 = vadd.f32 %v4319_v23, %v2073_v62  ;;  %v2074_v25 = vmax.f32 %v1546_v43, %v1938_v17 }
 0x1fa   :  { %v2178_v35 = vmax.f32 %v2129_v24, 0.0  ;;  %v2130_v36 = vadd.f32 %v4319_v23, %v2074_v25  ;;  %v4856_v24 = vld [vmem:[#allocation9_spill] sm:$0xff]  ;;  %v4857_v25 = vld [vmem:[#allocation10_spill] sm:$0xff] }
 0x1fb   :  { %v1415_v57 = vpop.f32.mrb[144].mxu0  ;;  %v1943_v58 = vpop.f32.mrb[144].mxu1 }
 0x1fc   :  { %v2729_v55 = vpack.c.bf16 %v2178_v35, %v2178_v35  ;;  %v2179_v56 = vmax.f32 %v2130_v36, 0.0  ;;  %v1547_v27 = vmax.f32 %v4844_v44, %v1415_v57  ;;  %v3114_v42 = vpop.f32.mrb[145].mxu0  ;;  %v3216_v4 = vpop.f32.mrb[145].mxu1  ;;  %v4858_v35 = vmax.f32 %v4856_v24, %v4857_v25  ;;  %v4872_v24 = vld [vmem:[#allocation20_spill] sm:$0xff] }
 0x1fd   :  { %v1418_v5 = vpop.f32.mrb[146].mxu0  ;;  %v1946_v30 = vpop.f32.mrb[146].mxu1 }
 0x1fe   :  { %2425 = vst.msk [vmem:[%s4716_s6 + $0x50] sm:$0xf] %vm2404_vm4, %v2729_v55  ;;  %v2730_v40 = vpack.c.bf16 %v2179_v56, %v2179_v56  ;;  %v2075_v41 = vmax.f32 %v1547_v27, %v1943_v58  ;;  %v1548_v0 = vmax.f32 %v4846_v8, %v1418_v5  ;;  %v3115_v18 = vpop.f32.mrb[147].mxu0  ;;  %v3217_v3 = vpop.f32.mrb[147].mxu1 }
 0x200   :  { %2426 = vst.msk [vmem:[%s4716_s6 + $0x54] sm:$0xf] %vm2404_vm4, %v2730_v40  ;;  %v2131_v48 = vadd.f32 %v4319_v23, %v2075_v41  ;;  %v2076_v14 = vmax.f32 %v1548_v0, %v1946_v30  ;;  %v4859_v40 = vld [vmem:[#allocation11_spill] sm:$0xff]  ;;  %v4860_v41 = vld [vmem:[#allocation12_spill] sm:$0xff] }
 0x201   :  { %v4861_v7 = vmax.f32 %v4859_v40, %v4860_v41 }
 0x202   :  { %v2180_v13 = vmax.f32 %v2131_v48, 0.0  ;;  %v2132_v21 = vadd.f32 %v4319_v23, %v2076_v14 }
 0x203   :  { %v1423_v22 = vpop.f32.mrb[148].mxu0  ;;  %v1951_v47 = vpop.f32.mrb[148].mxu1 }
 0x204   :  { %v2731_v2 = vpack.c.bf16 %v2180_v13, %v2180_v13  ;;  %v2181_v12 = vmax.f32 %v2132_v21, 0.0  ;;  %v1549_v38 = vmax.f32 %v4849_v37, %v1423_v22  ;;  %v3118_v9 = vpop.f32.mrb[149].mxu0  ;;  %v3220_v10 = vpop.f32.mrb[149].mxu1  ;;  %v4862_v21 = vld [vmem:[#allocation13_spill] sm:$0xff]  ;;  %v4863_v22 = vld [vmem:[#allocation14_spill] sm:$0xff] }
 0x205   :  { %v1426_v15 = vpop.f32.mrb[150].mxu0  ;;  %v1954_v19 = vpop.f32.mrb[150].mxu1 }
 0x206   :  { %2427 = vst.msk [vmem:[%s4716_s6 + $0x58] sm:$0xf] %vm2404_vm4, %v2731_v2  ;;  %v2732_v45 = vpack.c.bf16 %v2181_v12, %v2181_v12  ;;  %v2077_v46 = vmax.f32 %v1549_v38, %v1951_v47  ;;  %v1550_v6 = vmax.f32 %v4852_v59, %v1426_v15  ;;  %v3119_v51 = vpop.f32.mrb[151].mxu0  ;;  %v3221_v1 = vpop.f32.mrb[151].mxu1  ;;  %v4864_v47 = vmax.f32 %v4862_v21, %v4863_v22  ;;  %v4878_v21 = vld [vmem:[#allocation24_spill] sm:$0xff] }
 0x208   :  { %2428 = vst.msk [vmem:[%s4716_s6 + $0x5c] sm:$0xf] %vm2404_vm4, %v2732_v45  ;;  %v2133_v31 = vadd.f32 %v4319_v23, %v2077_v46  ;;  %v2078_v32 = vmax.f32 %v1550_v6, %v1954_v19  ;;  %v4865_v46 = vld [vmem:[#allocation15_spill] sm:$0xff] }
 0x209   :  { %v4867_v29 = vmax.f32 %v4865_v46, %v4866_v28 }
 0x20a   :  { %v2182_v60 = vmax.f32 %v2133_v31, 0.0  ;;  %v2134_v11 = vadd.f32 %v4319_v23, %v2078_v32 }
 0x20b   :  { %v1431_v52 = vpop.f32.mrb[152].mxu0  ;;  %v1959_v53 = vpop.f32.mrb[152].mxu1 }
 0x20c   :  { %v2733_v49 = vpack.c.bf16 %v2182_v60, %v2182_v60  ;;  %v2183_v50 = vmax.f32 %v2134_v11, 0.0  ;;  %v1551_v17 = vmax.f32 %v4855_v16, %v1431_v52  ;;  %v3122_v63 = vpop.f32.mrb[153].mxu0  ;;  %v3224_v62 = vpop.f32.mrb[153].mxu1  ;;  %v4868_v11 = vld [vmem:[#allocation17_spill] sm:$0xff]  ;;  %v4869_v52 = vld [vmem:[#allocation18_spill] sm:$0xff] }
 0x20d   :  { %v1434_v39 = vpop.f32.mrb[154].mxu0  ;;  %v1962_v43 = vpop.f32.mrb[154].mxu1 }
 0x20e   :  { %2429 = vst.msk [vmem:[%s4716_s6 + $0x60] sm:$0xf] %vm2404_vm4, %v2733_v49  ;;  %v2734_v33 = vpack.c.bf16 %v2183_v50, %v2183_v50  ;;  %v2079_v34 = vmax.f32 %v1551_v17, %v1959_v53  ;;  %v1552_v36 = vmax.f32 %v4858_v35, %v1434_v39  ;;  %v3123_v57 = vpop.f32.mrb[155].mxu0  ;;  %v3225_v58 = vpop.f32.mrb[155].mxu1  ;;  %v4870_v53 = vmax.f32 %v4868_v11, %v4869_v52  ;;  %v4884_v11 = vld [vmem:[#allocation28_spill] sm:$0xff] }
 0x210   :  { %2430 = vst.msk [vmem:[%s4716_s6 + $0x64] sm:$0xf] %vm2404_vm4, %v2734_v33  ;;  %v2135_v55 = vadd.f32 %v4319_v23, %v2079_v34  ;;  %v2080_v56 = vmax.f32 %v1552_v36, %v1962_v43  ;;  %v4871_v34 = vld [vmem:[#allocation19_spill] sm:$0xff] }
 0x211   :  { %v4873_v25 = vmax.f32 %v4871_v34, %v4872_v24 }
 0x212   :  { %v2184_v44 = vmax.f32 %v2135_v55, 0.0  ;;  %v2136_v27 = vadd.f32 %v4319_v23, %v2080_v56 }
 0x213   :  { %v1439_v42 = vpop.f32.mrb[156].mxu0  ;;  %v1967_v4 = vpop.f32.mrb[156].mxu1 }
 0x214   :  { %v2735_v5 = vpack.c.bf16 %v2184_v44, %v2184_v44  ;;  %v2185_v30 = vmax.f32 %v2136_v27, 0.0  ;;  %v1553_v8 = vmax.f32 %v4861_v7, %v1439_v42  ;;  %v3126_v0 = vpop.f32.mrb[157].mxu0  ;;  %v3228_v18 = vpop.f32.mrb[157].mxu1  ;;  %v4874_v27 = vld [vmem:[#allocation21_spill] sm:$0xff]  ;;  %v4875_v42 = vld [vmem:[#allocation22_spill] sm:$0xff] }
 0x215   :  { %v1442_v3 = vpop.f32.mrb[158].mxu0  ;;  %v1970_v48 = vpop.f32.mrb[158].mxu1 }
 0x216   :  { %2431 = vst.msk [vmem:[%s4716_s6 + $0x68] sm:$0xf] %vm2404_vm4, %v2735_v5  ;;  %v2736_v14 = vpack.c.bf16 %v2185_v30, %v2185_v30  ;;  %v2081_v13 = vmax.f32 %v1553_v8, %v1967_v4  ;;  %v1554_v2 = vmax.f32 %v4864_v47, %v1442_v3  ;;  %v3127_v12 = vpop.f32.mrb[159].mxu0  ;;  %v3229_v54 = vpop.f32.mrb[159].mxu1  ;;  %v4876_v4 = vmax.f32 %v4874_v27, %v4875_v42  ;;  %v4890_v27 = vld [vmem:[#allocation32_spill] sm:$0xff] }
 0x218   :  { %2432 = vst.msk [vmem:[%s4716_s6 + $0x6c] sm:$0xf] %vm2404_vm4, %v2736_v14  ;;  %v2137_v26 = vadd.f32 %v4319_v23, %v2081_v13  ;;  %v2082_v37 = vmax.f32 %v1554_v2, %v1970_v48  ;;  %v4877_v13 = vld [vmem:[#allocation23_spill] sm:$0xff] }
 0x219   :  { %v4879_v22 = vmax.f32 %v4877_v13, %v4878_v21 }
 0x21a   :  { %v2186_v38 = vmax.f32 %v2137_v26, 0.0  ;;  %v2138_v9 = vadd.f32 %v4319_v23, %v2082_v37 }
 0x21b   :  { %v1447_v10 = vpop.f32.mrb[160].mxu0  ;;  %v1975_v15 = vpop.f32.mrb[160].mxu1 }
 0x21c   :  { %v2737_v19 = vpack.c.bf16 %v2186_v38, %v2186_v38  ;;  %v2187_v45 = vmax.f32 %v2138_v9, 0.0  ;;  %v1555_v59 = vmax.f32 %v4867_v29, %v1447_v10  ;;  %v3130_v6 = vpop.f32.mrb[161].mxu0  ;;  %v3232_v51 = vpop.f32.mrb[161].mxu1  ;;  %v4880_v9 = vld [vmem:[#allocation25_spill] sm:$0xff]  ;;  %v4881_v10 = vld [vmem:[#allocation26_spill] sm:$0xff] }
 0x21d   :  { %v1450_v1 = vpop.f32.mrb[162].mxu0  ;;  %v1978_v31 = vpop.f32.mrb[162].mxu1 }
 0x21e   :  { %2433 = vst.msk [vmem:[%s4716_s6 + $0x70] sm:$0xf] %vm2404_vm4, %v2737_v19  ;;  %v2738_v32 = vpack.c.bf16 %v2187_v45, %v2187_v45  ;;  %v2083_v60 = vmax.f32 %v1555_v59, %v1975_v15  ;;  %v1556_v49 = vmax.f32 %v4870_v53, %v1450_v1  ;;  %v3131_v50 = vpop.f32.mrb[163].mxu0  ;;  %v3233_v61 = vpop.f32.mrb[163].mxu1  ;;  %v4882_v15 = vmax.f32 %v4880_v9, %v4881_v10  ;;  %v4896_v9 = vld [vmem:[#allocation36_spill] sm:$0xff] }
 0x220   :  { %2434 = vst.msk [vmem:[%s4716_s6 + $0x74] sm:$0xf] %vm2404_vm4, %v2738_v32  ;;  %v2139_v20 = vadd.f32 %v4319_v23, %v2083_v60  ;;  %v2084_v16 = vmax.f32 %v1556_v49, %v1978_v31  ;;  %v4883_v60 = vld [vmem:[#allocation27_spill] sm:$0xff] }
 0x221   :  { %v4885_v52 = vmax.f32 %v4883_v60, %v4884_v11 }
 0x222   :  { %v2188_v17 = vmax.f32 %v2139_v20, 0.0  ;;  %v2140_v63 = vadd.f32 %v4319_v23, %v2084_v16 }
 0x223   :  { %v1455_v62 = vpop.f32.mrb[164].mxu0  ;;  %v1983_v39 = vpop.f32.mrb[164].mxu1 }
 0x224   :  { %v2739_v43 = vpack.c.bf16 %v2188_v17, %v2188_v17  ;;  %v2189_v33 = vmax.f32 %v2140_v63, 0.0  ;;  %v1557_v35 = vmax.f32 %v4873_v25, %v1455_v62  ;;  %v3134_v36 = vpop.f32.mrb[165].mxu0  ;;  %v3236_v57 = vpop.f32.mrb[165].mxu1  ;;  %v4886_v63 = vld [vmem:[#allocation29_spill] sm:$0xff]  ;;  %v4887_v62 = vld [vmem:[#allocation30_spill] sm:$0xff] }
 0x225   :  { %v1458_v58 = vpop.f32.mrb[166].mxu0  ;;  %v1986_v55 = vpop.f32.mrb[166].mxu1 }
 0x226   :  { %2435 = vst.msk [vmem:[%s4716_s6 + $0x78] sm:$0xf] %vm2404_vm4, %v2739_v43  ;;  %v2740_v56 = vpack.c.bf16 %v2189_v33, %v2189_v33  ;;  %v2085_v44 = vmax.f32 %v1557_v35, %v1983_v39  ;;  %v1558_v5 = vmax.f32 %v4876_v4, %v1458_v58  ;;  %v3135_v30 = vpop.f32.mrb[167].mxu0  ;;  %v3237_v40 = vpop.f32.mrb[167].mxu1  ;;  %v4888_v39 = vmax.f32 %v4886_v63, %v4887_v62  ;;  %v4902_v63 = vld [vmem:[#allocation40_spill] sm:$0xff] }
 0x228   :  { %2436 = vst.msk [vmem:[%s4716_s6 + $0x7c] sm:$0xf] %vm2404_vm4, %v2740_v56  ;;  %v2141_v41 = vadd.f32 %v4319_v23, %v2085_v44  ;;  %v2086_v7 = vmax.f32 %v1558_v5, %v1986_v55  ;;  %v4889_v44 = vld [vmem:[#allocation31_spill] sm:$0xff] }
 0x229   :  { %v4891_v42 = vmax.f32 %v4889_v44, %v4890_v27 }
 0x22a   :  { %v2190_v8 = vmax.f32 %v2141_v41, 0.0  ;;  %v2142_v0 = vadd.f32 %v4319_v23, %v2086_v7 }
 0x22b   :  { %v1463_v18 = vpop.f32.mrb[168].mxu0  ;;  %v1991_v3 = vpop.f32.mrb[168].mxu1 }
 0x22c   :  { %v2741_v48 = vpack.c.bf16 %v2190_v8, %v2190_v8  ;;  %v2191_v14 = vmax.f32 %v2142_v0, 0.0  ;;  %v1559_v47 = vmax.f32 %v4879_v22, %v1463_v18  ;;  %v3138_v2 = vpop.f32.mrb[169].mxu0  ;;  %v3240_v12 = vpop.f32.mrb[169].mxu1  ;;  %v4892_v0 = vld [vmem:[#allocation33_spill] sm:$0xff]  ;;  %v4893_v18 = vld [vmem:[#allocation34_spill] sm:$0xff] }
 0x22d   :  { %v1466_v54 = vpop.f32.mrb[170].mxu0  ;;  %v1994_v26 = vpop.f32.mrb[170].mxu1 }
 0x22e   :  { %2437 = vst.msk [vmem:[%s4716_s6 + $0x80] sm:$0xf] %vm2404_vm4, %v2741_v48  ;;  %v2742_v37 = vpack.c.bf16 %v2191_v14, %v2191_v14  ;;  %v2087_v38 = vmax.f32 %v1559_v47, %v1991_v3  ;;  %v1560_v19 = vmax.f32 %v4882_v15, %v1466_v54  ;;  %v3139_v45 = vpop.f32.mrb[171].mxu0  ;;  %v3241_v46 = vpop.f32.mrb[171].mxu1  ;;  %v4894_v3 = vmax.f32 %v4892_v0, %v4893_v18  ;;  %v4908_v0 = vld [vmem:[#allocation44_spill] sm:$0xff] }
 0x230   :  { %2438 = vst.msk [vmem:[%s4716_s6 + $0x84] sm:$0xf] %vm2404_vm4, %v2742_v37  ;;  %v2143_v28 = vadd.f32 %v4319_v23, %v2087_v38  ;;  %v2088_v29 = vmax.f32 %v1560_v19, %v1994_v26  ;;  %v4895_v38 = vld [vmem:[#allocation35_spill] sm:$0xff] }
 0x231   :  { %v4897_v10 = vmax.f32 %v4895_v38, %v4896_v9 }
 0x232   :  { %v2192_v59 = vmax.f32 %v2143_v28, 0.0  ;;  %v2144_v6 = vadd.f32 %v4319_v23, %v2088_v29 }
 0x233   :  { %v1471_v51 = vpop.f32.mrb[172].mxu0  ;;  %v1999_v1 = vpop.f32.mrb[172].mxu1 }
 0x234   :  { %v2743_v31 = vpack.c.bf16 %v2192_v59, %v2192_v59  ;;  %v2193_v32 = vmax.f32 %v2144_v6, 0.0  ;;  %v1561_v53 = vmax.f32 %v4885_v52, %v1471_v51  ;;  %v3142_v49 = vpop.f32.mrb[173].mxu0  ;;  %v3244_v50 = vpop.f32.mrb[173].mxu1  ;;  %v4898_v6 = vld [vmem:[#allocation37_spill] sm:$0xff]  ;;  %v4899_v51 = vld [vmem:[#allocation38_spill] sm:$0xff] }
 0x235   :  { %v1474_v61 = vpop.f32.mrb[174].mxu0  ;;  %v2002_v20 = vpop.f32.mrb[174].mxu1 }
 0x236   :  { %2439 = vst.msk [vmem:[%s4716_s6 + $0x88] sm:$0xf] %vm2404_vm4, %v2743_v31  ;;  %v2744_v16 = vpack.c.bf16 %v2193_v32, %v2193_v32  ;;  %v2089_v17 = vmax.f32 %v1561_v53, %v1999_v1  ;;  %v1562_v43 = vmax.f32 %v4888_v39, %v1474_v61  ;;  %v3143_v33 = vpop.f32.mrb[175].mxu0  ;;  %v3245_v34 = vpop.f32.mrb[175].mxu1  ;;  %v4900_v1 = vmax.f32 %v4898_v6, %v4899_v51  ;;  %v4914_v6 = vld [vmem:[#allocation48_spill] sm:$0xff] }
 0x238   :  { %2440 = vst.msk [vmem:[%s4716_s6 + $0x8c] sm:$0xf] %vm2404_vm4, %v2744_v16  ;;  %v2145_v24 = vadd.f32 %v4319_v23, %v2089_v17  ;;  %v2090_v25 = vmax.f32 %v1562_v43, %v2002_v20  ;;  %v4901_v17 = vld [vmem:[#allocation39_spill] sm:$0xff] }
 0x239   :  { %v4903_v62 = vmax.f32 %v4901_v17, %v4902_v63 }
 0x23a   :  { %v2194_v35 = vmax.f32 %v2145_v24, 0.0  ;;  %v2146_v36 = vadd.f32 %v4319_v23, %v2090_v25 }
 0x23b   :  { %v1479_v57 = vpop.f32.mrb[176].mxu0  ;;  %v2007_v58 = vpop.f32.mrb[176].mxu1 }
 0x23c   :  { %v2745_v55 = vpack.c.bf16 %v2194_v35, %v2194_v35  ;;  %v2195_v56 = vmax.f32 %v2146_v36, 0.0  ;;  %v1563_v4 = vmax.f32 %v4891_v42, %v1479_v57  ;;  %v3146_v5 = vpop.f32.mrb[177].mxu0  ;;  %v3248_v30 = vpop.f32.mrb[177].mxu1  ;;  %v4904_v36 = vld [vmem:[#allocation41_spill] sm:$0xff]  ;;  %v4905_v57 = vld [vmem:[#allocation42_spill] sm:$0xff] }
 0x23d   :  { %v1482_v40 = vpop.f32.mrb[178].mxu0  ;;  %v2010_v41 = vpop.f32.mrb[178].mxu1 }
 0x23e   :  { %2441 = vst.msk [vmem:[%s4716_s6 + $0x90] sm:$0xf] %vm2404_vm4, %v2745_v55  ;;  %v2746_v7 = vpack.c.bf16 %v2195_v56, %v2195_v56  ;;  %v2091_v8 = vmax.f32 %v1563_v4, %v2007_v58  ;;  %v1564_v48 = vmax.f32 %v4894_v3, %v1482_v40  ;;  %v3147_v14 = vpop.f32.mrb[179].mxu0  ;;  %v3249_v13 = vpop.f32.mrb[179].mxu1  ;;  %v4906_v58 = vmax.f32 %v4904_v36, %v4905_v57  ;;  %v4920_v36 = vld [vmem:[#allocation52_spill] sm:$0xff] }
 0x240   :  { %2442 = vst.msk [vmem:[%s4716_s6 + $0x94] sm:$0xf] %vm2404_vm4, %v2746_v7  ;;  %v2147_v21 = vadd.f32 %v4319_v23, %v2091_v8  ;;  %v2092_v22 = vmax.f32 %v1564_v48, %v2010_v41  ;;  %v4907_v8 = vld [vmem:[#allocation43_spill] sm:$0xff] }
 0x241   :  { %v4909_v18 = vmax.f32 %v4907_v8, %v4908_v0 }
 0x242   :  { %v2196_v47 = vmax.f32 %v2147_v21, 0.0  ;;  %v2148_v2 = vadd.f32 %v4319_v23, %v2092_v22 }
 0x243   :  { %v1487_v12 = vpop.f32.mrb[180].mxu0  ;;  %v2015_v54 = vpop.f32.mrb[180].mxu1 }
 0x244   :  { %v2747_v26 = vpack.c.bf16 %v2196_v47, %v2196_v47  ;;  %v2197_v37 = vmax.f32 %v2148_v2, 0.0  ;;  %v1565_v15 = vmax.f32 %v4897_v10, %v1487_v12  ;;  %v3150_v19 = vpop.f32.mrb[181].mxu0  ;;  %v3252_v45 = vpop.f32.mrb[181].mxu1  ;;  %v4910_v2 = vld [vmem:[#allocation45_spill] sm:$0xff]  ;;  %v4911_v12 = vld [vmem:[#allocation46_spill] sm:$0xff] }
 0x245   :  { %v1490_v46 = vpop.f32.mrb[182].mxu0  ;;  %v2018_v28 = vpop.f32.mrb[182].mxu1 }
 0x246   :  { %2443 = vst.msk [vmem:[%s4716_s6 + $0x98] sm:$0xf] %vm2404_vm4, %v2747_v26  ;;  %v2748_v29 = vpack.c.bf16 %v2197_v37, %v2197_v37  ;;  %v2093_v59 = vmax.f32 %v1565_v15, %v2015_v54  ;;  %v1566_v31 = vmax.f32 %v4900_v1, %v1490_v46  ;;  %v3151_v32 = vpop.f32.mrb[183].mxu0  ;;  %v3253_v60 = vpop.f32.mrb[183].mxu1  ;;  %v4912_v54 = vmax.f32 %v4910_v2, %v4911_v12 }
 0x248   :  { %2444 = vst.msk [vmem:[%s4716_s6 + $0x9c] sm:$0xf] %vm2404_vm4, %v2748_v29  ;;  %v2149_v11 = vadd.f32 %v4319_v23, %v2093_v59  ;;  %v2094_v52 = vmax.f32 %v1566_v31, %v2018_v28  ;;  %v4913_v59 = vld [vmem:[#allocation47_spill] sm:$0xff] }
 0x249   :  { %v4915_v51 = vmax.f32 %v4913_v59, %v4914_v6 }
 0x24a   :  { %v2198_v53 = vmax.f32 %v2149_v11, 0.0  ;;  %v2150_v49 = vadd.f32 %v4319_v23, %v2094_v52 }
 0x24b   :  { %v1495_v50 = vpop.f32.mrb[184].mxu0  ;;  %v2023_v61 = vpop.f32.mrb[184].mxu1 }
 0x24c   :  { %v2749_v20 = vpack.c.bf16 %v2198_v53, %v2198_v53  ;;  %v2199_v16 = vmax.f32 %v2150_v49, 0.0  ;;  %v1567_v39 = vmax.f32 %v4903_v62, %v1495_v50  ;;  %v3154_v43 = vpop.f32.mrb[185].mxu0  ;;  %v3256_v33 = vpop.f32.mrb[185].mxu1  ;;  %v4916_v49 = vld [vmem:[#allocation49_spill] sm:$0xff]  ;;  %v4917_v50 = vld [vmem:[#allocation50_spill] sm:$0xff] }
 0x24d   :  { %v1498_v34 = vpop.f32.mrb[186].mxu0  ;;  %v2026_v24 = vpop.f32.mrb[186].mxu1 }
 0x24e   :  { %2445 = vst.msk [vmem:[%s4716_s6 + $0xa0] sm:$0xf] %vm2404_vm4, %v2749_v20  ;;  %v2750_v25 = vpack.c.bf16 %v2199_v16, %v2199_v16  ;;  %v2095_v35 = vmax.f32 %v1567_v39, %v2023_v61  ;;  %v1568_v55 = vmax.f32 %v4906_v58, %v1498_v34  ;;  %v3155_v56 = vpop.f32.mrb[187].mxu0  ;;  %v3257_v44 = vpop.f32.mrb[187].mxu1  ;;  %v4918_v61 = vmax.f32 %v4916_v49, %v4917_v50 }
 0x250   :  { %2446 = vst.msk [vmem:[%s4716_s6 + $0xa4] sm:$0xf] %vm2404_vm4, %v2750_v25  ;;  %v2151_v27 = vadd.f32 %v4319_v23, %v2095_v35  ;;  %v2096_v42 = vmax.f32 %v1568_v55, %v2026_v24  ;;  %v4919_v35 = vld [vmem:[#allocation51_spill] sm:$0xff] }
 0x251   :  { %v4921_v57 = vmax.f32 %v4919_v35, %v4920_v36 }
 0x252   :  { %v2200_v4 = vmax.f32 %v2151_v27, 0.0  ;;  %v2152_v5 = vadd.f32 %v4319_v23, %v2096_v42 }
 0x253   :  { %v1503_v30 = vpop.f32.mrb[188].mxu0  ;;  %v2031_v40 = vpop.f32.mrb[188].mxu1 }
 0x254   :  { %v2751_v41 = vpack.c.bf16 %v2200_v4, %v2200_v4  ;;  %v2201_v7 = vmax.f32 %v2152_v5, 0.0  ;;  %v1569_v3 = vmax.f32 %v4909_v18, %v1503_v30  ;;  %v3158_v48 = vpop.f32.mrb[189].mxu0  ;;  %v3260_v14 = vpop.f32.mrb[189].mxu1 }
 0x255   :  { %v1506_v13 = vpop.f32.mrb[190].mxu0  ;;  %v2034_v21 = vpop.f32.mrb[190].mxu1 }
 0x256   :  { %2447 = vst.msk [vmem:[%s4716_s6 + $0xa8] sm:$0xf] %vm2404_vm4, %v2751_v41  ;;  %v2752_v22 = vpack.c.bf16 %v2201_v7, %v2201_v7  ;;  %v2097_v47 = vmax.f32 %v1569_v3, %v2031_v40  ;;  %v1570_v26 = vmax.f32 %v4912_v54, %v1506_v13  ;;  %v3159_v37 = vpop.f32.mrb[191].mxu0  ;;  %v3261_v38 = vpop.f32.mrb[191].mxu1 }
 0x258   :  { %2448 = vst.msk [vmem:[%s4716_s6 + $0xac] sm:$0xf] %vm2404_vm4, %v2752_v22  ;;  %v2153_v9 = vadd.f32 %v4319_v23, %v2097_v47  ;;  %v2098_v10 = vmax.f32 %v1570_v26, %v2034_v21 }
 0x25a   :  { %v2202_v15 = vmax.f32 %v2153_v9, 0.0  ;;  %v2154_v19 = vadd.f32 %v4319_v23, %v2098_v10 }
 0x25b   :  { %v1511_v45 = vpop.f32.mrb[192].mxu0  ;;  %v2039_v46 = vpop.f32.mrb[192].mxu1 }
 0x25c   :  { %v2753_v28 = vpack.c.bf16 %v2202_v15, %v2202_v15  ;;  %v2203_v29 = vmax.f32 %v2154_v19, 0.0  ;;  %v1571_v1 = vmax.f32 %v4915_v51, %v1511_v45  ;;  %v3162_v31 = vpop.f32.mrb[193].mxu0  ;;  %v3264_v32 = vpop.f32.mrb[193].mxu1 }
 0x25d   :  { %v1514_v60 = vpop.f32.mrb[194].mxu0  ;;  %v2042_v11 = vpop.f32.mrb[194].mxu1 }
 0x25e   :  { %2449 = vst.msk [vmem:[%s4716_s6 + $0xb0] sm:$0xf] %vm2404_vm4, %v2753_v28  ;;  %v2754_v52 = vpack.c.bf16 %v2203_v29, %v2203_v29  ;;  %v2099_v53 = vmax.f32 %v1571_v1, %v2039_v46  ;;  %v1572_v20 = vmax.f32 %v4918_v61, %v1514_v60  ;;  %v3163_v16 = vpop.f32.mrb[195].mxu0  ;;  %v3265_v17 = vpop.f32.mrb[195].mxu1 }
 0x260   :  { %2450 = vst.msk [vmem:[%s4716_s6 + $0xb4] sm:$0xf] %vm2404_vm4, %v2754_v52  ;;  %v2155_v63 = vadd.f32 %v4319_v23, %v2099_v53  ;;  %v2100_v62 = vmax.f32 %v1572_v20, %v2042_v11 }
 0x262   :  { %v2204_v39 = vmax.f32 %v2155_v63, 0.0  ;;  %v2156_v43 = vadd.f32 %v4319_v23, %v2100_v62 }
 0x263   :  { %v1519_v33 = vpop.f32.mrb[196].mxu0  ;;  %v2047_v34 = vpop.f32.mrb[196].mxu1 }
 0x264   :  { %v2755_v24 = vpack.c.bf16 %v2204_v39, %v2204_v39  ;;  %v2205_v25 = vmax.f32 %v2156_v43, 0.0  ;;  %v1573_v58 = vmax.f32 %v4921_v57, %v1519_v33  ;;  %v3166_v55 = vpop.f32.mrb[197].mxu0  ;;  %v3268_v56 = vpop.f32.mrb[197].mxu1 }
 0x265   :  { %v1522_v44 = vpop.f32.mrb[198].mxu0  ;;  %v2050_v27 = vpop.f32.mrb[198].mxu1 }
 0x266   :  { %2451 = vst.msk [vmem:[%s4716_s6 + $0xb8] sm:$0xf] %vm2404_vm4, %v2755_v24  ;;  %v2756_v42 = vpack.c.bf16 %v2205_v25, %v2205_v25  ;;  %v2101_v4 = vmax.f32 %v1573_v58, %v2047_v34  ;;  %v3167_v5 = vpop.f32.mrb[199].mxu0  ;;  %v3269_v30 = vpop.f32.mrb[199].mxu1 }
 0x268   :  { %2452 = vst.msk [vmem:[%s4716_s6 + $0xbc] sm:$0xf] %vm2404_vm4, %v2756_v42  ;;  %v2157_v40 = vadd.f32 %v4319_v23, %v2101_v4 }
 0x26a   :  { %v2206_v41 = vmax.f32 %v2157_v40, 0.0 }
 0x26c   :  { %v2757_v7 = vpack.c.bf16 %v2206_v41, %v2206_v41 }
 0x26e   :  { %2453 = vst.msk [vmem:[%s4716_s6 + $0xc0] sm:$0xf] %vm2404_vm4, %v2757_v7 }

// kernel: simple_cnn_forward.4
= control target key start
LH: loop header
LB: loop body
LE: loop exit
PB: predicated region body
PF: predicated region fallthrough
CT: control target
= control target key end

     0   :  { %v2289_v0 = vmov 0.0   ;;  %vm2290_vm0 = vmmov 0   ;;  %vm294_vm1 = vcmask 261120   ;;  %vm1586_vm2 = vcmask 519168   ;;  %s3065_s4 = inlined_call_operand.vmem [shape: bf16[288,64], index: 4, kind: input, shape index: {}]   ;;  %s3066_s0 = inlined_call_operand.vmem [shape: bf16[104,288], index: 0, kind: input, shape index: {}]   ;;  %s3067_s1 = inlined_call_operand.vmem [shape: bf16[104,288], index: 1, kind: input, shape index: {}]   ;;  %s3068_s2 = inlined_call_operand.vmem [shape: bf16[104,288], index: 2, kind: input, shape index: {}]   ;;  %s3069_s3 = inlined_call_operand.vmem [shape: bf16[104,288], index: 3, kind: input, shape index: {}]   ;;  %s3070_s5 = inlined_call_operand.vmem [shape: f32[1,64], index: 5, kind: input, shape index: {}]   ;;  %s3071_s6 = inlined_call_operand.vmem [shape: bf16[104,64], index: 6, kind: output, shape index: {}]  }
   0x1   :  { %2029 = vmatprep.subr.bf16.mxu1 %v2289_v0  ;;  %v2330_v1 = vld [vmem:[%s3065_s4 + $0x40] sm:$0xff]   ;;  %2033 = vmatprep.mubr.msk.bf16.mxu1 %vm2290_vm0, %v2289_v0  ;;  %v2349_v4 = vld [vmem:[%s3065_s4 + $0x48] sm:$0xff]   ;;  %v2371_v8 = vld [vmem:[%s3065_s4 + $0x50] sm:$0xff]  }
   0x2   :  { %v2337_v2 = vld [vmem:[%s3065_s4 + $0x80] sm:$0xff]   ;;  %1761 = vmatprep.subr.bf16.mxu0 %v2330_v1  ;;  %v2356_v5 = vld [vmem:[%s3065_s4 + $0x88] sm:$0xff]   ;;  %v2377_v9 = vld [vmem:[%s3065_s4 + $0x10] sm:$0xff]  }
   0x3   :  { %v2343_v3 = vld [vmem:[%s3065_s4] sm:$0xff]   ;;  %2030 = vmatpush3.bf16.msra.mxu1 %v2337_v2  ;;  %v2362_v6 = vld [vmem:[%s3065_s4 + $0x8] sm:$0xff]   ;;  %v2384_v10 = vld [vmem:[%s3065_s4 + $0x58] sm:$0xff]  }
   0x4   :  { %1762 = vmatpush3.bf16.msra.mxu0 %v2343_v3  ;;  %2031 = vmatprep.subr.bf16.mxu1 %v2289_v0  ;;  %v2169_v7 = vld [vmem:[%s3066_s0 + $0x8] ss:$12 sps:$4 sm:$0xff]   ;;  %v2394_v11 = vld [vmem:[%s3065_s4 + $0x18] sm:$0xff]   ;;  %v2401_v12 = vld [vmem:[%s3065_s4 + $0x60] sm:$0xff]  }
   0x5   :  { %1763 = vmatprep.subr.bf16.mxu0 %v2349_v4  ;;  %v2174_v13 = vld [vmem:[%s3066_s0 + $0x20] ss:$12 sps:$4 sm:$0xff]   ;;  %v2179_v17 = vld [vmem:[%s3066_s0 + $0x38] ss:$12 sps:$4 sm:$0xff]   ;;  %v2438_v18 = vld [vmem:[%s3065_s4 + $0x70] sm:$0xff]  }
   0x6   :  { %v2411_v14 = vld [vmem:[%s3065_s4 + $0x20] sm:$0xff]   ;;  %v2418_v15 = vld [vmem:[%s3065_s4 + $0x68] sm:$0xff]   ;;  %v2448_v20 = vld [vmem:[%s3065_s4 + $0x30] sm:$0xff]  }
   0x7   :  { %2032 = vmatpush3.bf16.msra.mxu1 %v2356_v5  ;;  %v2424_v16 = vld [vmem:[%s3065_s4 + $0x28] sm:$0xff]   ;;  %v2186_v19 = vld [vmem:[%s3066_s0 + $0x4] ss:$12 sps:$4 sm:$0xff]   ;;  %v2454_v21 = vld [vmem:[%s3065_s4 + $0x78] sm:$0xff]  }
   0x8   :  { %1764 = vmatpush3.bf16.msra.mxu0 %v2362_v6  ;;  %1828 = vmatprep.subr.bf16.mxu1 %v2330_v1  ;;  %v2465_v22 = vld [vmem:[%s3065_s4 + $0x38] sm:$0xff]   ;;  %v2184_v24 = vld [vmem:[%s3066_s0] ss:$12 sps:$4 sm:$0xff]   ;;  %v2190_v26 = vld [vmem:[%s3066_s0 + $0x68] ss:$12 sps:$4 sm:$0xff]  }
   0x9   :  { %1765 = vmatprep.subr.bf16.mxu0 %v2371_v8  ;;  %348 = vmatprep.mubr.bf16.mxu0 %v2186_v19  ;;  %v2187_v23 = vld [vmem:[%s3066_s0 + $0x50] ss:$12 sps:$4 sm:$0xff]   ;;  %v2191_v27 = vld [vmem:[%s3066_s0 + $0x18] ss:$12 sps:$4 sm:$0xff]   ;;  %v2192_v28 = vld [vmem:[%s3066_s0 + $0x34] ss:$12 sps:$4 sm:$0xff]  }
   0xa   :  { %2034 = vmatmul.mubr.msk.bf16.vlgmr.msra.gmra.mrb[0].mxu1 %vm294_vm1, %v2169_v7  ;;  %v2188_v25 = vld [vmem:[%s3066_s0 + $0x1c] ss:$12 sps:$4 sm:$0xff]   ;;  %v2194_v29 = vld [vmem:[%s3066_s0 + $0x80] ss:$12 sps:$4 sm:$0xff]   ;;  %v2198_v32 = vld [vmem:[%s3066_s0 + $0x98] ss:$0 sps:$4 sm:$0xff]  }
   0xb   :  { %2037 = vmatprep.mubr.msk.bf16.mxu1 %vm2290_vm0, %v2289_v0  ;;  %1829 = vmatpush3.bf16.msra.mxu1 %v2343_v3  ;;  %v2195_v30 = vld [vmem:[%s3066_s0 + $0x30] ss:$12 sps:$4 sm:$0xff]   ;;  %v2196_v31 = vld [vmem:[%s3066_s0 + $0x4c] ss:$12 sps:$4 sm:$0xff]   ;;  %v2199_v33 = vld [vmem:[%s3066_s0 + $0x48] ss:$12 sps:$4 sm:$0xff]  }
   0xc   :  { %1766 = vmatpush3.bf16.msra.mxu0 %v2377_v9  ;;  %1830 = vmatprep.subr.bf16.mxu1 %v2349_v4  ;;  %v2202_v34 = vld [vmem:[%s3067_s1 + $0x4] ss:$12 sps:$4 sm:$0xff]   ;;  %v2200_v36 = vld [vmem:[%s3067_s1] ss:$12 sps:$4 sm:$0xff]   ;;  %v2206_v38 = vld [vmem:[%s3067_s1 + $0x1c] ss:$12 sps:$4 sm:$0xff]  }
   0xd   :  { %1767 = vmatprep.subr.bf16.mxu0 %v2384_v10  ;;  %v2203_v35 = vld [vmem:[%s3066_s0 + $0x64] ss:$12 sps:$4 sm:$0xff]   ;;  %v2205_v37 = vld [vmem:[%s3066_s0 + $0x60] ss:$12 sps:$4 sm:$0xff]   ;;  %v2208_v39 = vld [vmem:[%s3066_s0 + $0x7c] ss:$12 sps:$4 sm:$0xff]  }
   0xe   :  { %v2210_v40 = vld [vmem:[%s3067_s1 + $0x18] ss:$12 sps:$4 sm:$0xff]   ;;  %v84_v41 = vld [vmem:[%s3066_s0 + $0x90] sm:$0xff]  ;;  %v2223_v51 = vld [vmem:[%s3067_s1 + $0x60] ss:$12 sps:$4 sm:$0xff]  }
   0xf   :  { %1831 = vmatpush3.bf16.msra.mxu1 %v2362_v6  ;;  %v2211_v42 = vld [vmem:[%s3066_s0 + $0x78] ss:$12 sps:$4 sm:$0xff]   ;;  %v2212_v43 = vld [vmem:[%s3067_s1 + $0x34] ss:$12 sps:$4 sm:$0xff]   ;;  %v1623_v44 = vcombine.high %v84_v41, %v84_v41  ;;  %v2215_v45 = vld [vmem:[%s3067_s1 + $0x30] ss:$12 sps:$4 sm:$0xff]   ;;  %v1622_v46 = vcombine.low %v84_v41, %v84_v41 }
  0x10   :  { %1768 = vmatpush3.bf16.msra.mxu0 %v2394_v11  ;;  %1832 = vmatprep.subr.bf16.mxu1 %v2371_v8  ;;  %v2217_v47 = vld [vmem:[%s3067_s1 + $0x4c] ss:$12 sps:$4 sm:$0xff]   ;;  %v2219_v48 = vld [vmem:[%s3067_s1 + $0x48] ss:$12 sps:$4 sm:$0xff]   ;;  %v2221_v50 = vld [vmem:[%s3067_s1 + $0x64] ss:$12 sps:$4 sm:$0xff]  }
  0x11   :  { %1769 = vmatprep.subr.bf16.mxu0 %v2401_v12  ;;  %v2220_v49 = vld [vmem:[%s3067_s1 + $0x8] ss:$12 sps:$4 sm:$0xff]   ;;  %v2224_v52 = vld [vmem:[%s3067_s1 + $0x20] ss:$12 sps:$4 sm:$0xff]   ;;  %v2227_v55 = vld [vmem:[%s3067_s1 + $0x78] ss:$12 sps:$4 sm:$0xff]  }
  0x12   :  { %2038 = vmatmul.mubr.msk.bf16.gmra.mrb[4].mxu1 %vm294_vm1, %v2174_v13  ;;  %v2225_v53 = vld [vmem:[%s3067_s1 + $0x7c] ss:$12 sps:$4 sm:$0xff]   ;;  %v516_v54 = vld [vmem:[%s3067_s1 + $0x90] sm:$0xff]  ;;  %v2228_v56 = vld [vmem:[%s3067_s1 + $0x38] ss:$12 sps:$4 sm:$0xff]  }
  0x13   :  { %2041 = vmatprep.mubr.msk.bf16.mxu1 %vm2290_vm0, %v2289_v0  ;;  %1833 = vmatpush3.bf16.msra.mxu1 %v2377_v9  ;;  %v1669_v57 = vcombine.high %v516_v54, %v516_v54  ;;  %v1668_v58 = vcombine.low %v516_v54, %v516_v54  ;;  %v2231_v59 = vld [vmem:[%s3067_s1 + $0x50] ss:$12 sps:$4 sm:$0xff]   ;;  %v2232_v61 = vld [vmem:[%s3068_s2] ss:$12 sps:$4 sm:$0xff]   ;;  %v2235_v62 = vld [vmem:[%s3067_s1 + $0x68] ss:$12 sps:$4 sm:$0xff]  }
  0x14   :  { %1770 = vmatpush3.bf16.msra.mxu0 %v2411_v14  ;;  %1834 = vmatprep.subr.bf16.mxu1 %v2384_v10  ;;  %v2234_v60 = vld [vmem:[%s3068_s2 + $0x4] ss:$12 sps:$4 sm:$0xff]   ;;  %v2236_v63 = vld [vmem:[%s3068_s2 + $0x1c] ss:$12 sps:$4 sm:$0xff]   ;;  %v2239_v7 = vld [vmem:[%s3067_s1 + $0x80] ss:$12 sps:$4 sm:$0xff]  }
  0x15   :  { %1771 = vmatprep.subr.bf16.mxu0 %v2418_v15  ;;  %v2240_v13 = vld [vmem:[%s3068_s2 + $0x34] ss:$12 sps:$4 sm:$0xff]  }
  0x17   :  { %1835 = vmatpush3.bf16.msra.mxu1 %v2394_v11 }
  0x18   :  { %1772 = vmatpush3.bf16.msra.mxu0 %v2424_v16  ;;  %1836 = vmatprep.subr.bf16.mxu1 %v2401_v12 }
  0x19   :  { %1773 = vmatprep.subr.bf16.mxu0 %v2438_v18 }
  0x1a   :  { %2042 = vmatmul.mubr.msk.bf16.gmra.mrb[8].mxu1 %vm294_vm1, %v2179_v17  ;;  %v2255_v17 = vld [vmem:[%s3068_s2 + $0x38] ss:$12 sps:$4 sm:$0xff]  }
  0x1b   :  { %2045 = vmatprep.mubr.msk.bf16.mxu1 %vm2290_vm0, %v2289_v0  ;;  %1837 = vmatpush3.bf16.msra.mxu1 %v2411_v14 }
  0x1c   :  { %1774 = vmatpush3.bf16.msra.mxu0 %v2448_v20  ;;  %1838 = vmatprep.subr.bf16.mxu1 %v2418_v15 }
  0x1d   :  { %1775 = vmatprep.subr.bf16.mxu0 %v2454_v21 }
  0x1f   :  { %1839 = vmatpush3.bf16.msra.mxu1 %v2424_v16 }
  0x20   :  { %1776 = vmatpush3.bf16.msra.mxu0 %v2465_v22  ;;  %1840 = vmatprep.subr.bf16.mxu1 %v2438_v18 }
  0x21   :  { %2061 = vmatprep.subr.bf16.mxu0 %v2289_v0 }
  0x22   :  { %2046 = vmatmul.mubr.msk.bf16.gmra.mrb[12].mxu1 %vm294_vm1, %v2187_v23  ;;  %v2262_v23 = vld [vmem:[%s3068_s2 + $0x68] ss:$12 sps:$4 sm:$0xff]  }
  0x23   :  { %349 = vmatmul.mubr.bf16.vlgmr.msra.gmra.mrb[0].mxu0 %v2184_v24  ;;  %2049 = vmatprep.mubr.msk.bf16.mxu1 %vm2290_vm0, %v2289_v0  ;;  %v2263_v24 = vld [vmem:[%s3069_s3 + $0x1c] ss:$12 sps:$4 sm:$0xff]  }
  0x24   :  { %2062 = vmatpush3.bf16.msra.mxu0 %v2337_v2  ;;  %356 = vmatprep.mubr.bf16.mxu0 %v2188_v25  ;;  %v2265_v25 = vld [vmem:[%s3069_s3 + $0x18] ss:$12 sps:$4 sm:$0xff]  }
  0x25   :  { %1841 = vmatpush3.bf16.msra.mxu1 %v2448_v20  ;;  %2063 = vmatprep.subr.bf16.mxu0 %v2289_v0 }
  0x26   :  { %1842 = vmatprep.subr.bf16.mxu1 %v2454_v21 }
  0x28   :  { %2064 = vmatpush3.bf16.msra.mxu0 %v2356_v5 }
  0x29   :  { %1843 = vmatpush3.bf16.msra.mxu1 %v2465_v22  ;;  %2093 = vmatprep.subr.bf16.mxu0 %v2289_v0 }
  0x2a   :  { %2050 = vmatmul.mubr.msk.bf16.gmra.mrb[16].mxu1 %vm294_vm1, %v2190_v26  ;;  %1895 = vmatprep.subr.bf16.mxu1 %v2330_v1  ;;  %v2266_v26 = vld [vmem:[%s3068_s2 + $0x80] ss:$12 sps:$4 sm:$0xff]  }
  0x2b   :  { %357 = vmatmul.mubr.bf16.gmra.mrb[4].mxu0 %v2191_v27  ;;  %2053 = vmatprep.mubr.msk.bf16.mxu1 %vm2290_vm0, %v2289_v0  ;;  %v2267_v27 = vld [vmem:[%s3069_s3 + $0x34] ss:$12 sps:$4 sm:$0xff]  }
  0x2c   :  { %364 = vmatprep.mubr.bf16.mxu0 %v2192_v28  ;;  %v2270_v28 = vld [vmem:[%s3068_s2 + $0x98] ss:$0 sps:$4 sm:$0xff]  }
  0x32   :  { %2054 = vmatmul.mubr.msk.bf16.gmra.mrb[20].mxu1 %vm294_vm1, %v2194_v29  ;;  %v2271_v29 = vld [vmem:[%s3069_s3 + $0x4c] ss:$12 sps:$4 sm:$0xff]  }
  0x33   :  { %365 = vmatmul.mubr.bf16.gmra.mrb[8].mxu0 %v2195_v30  ;;  %2057 = vmatprep.mubr.msk.bf16.mxu1 %vm2290_vm0, %v2289_v0  ;;  %v2274_v30 = vld [vmem:[%s3069_s3 + $0x8] ss:$12 sps:$4 sm:$0xff]  }
  0x34   :  { %372 = vmatprep.mubr.bf16.mxu0 %v2196_v31  ;;  %v2275_v31 = vld [vmem:[%s3069_s3 + $0x64] ss:$12 sps:$4 sm:$0xff]  }
  0x3a   :  { %2058 = vmatmul.mubr.msk.bf16.gmra.mrb[24].mxu1 %vm294_vm1, %v2198_v32  ;;  %v2277_v32 = vld [vmem:[%s3069_s3 + $0x60] ss:$12 sps:$4 sm:$0xff]  }
  0x3b   :  { %373 = vmatmul.mubr.bf16.gmra.mrb[12].mxu0 %v2199_v33  ;;  %671 = vmatprep.mubr.bf16.mxu1 %v2202_v34  ;;  %v2278_v33 = vld [vmem:[%s3069_s3 + $0x20] ss:$12 sps:$4 sm:$0xff]   ;;  %v2279_v34 = vld [vmem:[%s3069_s3 + $0x7c] ss:$12 sps:$4 sm:$0xff]  }
  0x3c   :  { %380 = vmatprep.mubr.bf16.mxu0 %v2203_v35  ;;  %v1188_v35 = vld [vmem:[%s3069_s3 + $0x90] sm:$0xff] }
  0x42   :  { %672 = vmatmul.mubr.bf16.vlgmr.msra.gmra.mrb[28].mxu1 %v2200_v36  ;;  %v2281_v36 = vld [vmem:[%s3069_s3 + $0x78] ss:$12 sps:$4 sm:$0xff]  }
  0x43   :  { %381 = vmatmul.mubr.bf16.gmra.mrb[16].mxu0 %v2205_v37  ;;  %679 = vmatprep.mubr.bf16.mxu1 %v2206_v38  ;;  %v2282_v37 = vld [vmem:[%s3069_s3 + $0x38] ss:$12 sps:$4 sm:$0xff]   ;;  %v1725_v38 = vcombine.high %v1188_v35, %v1188_v35 }
  0x44   :  { %388 = vmatprep.mubr.bf16.mxu0 %v2208_v39  ;;  %1896 = vmatpush3.bf16.msra.mxu1 %v2343_v3 }
  0x45   :  { %1897 = vmatprep.subr.bf16.mxu1 %v2349_v4 }
  0x48   :  { %1898 = vmatpush3.bf16.msra.mxu1 %v2362_v6 }
  0x49   :  { %1899 = vmatprep.subr.bf16.mxu1 %v2371_v8 }
  0x4a   :  { %680 = vmatmul.mubr.bf16.gmra.mrb[32].mxu1 %v2210_v40  ;;  %v1724_v40 = vcombine.low %v1188_v35, %v1188_v35 }
  0x4b   :  { %389 = vmatmul.mubr.bf16.gmra.mrb[20].mxu0 %v2211_v42  ;;  %687 = vmatprep.mubr.bf16.mxu1 %v2212_v43  ;;  %v2285_v42 = vld [vmem:[%s3069_s3 + $0x50] ss:$12 sps:$4 sm:$0xff]  }
  0x4c   :  { %396 = vmatprep.mubr.bf16.mxu0 %v1623_v44  ;;  %1900 = vmatpush3.bf16.msra.mxu1 %v2377_v9 }
  0x4d   :  { %1901 = vmatprep.subr.bf16.mxu1 %v2384_v10 }
  0x50   :  { %1902 = vmatpush3.bf16.msra.mxu1 %v2394_v11 }
  0x51   :  { %1903 = vmatprep.subr.bf16.mxu1 %v2401_v12 }
  0x52   :  { %688 = vmatmul.mubr.bf16.gmra.mrb[36].mxu1 %v2215_v45 }
  0x53   :  { %397 = vmatmul.mubr.bf16.gmra.mrb[24].mxu0 %v1622_v46  ;;  %695 = vmatprep.mubr.bf16.mxu1 %v2217_v47  ;;  %v2286_v46 = vld [vmem:[%s3069_s3 + $0x98] ss:$0 sps:$4 sm:$0xff]  }
  0x54   :  { %2065 = vmatprep.mubr.msk.bf16.mxu0 %vm2290_vm0, %v2289_v0  ;;  %1904 = vmatpush3.bf16.msra.mxu1 %v2411_v14 }
  0x55   :  { %1905 = vmatprep.subr.bf16.mxu1 %v2418_v15 }
  0x58   :  { %1906 = vmatpush3.bf16.msra.mxu1 %v2424_v16 }
  0x59   :  { %1907 = vmatprep.subr.bf16.mxu1 %v2438_v18 }
  0x5a   :  { %696 = vmatmul.mubr.bf16.gmra.mrb[40].mxu1 %v2219_v48  ;;  %v2287_v48 = vld [vmem:[%s3069_s3 + $0x68] ss:$12 sps:$4 sm:$0xff]  }
  0x5b   :  { %2066 = vmatmul.mubr.msk.bf16.vlgmr.msra.gmra.mrb[28].mxu0 %vm294_vm1, %v2220_v49  ;;  %703 = vmatprep.mubr.bf16.mxu1 %v2221_v50 }
  0x5c   :  { %2094 = vmatpush3.bf16.msra.mxu0 %v2337_v2  ;;  %2069 = vmatprep.mubr.msk.bf16.mxu0 %vm2290_vm0, %v2289_v0 }
  0x5d   :  { %1908 = vmatpush3.bf16.msra.mxu1 %v2448_v20  ;;  %2095 = vmatprep.subr.bf16.mxu0 %v2289_v0 }
  0x5e   :  { %1909 = vmatprep.subr.bf16.mxu1 %v2454_v21 }
  0x60   :  { %2096 = vmatpush3.bf16.msra.mxu0 %v2356_v5 }
  0x61   :  { %1910 = vmatpush3.bf16.msra.mxu1 %v2465_v22  ;;  %2125 = vmatprep.subr.bf16.mxu0 %v2289_v0 }
  0x62   :  { %704 = vmatmul.mubr.bf16.gmra.mrb[44].mxu1 %v2223_v51  ;;  %1962 = vmatprep.subr.bf16.mxu1 %v2330_v1  ;;  %v2238_v1 = vld [vmem:[%s3068_s2 + $0x18] ss:$12 sps:$4 sm:$0xff]  }
  0x63   :  { %2070 = vmatmul.mubr.msk.bf16.gmra.mrb[32].mxu0 %vm294_vm1, %v2224_v52  ;;  %711 = vmatprep.mubr.bf16.mxu1 %v2225_v53  ;;  %v2288_v53 = vld [vmem:[%s3069_s3 + $0x80] ss:$12 sps:$4 sm:$0xff]  }
  0x64   :  { %2073 = vmatprep.mubr.msk.bf16.mxu0 %vm2290_vm0, %v2289_v0 }
  0x6a   :  { %712 = vmatmul.mubr.bf16.gmra.mrb[48].mxu1 %v2227_v55 }
  0x6b   :  { %2074 = vmatmul.mubr.msk.bf16.gmra.mrb[36].mxu0 %vm294_vm1, %v2228_v56  ;;  %719 = vmatprep.mubr.bf16.mxu1 %v1669_v57 }
  0x6c   :  { %2077 = vmatprep.mubr.msk.bf16.mxu0 %vm2290_vm0, %v2289_v0 }
  0x72   :  { %720 = vmatmul.mubr.bf16.gmra.mrb[52].mxu1 %v1668_v58 }
  0x73   :  { %2078 = vmatmul.mubr.msk.bf16.gmra.mrb[40].mxu0 %vm294_vm1, %v2231_v59  ;;  %1007 = vmatprep.mubr.bf16.mxu1 %v2234_v60 }
  0x74   :  { %2081 = vmatprep.mubr.msk.bf16.mxu0 %vm2290_vm0, %v2289_v0 }
  0x7a   :  { %1008 = vmatmul.mubr.bf16.vlgmr.msra.gmra.mrb[56].mxu1 %v2232_v61 }
  0x7b   :  { %2082 = vmatmul.mubr.msk.bf16.gmra.mrb[44].mxu0 %vm294_vm1, %v2235_v62  ;;  %1015 = vmatprep.mubr.bf16.mxu1 %v2236_v63 }
  0x7c   :  { %2085 = vmatprep.mubr.msk.bf16.mxu0 %vm2290_vm0, %v2289_v0  ;;  %1963 = vmatpush3.bf16.msra.mxu1 %v2343_v3  ;;  %v2242_v3 = vld [vmem:[%s3068_s2 + $0x30] ss:$12 sps:$4 sm:$0xff]  }
  0x7d   :  { %1964 = vmatprep.subr.bf16.mxu1 %v2349_v4  ;;  %v2243_v4 = vld [vmem:[%s3067_s1 + $0x98] ss:$0 sps:$4 sm:$0xff]  }
  0x80   :  { %1965 = vmatpush3.bf16.msra.mxu1 %v2362_v6  ;;  %v2244_v6 = vld [vmem:[%s3068_s2 + $0x4c] ss:$12 sps:$4 sm:$0xff]  }
  0x81   :  { %1966 = vmatprep.subr.bf16.mxu1 %v2371_v8  ;;  %v2246_v8 = vld [vmem:[%s3068_s2 + $0x48] ss:$12 sps:$4 sm:$0xff]  }
  0x82   :  { %1016 = vmatmul.mubr.bf16.gmra.mrb[60].mxu1 %v2238_v1 }
  0x83   :  { %2086 = vmatmul.mubr.msk.bf16.gmra.mrb[48].mxu0 %vm294_vm1, %v2239_v7  ;;  %1023 = vmatprep.mubr.bf16.mxu1 %v2240_v13 }
  0x84   :  { %2089 = vmatprep.mubr.msk.bf16.mxu0 %vm2290_vm0, %v2289_v0  ;;  %1967 = vmatpush3.bf16.msra.mxu1 %v2377_v9  ;;  %v2247_v9 = vld [vmem:[%s3068_s2 + $0x8] ss:$12 sps:$4 sm:$0xff]  }
  0x85   :  { %1968 = vmatprep.subr.bf16.mxu1 %v2384_v10  ;;  %v2248_v10 = vld [vmem:[%s3068_s2 + $0x64] ss:$12 sps:$4 sm:$0xff]  }
  0x88   :  { %1969 = vmatpush3.bf16.msra.mxu1 %v2394_v11  ;;  %v2250_v11 = vld [vmem:[%s3068_s2 + $0x60] ss:$12 sps:$4 sm:$0xff]  }
  0x89   :  { %1970 = vmatprep.subr.bf16.mxu1 %v2401_v12  ;;  %v2251_v12 = vld [vmem:[%s3068_s2 + $0x20] ss:$12 sps:$4 sm:$0xff]  }
  0x8a   :  { %1024 = vmatmul.mubr.bf16.gmra.mrb[64].mxu1 %v2242_v3 }
  0x8b   :  { %2090 = vmatmul.mubr.msk.bf16.gmra.mrb[52].mxu0 %vm294_vm1, %v2243_v4  ;;  %1031 = vmatprep.mubr.bf16.mxu1 %v2244_v6 }
  0x8c   :  { %2097 = vmatprep.mubr.msk.bf16.mxu0 %vm2290_vm0, %v2289_v0  ;;  %1971 = vmatpush3.bf16.msra.mxu1 %v2411_v14  ;;  %v2252_v14 = vld [vmem:[%s3068_s2 + $0x7c] ss:$12 sps:$4 sm:$0xff]  }
  0x8d   :  { %1972 = vmatprep.subr.bf16.mxu1 %v2418_v15  ;;  %v852_v15 = vld [vmem:[%s3068_s2 + $0x90] sm:$0xff] }
  0x8e   :  { %v1696_v19 = vcombine.low %v852_v15, %v852_v15 }
  0x90   :  { %1973 = vmatpush3.bf16.msra.mxu1 %v2424_v16  ;;  %v2254_v16 = vld [vmem:[%s3068_s2 + $0x78] ss:$12 sps:$4 sm:$0xff]  }
  0x91   :  { %1974 = vmatprep.subr.bf16.mxu1 %v2438_v18  ;;  %v1697_v18 = vcombine.high %v852_v15, %v852_v15 }
  0x92   :  { %1032 = vmatmul.mubr.bf16.gmra.mrb[68].mxu1 %v2246_v8 }
  0x93   :  { %2098 = vmatmul.mubr.msk.bf16.vlgmr.msra.gmra.mrb[56].mxu0 %vm294_vm1, %v2247_v9  ;;  %1039 = vmatprep.mubr.bf16.mxu1 %v2248_v10 }
  0x94   :  { %2126 = vmatpush3.bf16.msra.mxu0 %v2337_v2  ;;  %2101 = vmatprep.mubr.msk.bf16.mxu0 %vm2290_vm0, %v2289_v0 }
  0x95   :  { %1975 = vmatpush3.bf16.msra.mxu1 %v2448_v20  ;;  %2127 = vmatprep.subr.bf16.mxu0 %v2289_v0  ;;  %v2258_v20 = vld [vmem:[%s3068_s2 + $0x50] ss:$12 sps:$4 sm:$0xff]  }
  0x96   :  { %1976 = vmatprep.subr.bf16.mxu1 %v2454_v21  ;;  %v2261_v21 = vld [vmem:[%s3069_s3 + $0x4] ss:$12 sps:$4 sm:$0xff]  }
  0x98   :  { %2128 = vmatpush3.bf16.msra.mxu0 %v2356_v5 }
  0x99   :  { %1977 = vmatpush3.bf16.msra.mxu1 %v2465_v22  ;;  %v2259_v22 = vld [vmem:[%s3069_s3] ss:$12 sps:$4 sm:$0xff]  }
  0x9a   :  { %1040 = vmatmul.mubr.bf16.gmra.mrb[72].mxu1 %v2250_v11  ;;  %2157 = vmatprep.subr.bf16.mxu1 %v2289_v0 }
  0x9b   :  { %2102 = vmatmul.mubr.msk.bf16.gmra.mrb[60].mxu0 %vm294_vm1, %v2251_v12  ;;  %1047 = vmatprep.mubr.bf16.mxu1 %v2252_v14 }
  0x9c   :  { %2105 = vmatprep.mubr.msk.bf16.mxu0 %vm2290_vm0, %v2289_v0 }
  0xa2   :  { %1048 = vmatmul.mubr.bf16.gmra.mrb[76].mxu1 %v2254_v16 }
  0xa3   :  { %2106 = vmatmul.mubr.msk.bf16.gmra.mrb[64].mxu0 %vm294_vm1, %v2255_v17  ;;  %1055 = vmatprep.mubr.bf16.mxu1 %v1697_v18 }
  0xa4   :  { %2109 = vmatprep.mubr.msk.bf16.mxu0 %vm2290_vm0, %v2289_v0 }
  0xaa   :  { %1056 = vmatmul.mubr.bf16.gmra.mrb[80].mxu1 %v1696_v19 }
  0xab   :  { %2110 = vmatmul.mubr.msk.bf16.gmra.mrb[68].mxu0 %vm294_vm1, %v2258_v20  ;;  %1343 = vmatprep.mubr.bf16.mxu1 %v2261_v21 }
  0xac   :  { %2113 = vmatprep.mubr.msk.bf16.mxu0 %vm2290_vm0, %v2289_v0 }
  0xb2   :  { %1344 = vmatmul.mubr.bf16.vlgmr.msra.gmra.mrb[84].mxu1 %v2259_v22 }
  0xb3   :  { %2114 = vmatmul.mubr.msk.bf16.gmra.mrb[72].mxu0 %vm294_vm1, %v2262_v23  ;;  %1351 = vmatprep.mubr.bf16.mxu1 %v2263_v24 }
  0xb4   :  { %2117 = vmatprep.mubr.msk.bf16.mxu0 %vm2290_vm0, %v2289_v0  ;;  %2159 = vmatpush3.bf16.msra.mxu1 %v2337_v2  ;;  %v2269_v2 = vld [vmem:[%s3069_s3 + $0x30] ss:$12 sps:$4 sm:$0xff]  }
  0xb5   :  { %2158 = vmatprep.subr.bf16.mxu1 %v2289_v0 }
  0xb8   :  { %2160 = vmatpush3.bf16.msra.mxu1 %v2356_v5  ;;  %v2273_v5 = vld [vmem:[%s3069_s3 + $0x48] ss:$12 sps:$4 sm:$0xff]  }
  0xba   :  { %1352 = vmatmul.mubr.bf16.gmra.mrb[88].mxu1 %v2265_v25 }
  0xbb   :  { %2118 = vmatmul.mubr.msk.bf16.gmra.mrb[76].mxu0 %vm294_vm1, %v2266_v26  ;;  %1359 = vmatprep.mubr.bf16.mxu1 %v2267_v27 }
  0xbc   :  { %2121 = vmatprep.mubr.msk.bf16.mxu0 %vm2290_vm0, %v2289_v0 }
  0xc2   :  { %1360 = vmatmul.mubr.bf16.gmra.mrb[92].mxu1 %v2269_v2 }
  0xc3   :  { %2122 = vmatmul.mubr.msk.bf16.gmra.mrb[80].mxu0 %vm294_vm1, %v2270_v28  ;;  %1367 = vmatprep.mubr.bf16.mxu1 %v2271_v29 }
  0xc4   :  { %2129 = vmatprep.mubr.msk.bf16.mxu0 %vm2290_vm0, %v2289_v0 }
  0xca   :  { %1368 = vmatmul.mubr.bf16.gmra.mrb[96].mxu1 %v2273_v5 }
  0xcb   :  { %2130 = vmatmul.mubr.msk.bf16.vlgmr.msra.gmra.mrb[84].mxu0 %vm294_vm1, %v2274_v30  ;;  %1375 = vmatprep.mubr.bf16.mxu1 %v2275_v31 }
  0xcc   :  { %2133 = vmatprep.mubr.msk.bf16.mxu0 %vm2290_vm0, %v2289_v0 }
  0xd2   :  { %1376 = vmatmul.mubr.bf16.gmra.mrb[100].mxu1 %v2277_v32 }
  0xd3   :  { %2134 = vmatmul.mubr.msk.bf16.gmra.mrb[88].mxu0 %vm294_vm1, %v2278_v33  ;;  %1383 = vmatprep.mubr.bf16.mxu1 %v2279_v34 }
  0xd4   :  { %2137 = vmatprep.mubr.msk.bf16.mxu0 %vm2290_vm0, %v2289_v0 }
  0xda   :  { %1384 = vmatmul.mubr.bf16.gmra.mrb[104].mxu1 %v2281_v36 }
  0xdb   :  { %2138 = vmatmul.mubr.msk.bf16.gmra.mrb[92].mxu0 %vm294_vm1, %v2282_v37  ;;  %1391 = vmatprep.mubr.bf16.mxu1 %v1725_v38 }
  0xdc   :  { %2141 = vmatprep.mubr.msk.bf16.mxu0 %vm2290_vm0, %v2289_v0 }
  0xdd   :  { %v438_v39 = vpop.f32.mrb[0].mxu1 }
  0xde   :  { %v2035_v41 = vpop.f32.mrb[1].mxu1 }
  0xdf   :  { %v441_v43 = vpop.f32.mrb[2].mxu1 }
  0xe0   :  { %v2036_v44 = vpop.f32.mrb[3].mxu1 }
  0xe2   :  { %1392 = vmatmul.mubr.bf16.gmra.mrb[108].mxu1 %v1724_v40 }
  0xe3   :  { %2142 = vmatmul.mubr.msk.bf16.gmra.mrb[96].mxu0 %vm294_vm1, %v2285_v42  ;;  %2153 = vmatprep.mubr.msk.bf16.mxu1 %vm2290_vm0, %v2289_v0 }
  0xe4   :  { %2145 = vmatprep.mubr.msk.bf16.mxu0 %vm2290_vm0, %v2289_v0 }
  0xe5   :  { %v446_v45 = vpop.f32.mrb[4].mxu1 }
  0xe6   :  { %v2039_v47 = vpop.f32.mrb[5].mxu1 }
  0xe7   :  { %v449_v49 = vpop.f32.mrb[6].mxu1 }
  0xe8   :  { %v2040_v50 = vpop.f32.mrb[7].mxu1 }
  0xea   :  { %2154 = vmatmul.mubr.msk.bf16.vlgmr.msra.gmra.mrb[112].mxu1 %vm294_vm1, %v2286_v46 }
  0xeb   :  { %2146 = vmatmul.mubr.msk.bf16.gmra.mrb[100].mxu0 %vm294_vm1, %v2287_v48 }
  0xec   :  { %2149 = vmatprep.mubr.msk.bf16.mxu0 %vm2290_vm0, %v2289_v0 }
  0xed   :  { %v454_v51 = vpop.f32.mrb[8].mxu1 }
  0xee   :  { %v2043_v52 = vpop.f32.mrb[9].mxu1 }
  0xef   :  { %v457_v54 = vpop.f32.mrb[10].mxu1 }
  0xf0   :  { %v2044_v55 = vpop.f32.mrb[11].mxu1 }
  0xf3   :  { %2150 = vmatmul.mubr.msk.bf16.gmra.mrb[104].mxu0 %vm294_vm1, %v2288_v53 }
  0xf5   :  { %v462_v56 = vpop.f32.mrb[12].mxu1 }
  0xf6   :  { %v1777_v57 = vpop.f32.mrb[0].mxu0  ;;  %v2047_v58 = vpop.f32.mrb[13].mxu1 }
  0xf7   :  { %v1778_v59 = vpop.f32.mrb[1].mxu0  ;;  %v465_v60 = vpop.f32.mrb[14].mxu1 }
  0xf8   :  { %v1779_v61 = vadd.f32 %v1778_v59, %v1777_v57  ;;  %v1780_v62 = vpop.f32.mrb[2].mxu0  ;;  %v2048_v63 = vpop.f32.mrb[15].mxu1 }
  0xf9   :  { %v1781_v1 = vpop.f32.mrb[3].mxu0 }
  0xfa   :  { %v2824_v0 = vadd.f32 %v1779_v61, %v438_v39  ;;  %v1782_v7 = vadd.f32 %v1781_v1, %v1780_v62 }
  0xfc   :  { %v2826_v13 = vadd.f32 %v1782_v7, %v441_v43 }
  0xfd   :  { %v470_v3 = vpop.f32.mrb[16].mxu1 }
  0xfe   :  { %v1783_v4 = vpop.f32.mrb[4].mxu0  ;;  %v2051_v6 = vpop.f32.mrb[17].mxu1 }
  0xff   :  { %v1784_v8 = vpop.f32.mrb[5].mxu0  ;;  %v473_v9 = vpop.f32.mrb[18].mxu1 }
 0x100   :  { %v1785_v10 = vadd.f32 %v1784_v8, %v1783_v4  ;;  %v1786_v11 = vpop.f32.mrb[6].mxu0  ;;  %v2052_v12 = vpop.f32.mrb[19].mxu1 }
 0x101   :  { %v1787_v14 = vpop.f32.mrb[7].mxu0 }
 0x102   :  { %v2828_v15 = vadd.f32 %v1785_v10, %v446_v45  ;;  %v1788_v16 = vadd.f32 %v1787_v14, %v1786_v11 }
 0x104   :  { %v2830_v17 = vadd.f32 %v1788_v16, %v449_v49 }
 0x105   :  { %v478_v18 = vpop.f32.mrb[20].mxu1 }
 0x106   :  { %v1789_v19 = vpop.f32.mrb[8].mxu0  ;;  %v2055_v20 = vpop.f32.mrb[21].mxu1 }
 0x107   :  { %v1790_v21 = vpop.f32.mrb[9].mxu0  ;;  %v481_v22 = vpop.f32.mrb[22].mxu1 }
 0x108   :  { %v1791_v23 = vadd.f32 %v1790_v21, %v1789_v19  ;;  %v1792_v24 = vpop.f32.mrb[10].mxu0  ;;  %v2056_v25 = vpop.f32.mrb[23].mxu1 }
 0x109   :  { %v1793_v26 = vpop.f32.mrb[11].mxu0 }
 0x10a   :  { %v2832_v27 = vadd.f32 %v1791_v23, %v454_v51  ;;  %v1794_v2 = vadd.f32 %v1793_v26, %v1792_v24 }
 0x10c   :  { %v2834_v28 = vadd.f32 %v1794_v2, %v457_v54 }
 0x10d   :  { %v486_v29 = vpop.f32.mrb[24].mxu1 }
 0x10e   :  { %v1795_v5 = vpop.f32.mrb[12].mxu0  ;;  %v2059_v30 = vpop.f32.mrb[25].mxu1 }
 0x10f   :  { %v1796_v31 = vpop.f32.mrb[13].mxu0  ;;  %v489_v32 = vpop.f32.mrb[26].mxu1 }
 0x110   :  { %v1797_v33 = vadd.f32 %v1796_v31, %v1795_v5  ;;  %v1798_v34 = vpop.f32.mrb[14].mxu0  ;;  %v2060_v35 = vpop.f32.mrb[27].mxu1 }
 0x111   :  { %v1799_v36 = vpop.f32.mrb[15].mxu0 }
 0x112   :  { %v2836_v37 = vadd.f32 %v1797_v33, %v462_v56  ;;  %v1800_v38 = vadd.f32 %v1799_v36, %v1798_v34 }
 0x114   :  { %v2838_v39 = vadd.f32 %v1800_v38, %v465_v60 }
 0x115   :  { %v1844_v40 = vpop.f32.mrb[28].mxu1 }
 0x116   :  { %v1801_v41 = vpop.f32.mrb[16].mxu0  ;;  %v1845_v42 = vpop.f32.mrb[29].mxu1 }
 0x117   :  { %v1802_v43 = vpop.f32.mrb[17].mxu0  ;;  %v1846_v44 = vadd.f32 %v1845_v42, %v1844_v40  ;;  %v1847_v45 = vpop.f32.mrb[30].mxu1 }
 0x118   :  { %v1803_v46 = vadd.f32 %v1802_v43, %v1801_v41  ;;  %v1804_v47 = vpop.f32.mrb[18].mxu0  ;;  %v1848_v48 = vpop.f32.mrb[31].mxu1 }
 0x119   :  { %v1805_v49 = vpop.f32.mrb[19].mxu0  ;;  %v1849_v50 = vadd.f32 %v1848_v48, %v1847_v45 }
 0x11a   :  { %v2840_v51 = vadd.f32 %v1803_v46, %v470_v3  ;;  %v1806_v52 = vadd.f32 %v1805_v49, %v1804_v47 }
 0x11c   :  { %v2842_v53 = vadd.f32 %v1806_v52, %v473_v9 }
 0x11d   :  { %v1850_v54 = vpop.f32.mrb[32].mxu1 }
 0x11e   :  { %v1807_v55 = vpop.f32.mrb[20].mxu0  ;;  %v1851_v56 = vpop.f32.mrb[33].mxu1 }
 0x11f   :  { %v1808_v57 = vpop.f32.mrb[21].mxu0  ;;  %v1852_v58 = vadd.f32 %v1851_v56, %v1850_v54  ;;  %v1853_v59 = vpop.f32.mrb[34].mxu1 }
 0x120   :  { %v1809_v60 = vadd.f32 %v1808_v57, %v1807_v55  ;;  %v1810_v61 = vpop.f32.mrb[22].mxu0  ;;  %v1854_v62 = vpop.f32.mrb[35].mxu1 }
 0x121   :  { %v1811_v63 = vpop.f32.mrb[23].mxu0  ;;  %v1855_v1 = vadd.f32 %v1854_v62, %v1853_v59 }
 0x122   :  { %v2844_v7 = vadd.f32 %v1809_v60, %v478_v18  ;;  %v1812_v4 = vadd.f32 %v1811_v63, %v1810_v61 }
 0x124   :  { %v2846_v6 = vadd.f32 %v1812_v4, %v481_v22 }
 0x125   :  { %v1856_v3 = vpop.f32.mrb[36].mxu1 }
 0x126   :  { %v1813_v8 = vpop.f32.mrb[24].mxu0  ;;  %v1857_v9 = vpop.f32.mrb[37].mxu1 }
 0x127   :  { %v1814_v10 = vpop.f32.mrb[25].mxu0  ;;  %v1858_v11 = vadd.f32 %v1857_v9, %v1856_v3  ;;  %v1859_v12 = vpop.f32.mrb[38].mxu1 }
 0x128   :  { %v1815_v14 = vadd.f32 %v1814_v10, %v1813_v8  ;;  %v1816_v16 = vpop.f32.mrb[26].mxu0  ;;  %v1860_v19 = vpop.f32.mrb[39].mxu1 }
 0x129   :  { %v1817_v20 = vpop.f32.mrb[27].mxu0  ;;  %v1861_v21 = vadd.f32 %v1860_v19, %v1859_v12 }
 0x12a   :  { %v2848_v23 = vadd.f32 %v1815_v14, %v486_v29 }
 0x12d   :  { %v1862_v24 = vpop.f32.mrb[40].mxu1 }
 0x12e   :  { %v761_v25 = vpop.f32.mrb[28].mxu0  ;;  %v1863_v18 = vpop.f32.mrb[41].mxu1 }
 0x12f   :  { %v2850_v26 = vadd.f32 %v1846_v44, %v761_v25  ;;  %v2067_v22 = vpop.f32.mrb[29].mxu0  ;;  %v1864_v2 = vadd.f32 %v1863_v18, %v1862_v24  ;;  %v1865_v5 = vpop.f32.mrb[42].mxu1 }
 0x130   :  { %v764_v30 = vpop.f32.mrb[30].mxu0  ;;  %v1866_v31 = vpop.f32.mrb[43].mxu1 }
 0x131   :  { %v815_v32 = vmax.f32 %v2824_v0, %v2850_v26  ;;  %v2854_v33 = vadd.f32 %v1849_v50, %v764_v30  ;;  %v2068_v34 = vpop.f32.mrb[31].mxu0  ;;  %v1867_v35 = vadd.f32 %v1866_v31, %v1865_v5 }
 0x133   :  { %v816_v29 = vmax.f32 %v2826_v13, %v2854_v33 }
 0x135   :  { %v1868_v36 = vpop.f32.mrb[44].mxu1 }
 0x136   :  { %v769_v38 = vpop.f32.mrb[32].mxu0  ;;  %v1869_v40 = vpop.f32.mrb[45].mxu1 }
 0x137   :  { %v2858_v41 = vadd.f32 %v1852_v58, %v769_v38  ;;  %v2071_v42 = vpop.f32.mrb[33].mxu0  ;;  %v1870_v43 = vadd.f32 %v1869_v40, %v1868_v36  ;;  %v1871_v44 = vpop.f32.mrb[46].mxu1 }
 0x138   :  { %v772_v45 = vpop.f32.mrb[34].mxu0  ;;  %v1872_v46 = vpop.f32.mrb[47].mxu1 }
 0x139   :  { %v817_v47 = vmax.f32 %v2828_v15, %v2858_v41  ;;  %v2862_v48 = vadd.f32 %v1855_v1, %v772_v45  ;;  %v2072_v49 = vpop.f32.mrb[35].mxu0  ;;  %v1873_v50 = vadd.f32 %v1872_v46, %v1871_v44 }
 0x13b   :  { %v818_v52 = vmax.f32 %v2830_v17, %v2862_v48 }
 0x13d   :  { %v1874_v54 = vpop.f32.mrb[48].mxu1 }
 0x13e   :  { %v777_v55 = vpop.f32.mrb[36].mxu0  ;;  %v1875_v56 = vpop.f32.mrb[49].mxu1 }
 0x13f   :  { %v2866_v57 = vadd.f32 %v1858_v11, %v777_v55  ;;  %v2075_v58 = vpop.f32.mrb[37].mxu0  ;;  %v1876_v59 = vadd.f32 %v1875_v56, %v1874_v54  ;;  %v1877_v60 = vpop.f32.mrb[50].mxu1 }
 0x140   :  { %v780_v61 = vpop.f32.mrb[38].mxu0  ;;  %v1878_v62 = vpop.f32.mrb[51].mxu1 }
 0x141   :  { %v819_v63 = vmax.f32 %v2832_v27, %v2866_v57  ;;  %v2870_v1 = vadd.f32 %v1861_v21, %v780_v61  ;;  %v2076_v4 = vpop.f32.mrb[39].mxu0  ;;  %v1879_v3 = vadd.f32 %v1878_v62, %v1877_v60 }
 0x143   :  { %v820_v8 = vmax.f32 %v2834_v28, %v2870_v1 }
 0x145   :  { %v1880_v9 = vpop.f32.mrb[52].mxu1 }
 0x146   :  { %v785_v10 = vpop.f32.mrb[40].mxu0  ;;  %v1881_v12 = vpop.f32.mrb[53].mxu1 }
 0x147   :  { %v2874_v11 = vadd.f32 %v1864_v2, %v785_v10  ;;  %v2079_v14 = vpop.f32.mrb[41].mxu0  ;;  %v1882_v16 = vadd.f32 %v1881_v12, %v1880_v9  ;;  %v1883_v19 = vpop.f32.mrb[54].mxu1 }
 0x148   :  { %v788_v20 = vpop.f32.mrb[42].mxu0  ;;  %v1884_v24 = vpop.f32.mrb[55].mxu1 }
 0x149   :  { %v821_v25 = vmax.f32 %v2836_v37, %v2874_v11  ;;  %v2878_v21 = vadd.f32 %v1867_v35, %v788_v20  ;;  %v2080_v18 = vpop.f32.mrb[43].mxu0 }
 0x14b   :  { %v822_v22 = vmax.f32 %v2838_v39, %v2878_v21 }
 0x14d   :  { %v1911_v5 = vpop.f32.mrb[56].mxu1 }
 0x14e   :  { %v793_v30 = vpop.f32.mrb[44].mxu0  ;;  %v1912_v31 = vpop.f32.mrb[57].mxu1 }
 0x14f   :  { %v2882_v34 = vadd.f32 %v1870_v43, %v793_v30  ;;  %v2083_v2 = vpop.f32.mrb[45].mxu0  ;;  %v1913_v36 = vadd.f32 %v1912_v31, %v1911_v5  ;;  %v1914_v38 = vpop.f32.mrb[58].mxu1 }
 0x150   :  { %v796_v40 = vpop.f32.mrb[46].mxu0  ;;  %v1915_v42 = vpop.f32.mrb[59].mxu1 }
 0x151   :  { %v823_v44 = vmax.f32 %v2840_v51, %v2882_v34  ;;  %v2886_v45 = vadd.f32 %v1873_v50, %v796_v40  ;;  %v2084_v35 = vpop.f32.mrb[47].mxu0  ;;  %v1916_v46 = vadd.f32 %v1915_v42, %v1914_v38 }
 0x153   :  { %v824_v49 = vmax.f32 %v2842_v53, %v2886_v45 }
 0x155   :  { %v1917_v54 = vpop.f32.mrb[60].mxu1 }
 0x156   :  { %v801_v55 = vpop.f32.mrb[48].mxu0  ;;  %v1918_v56 = vpop.f32.mrb[61].mxu1 }
 0x157   :  { %v2890_v43 = vadd.f32 %v1876_v59, %v801_v55  ;;  %v2087_v58 = vpop.f32.mrb[49].mxu0  ;;  %v1919_v60 = vadd.f32 %v1918_v56, %v1917_v54  ;;  %v1920_v61 = vpop.f32.mrb[62].mxu1 }
 0x158   :  { %v804_v62 = vpop.f32.mrb[50].mxu0  ;;  %v1921_v4 = vpop.f32.mrb[63].mxu1 }
 0x159   :  { %v825_v9 = vmax.f32 %v2844_v7, %v2890_v43  ;;  %v2894_v50 = vadd.f32 %v1879_v3, %v804_v62  ;;  %v2088_v10 = vpop.f32.mrb[51].mxu0  ;;  %v1922_v12 = vadd.f32 %v1921_v4, %v1920_v61 }
 0x15b   :  { %v826_v14 = vmax.f32 %v2846_v6, %v2894_v50 }
 0x15d   :  { %v1923_v19 = vpop.f32.mrb[64].mxu1 }
 0x15e   :  { %v809_v20 = vpop.f32.mrb[52].mxu0  ;;  %v1924_v24 = vpop.f32.mrb[65].mxu1 }
 0x15f   :  { %v2898_v59 = vadd.f32 %v1882_v16, %v809_v20  ;;  %v2091_v18 = vpop.f32.mrb[53].mxu0  ;;  %v1925_v5 = vadd.f32 %v1924_v24, %v1923_v19  ;;  %v1926_v30 = vpop.f32.mrb[66].mxu1 }
 0x160   :  { %v812_v31 = vpop.f32.mrb[54].mxu0  ;;  %v1927_v2 = vpop.f32.mrb[67].mxu1 }
 0x161   :  { %v827_v38 = vmax.f32 %v2848_v23, %v2898_v59  ;;  %v2092_v3 = vpop.f32.mrb[55].mxu0  ;;  %v1928_v40 = vadd.f32 %v1927_v2, %v1926_v30 }
 0x165   :  { %v1929_v42 = vpop.f32.mrb[68].mxu1 }
 0x166   :  { %v1097_v35 = vpop.f32.mrb[56].mxu0  ;;  %v1930_v54 = vpop.f32.mrb[69].mxu1 }
 0x167   :  { %v1098_v55 = vadd.f32 %v1913_v36, %v1097_v35  ;;  %v2099_v56 = vpop.f32.mrb[57].mxu0  ;;  %v1931_v58 = vadd.f32 %v1930_v54, %v1929_v42  ;;  %v1932_v61 = vpop.f32.mrb[70].mxu1 }
 0x168   :  { %v1100_v62 = vpop.f32.mrb[58].mxu0  ;;  %v1933_v16 = vpop.f32.mrb[71].mxu1 }
 0x169   :  { %v2905_v4 = vmax.f32 %v815_v32, %v1098_v55  ;;  %v1101_v10 = vadd.f32 %v1916_v46, %v1100_v62  ;;  %v2100_v19 = vpop.f32.mrb[59].mxu0  ;;  %v1934_v20 = vadd.f32 %v1933_v16, %v1932_v61 }
 0x16b   :  { %v2910_v24 = vmax.f32 %v816_v29, %v1101_v10 }
 0x16d   :  { %v1935_v18 = vpop.f32.mrb[72].mxu1 }
 0x16e   :  { %v1105_v36 = vpop.f32.mrb[60].mxu0  ;;  %v1936_v30 = vpop.f32.mrb[73].mxu1 }
 0x16f   :  { %v1106_v31 = vadd.f32 %v1919_v60, %v1105_v36  ;;  %v2103_v2 = vpop.f32.mrb[61].mxu0  ;;  %v1937_v3 = vadd.f32 %v1936_v30, %v1935_v18  ;;  %v1938_v42 = vpop.f32.mrb[74].mxu1 }
 0x170   :  { %v1108_v35 = vpop.f32.mrb[62].mxu0  ;;  %v1939_v54 = vpop.f32.mrb[75].mxu1 }
 0x171   :  { %v2915_v0 = vmax.f32 %v817_v47, %v1106_v31  ;;  %v1109_v26 = vadd.f32 %v1922_v12, %v1108_v35  ;;  %v2104_v32 = vpop.f32.mrb[63].mxu0  ;;  %v1940_v46 = vadd.f32 %v1939_v54, %v1938_v42 }
 0x173   :  { %v2920_v13 = vmax.f32 %v818_v52, %v1109_v26 }
 0x175   :  { %v1941_v33 = vpop.f32.mrb[76].mxu1 }
 0x176   :  { %v1113_v29 = vpop.f32.mrb[64].mxu0  ;;  %v1942_v60 = vpop.f32.mrb[77].mxu1 }
 0x177   :  { %v1114_v55 = vadd.f32 %v1925_v5, %v1113_v29  ;;  %v2107_v56 = vpop.f32.mrb[65].mxu0  ;;  %v1943_v61 = vadd.f32 %v1942_v60, %v1941_v33  ;;  %v1944_v62 = vpop.f32.mrb[78].mxu1 }
 0x178   :  { %v1116_v16 = vpop.f32.mrb[66].mxu0  ;;  %v1945_v10 = vpop.f32.mrb[79].mxu1 }
 0x179   :  { %v2925_v15 = vmax.f32 %v819_v63, %v1114_v55  ;;  %v1117_v41 = vadd.f32 %v1928_v40, %v1116_v16  ;;  %v2108_v47 = vpop.f32.mrb[67].mxu0  ;;  %v1946_v12 = vadd.f32 %v1945_v10, %v1944_v62 }
 0x17b   :  { %v2930_v17 = vmax.f32 %v820_v8, %v1117_v41 }
 0x17d   :  { %v1947_v48 = vpop.f32.mrb[80].mxu1 }
 0x17e   :  { %v1121_v52 = vpop.f32.mrb[68].mxu0  ;;  %v1948_v5 = vpop.f32.mrb[81].mxu1 }
 0x17f   :  { %v1122_v19 = vadd.f32 %v1931_v58, %v1121_v52  ;;  %v2111_v18 = vpop.f32.mrb[69].mxu0  ;;  %v1949_v36 = vadd.f32 %v1948_v5, %v1947_v48  ;;  %v1950_v30 = vpop.f32.mrb[82].mxu1 }
 0x180   :  { %v1124_v31 = vpop.f32.mrb[70].mxu0  ;;  %v1951_v2 = vpop.f32.mrb[83].mxu1 }
 0x181   :  { %v2935_v27 = vmax.f32 %v821_v25, %v1122_v19  ;;  %v1125_v57 = vadd.f32 %v1934_v20, %v1124_v31  ;;  %v2112_v63 = vpop.f32.mrb[71].mxu0 }
 0x183   :  { %v2940_v28 = vmax.f32 %v822_v22, %v1125_v57 }
 0x185   :  { %v1978_v1 = vpop.f32.mrb[84].mxu1 }
 0x186   :  { %v1129_v8 = vpop.f32.mrb[72].mxu0  ;;  %v1979_v40 = vpop.f32.mrb[85].mxu1 }
 0x187   :  { %v1130_v58 = vadd.f32 %v1937_v3, %v1129_v8  ;;  %v2115_v42 = vpop.f32.mrb[73].mxu0  ;;  %v1980_v35 = vadd.f32 %v1979_v40, %v1978_v1  ;;  %v1981_v54 = vpop.f32.mrb[86].mxu1 }
 0x188   :  { %v1132_v26 = vpop.f32.mrb[74].mxu0  ;;  %v1982_v32 = vpop.f32.mrb[87].mxu1 }
 0x189   :  { %v2945_v37 = vmax.f32 %v823_v44, %v1130_v58  ;;  %v1133_v11 = vadd.f32 %v1940_v46, %v1132_v26  ;;  %v2116_v25 = vpop.f32.mrb[75].mxu0  ;;  %v1983_v20 = vadd.f32 %v1982_v32, %v1981_v54 }
 0x18b   :  { %v2950_v39 = vmax.f32 %v824_v49, %v1133_v11 }
 0x18d   :  { %v1984_v21 = vpop.f32.mrb[88].mxu1 }
 0x18e   :  { %v1137_v22 = vpop.f32.mrb[76].mxu0  ;;  %v1985_v3 = vpop.f32.mrb[89].mxu1 }
 0x18f   :  { %v1138_v33 = vadd.f32 %v1943_v61, %v1137_v22  ;;  %v2119_v29 = vpop.f32.mrb[77].mxu0  ;;  %v1986_v60 = vadd.f32 %v1985_v3, %v1984_v21  ;;  %v1987_v55 = vpop.f32.mrb[90].mxu1 }
 0x190   :  { %v1140_v56 = vpop.f32.mrb[78].mxu0  ;;  %v1988_v62 = vpop.f32.mrb[91].mxu1 }
 0x191   :  { %v2955_v51 = vmax.f32 %v825_v9, %v1138_v33  ;;  %v1141_v34 = vadd.f32 %v1946_v12, %v1140_v56  ;;  %v2120_v44 = vpop.f32.mrb[79].mxu0  ;;  %v1989_v46 = vadd.f32 %v1988_v62, %v1987_v55 }
 0x193   :  { %v2960_v53 = vmax.f32 %v826_v14, %v1141_v34 }
 0x195   :  { %v1990_v45 = vpop.f32.mrb[92].mxu1 }
 0x196   :  { %v1145_v49 = vpop.f32.mrb[80].mxu0  ;;  %v1991_v61 = vpop.f32.mrb[93].mxu1 }
 0x197   :  { %v1146_v16 = vadd.f32 %v1949_v36, %v1145_v49  ;;  %v2123_v10 = vpop.f32.mrb[81].mxu0  ;;  %v1992_v41 = vadd.f32 %v1991_v61, %v1990_v45  ;;  %v1993_v47 = vpop.f32.mrb[94].mxu1  ;;  %v2972_v36 = vld [vmem:[%s3070_s5] ss:$0 sm:$0xff] }
 0x198   :  { %v1148_v48 = vpop.f32.mrb[82].mxu0  ;;  %v1994_v52 = vpop.f32.mrb[95].mxu1 }
 0x199   :  { %v2965_v7 = vmax.f32 %v827_v38, %v1146_v16  ;;  %v2124_v43 = vpop.f32.mrb[83].mxu0  ;;  %v1995_v9 = vadd.f32 %v1994_v52, %v1993_v47 }
 0x19d   :  { %v1996_v12 = vpop.f32.mrb[96].mxu1 }
 0x19e   :  { %v1433_v6 = vpop.f32.mrb[84].mxu0  ;;  %v1997_v50 = vpop.f32.mrb[97].mxu1 }
 0x19f   :  { %v1434_v14 = vadd.f32 %v1980_v35, %v1433_v6  ;;  %v2131_v5 = vpop.f32.mrb[85].mxu0  ;;  %v2967_v19 = vadd.f32 %v1997_v50, %v1996_v12  ;;  %v1999_v18 = vpop.f32.mrb[98].mxu1 }
 0x1a0   :  { %v1436_v30 = vpop.f32.mrb[86].mxu0  ;;  %v2000_v31 = vpop.f32.mrb[99].mxu1 }
 0x1a1   :  { %v1487_v23 = vmax.f32 %v2905_v4, %v1434_v14  ;;  %v1437_v59 = vadd.f32 %v1983_v20, %v1436_v30  ;;  %v2132_v38 = vpop.f32.mrb[87].mxu0  ;;  %v2975_v2 = vadd.f32 %v2000_v31, %v1999_v18 }
 0x1a3   :  { %v1507_v57 = vadd.f32 %v2972_v36, %v1487_v23  ;;  %v1488_v63 = vmax.f32 %v2910_v24, %v1437_v59 }
 0x1a5   :  { %v1520_v1 = vmax.f32 %v1507_v57, 0.0  ;;  %v1508_v8 = vadd.f32 %v2972_v36, %v1488_v63  ;;  %v2002_v40 = vpop.f32.mrb[100].mxu1 }
 0x1a6   :  { %v1441_v58 = vpop.f32.mrb[88].mxu0  ;;  %v2003_v42 = vpop.f32.mrb[101].mxu1 }
 0x1a7   :  { %v1748_v35 = vpack.c.bf16 %v1520_v1, %v1520_v1  ;;  %v1521_v54 = vmax.f32 %v1508_v8, 0.0  ;;  %v1442_v26 = vadd.f32 %v1986_v60, %v1441_v58  ;;  %v2135_v32 = vpop.f32.mrb[89].mxu0  ;;  %v2980_v4 = vadd.f32 %v2003_v42, %v2002_v40  ;;  %v2005_v11 = vpop.f32.mrb[102].mxu1 }
 0x1a8   :  { %v1444_v25 = vpop.f32.mrb[90].mxu0  ;;  %v2006_v20 = vpop.f32.mrb[103].mxu1 }
 0x1a9   :  { %1587 = vst.msk [vmem:[%s3071_s6] sm:$0xf] %vm1586_vm2, %v1748_v35  ;;  %v1749_v24 = vpack.c.bf16 %v1521_v54, %v1521_v54  ;;  %v1489_v21 = vmax.f32 %v2915_v0, %v1442_v26  ;;  %v1445_v22 = vadd.f32 %v1989_v46, %v1444_v25  ;;  %v2136_v3 = vpop.f32.mrb[91].mxu0  ;;  %v2987_v33 = vadd.f32 %v2006_v20, %v2005_v11 }
 0x1ab   :  { %1588 = vst.msk [vmem:[%s3071_s6 + $0x4] sm:$0xf] %vm1586_vm2, %v1749_v24  ;;  %v1509_v29 = vadd.f32 %v2972_v36, %v1489_v21  ;;  %v1490_v60 = vmax.f32 %v2920_v13, %v1445_v22 }
 0x1ad   :  { %v1522_v55 = vmax.f32 %v1509_v29, 0.0  ;;  %v1510_v56 = vadd.f32 %v2972_v36, %v1490_v60  ;;  %v2008_v62 = vpop.f32.mrb[104].mxu1 }
 0x1ae   :  { %v1449_v34 = vpop.f32.mrb[92].mxu0  ;;  %v2009_v44 = vpop.f32.mrb[105].mxu1 }
 0x1af   :  { %v1750_v0 = vpack.c.bf16 %v1522_v55, %v1522_v55  ;;  %v1523_v46 = vmax.f32 %v1510_v56, 0.0  ;;  %v1450_v45 = vadd.f32 %v1992_v41, %v1449_v34  ;;  %v2139_v49 = vpop.f32.mrb[93].mxu0  ;;  %v2996_v61 = vadd.f32 %v2009_v44, %v2008_v62  ;;  %v2011_v16 = vpop.f32.mrb[106].mxu1 }
 0x1b0   :  { %v1452_v10 = vpop.f32.mrb[94].mxu0  ;;  %v2012_v47 = vpop.f32.mrb[107].mxu1 }
 0x1b1   :  { %1589 = vst.msk [vmem:[%s3071_s6 + $0x8] sm:$0xf] %vm1586_vm2, %v1750_v0  ;;  %v1751_v13 = vpack.c.bf16 %v1523_v46, %v1523_v46  ;;  %v1491_v48 = vmax.f32 %v2925_v15, %v1450_v45  ;;  %v1453_v52 = vadd.f32 %v1995_v9, %v1452_v10  ;;  %v2140_v43 = vpop.f32.mrb[95].mxu0  ;;  %v2013_v12 = vadd.f32 %v2012_v47, %v2011_v16 }
 0x1b3   :  { %1590 = vst.msk [vmem:[%s3071_s6 + $0xc] sm:$0xf] %vm1586_vm2, %v1751_v13  ;;  %v1511_v41 = vadd.f32 %v2972_v36, %v1491_v48  ;;  %v1492_v6 = vmax.f32 %v2930_v17, %v1453_v52 }
 0x1b5   :  { %v1524_v50 = vmax.f32 %v1511_v41, 0.0  ;;  %v1512_v14 = vadd.f32 %v2972_v36, %v1492_v6  ;;  %v2014_v5 = vpop.f32.mrb[108].mxu1 }
 0x1b6   :  { %v1457_v18 = vpop.f32.mrb[96].mxu0  ;;  %v2015_v30 = vpop.f32.mrb[109].mxu1 }
 0x1b7   :  { %v1752_v31 = vpack.c.bf16 %v1524_v50, %v1524_v50  ;;  %v1525_v15 = vmax.f32 %v1512_v14, 0.0  ;;  %v1458_v9 = vadd.f32 %v2967_v19, %v1457_v18  ;;  %v2143_v23 = vpop.f32.mrb[97].mxu0  ;;  %v2016_v59 = vadd.f32 %v2015_v30, %v2014_v5  ;;  %v2017_v38 = vpop.f32.mrb[110].mxu1 }
 0x1b8   :  { %v1460_v57 = vpop.f32.mrb[98].mxu0  ;;  %v2018_v63 = vpop.f32.mrb[111].mxu1 }
 0x1b9   :  { %1591 = vst.msk [vmem:[%s3071_s6 + $0x10] sm:$0xf] %vm1586_vm2, %v1752_v31  ;;  %v1753_v17 = vpack.c.bf16 %v1525_v15, %v1525_v15  ;;  %v1493_v1 = vmax.f32 %v2935_v27, %v1458_v9  ;;  %v1461_v8 = vadd.f32 %v2975_v2, %v1460_v57  ;;  %v2144_v40 = vpop.f32.mrb[99].mxu0 }
 0x1bb   :  { %1592 = vst.msk [vmem:[%s3071_s6 + $0x14] sm:$0xf] %vm1586_vm2, %v1753_v17  ;;  %v1513_v19 = vadd.f32 %v2972_v36, %v1493_v1  ;;  %v1494_v58 = vmax.f32 %v2940_v28, %v1461_v8 }
 0x1bd   :  { %v1526_v42 = vmax.f32 %v1513_v19, 0.0  ;;  %v1514_v35 = vadd.f32 %v2972_v36, %v1494_v58  ;;  %v1481_v54 = vpop.f32.mrb[112].mxu1 }
 0x1be   :  { %v1482_v26 = vadd.f32 %v2016_v59, %v1481_v54  ;;  %v1465_v32 = vpop.f32.mrb[100].mxu0  ;;  %v2155_v11 = vpop.f32.mrb[113].mxu1 }
 0x1bf   :  { %v1754_v27 = vpack.c.bf16 %v1526_v42, %v1526_v42  ;;  %v1527_v25 = vmax.f32 %v1514_v35, 0.0  ;;  %v1466_v2 = vadd.f32 %v2980_v4, %v1465_v32  ;;  %v2147_v20 = vpop.f32.mrb[101].mxu0  ;;  %v1484_v24 = vpop.f32.mrb[114].mxu1 }
 0x1c0   :  { %v1499_v21 = vmax.f32 %v2965_v7, %v1482_v26  ;;  %v1468_v22 = vpop.f32.mrb[102].mxu0  ;;  %v2156_v3 = vpop.f32.mrb[115].mxu1 }
 0x1c1   :  { %1593 = vst.msk [vmem:[%s3071_s6 + $0x18] sm:$0xf] %vm1586_vm2, %v1754_v27  ;;  %v1755_v28 = vpack.c.bf16 %v1527_v25, %v1527_v25  ;;  %v1495_v29 = vmax.f32 %v2945_v37, %v1466_v2  ;;  %v1469_v60 = vadd.f32 %v2987_v33, %v1468_v22  ;;  %v2148_v55 = vpop.f32.mrb[103].mxu0 }
 0x1c2   :  { %v1519_v56 = vadd.f32 %v2972_v36, %v1499_v21 }
 0x1c3   :  { %1594 = vst.msk [vmem:[%s3071_s6 + $0x1c] sm:$0xf] %vm1586_vm2, %v1755_v28  ;;  %v1515_v7 = vadd.f32 %v2972_v36, %v1495_v29  ;;  %v1496_v4 = vmax.f32 %v2950_v39, %v1469_v60 }
 0x1c4   :  { %v1532_v62 = vmax.f32 %v1519_v56, 0.0 }
 0x1c5   :  { %v1528_v34 = vmax.f32 %v1515_v7, 0.0  ;;  %v1516_v44 = vadd.f32 %v2972_v36, %v1496_v4 }
 0x1c6   :  { %v1760_v0 = vpack.c.bf16 %v1532_v62, %v1532_v62  ;;  %v1473_v37 = vpop.f32.mrb[104].mxu0 }
 0x1c7   :  { %v1756_v46 = vpack.c.bf16 %v1528_v34, %v1528_v34  ;;  %v1529_v33 = vmax.f32 %v1516_v44, 0.0  ;;  %v1474_v45 = vadd.f32 %v2996_v61, %v1473_v37  ;;  %v2151_v49 = vpop.f32.mrb[105].mxu0 }
 0x1c8   :  { %1599 = vst.msk [vmem:[%s3071_s6 + $0x30] sm:$0xf] %vm1586_vm2, %v1760_v0  ;;  %v1476_v16 = vpop.f32.mrb[106].mxu0 }
 0x1c9   :  { %1595 = vst.msk [vmem:[%s3071_s6 + $0x20] sm:$0xf] %vm1586_vm2, %v1756_v46  ;;  %v1757_v39 = vpack.c.bf16 %v1529_v33, %v1529_v33  ;;  %v1497_v10 = vmax.f32 %v2955_v51, %v1474_v45  ;;  %v1477_v47 = vadd.f32 %v2013_v12, %v1476_v16  ;;  %v2152_v13 = vpop.f32.mrb[107].mxu0 }
 0x1cb   :  { %1596 = vst.msk [vmem:[%s3071_s6 + $0x24] sm:$0xf] %vm1586_vm2, %v1757_v39  ;;  %v1517_v61 = vadd.f32 %v2972_v36, %v1497_v10  ;;  %v1498_v48 = vmax.f32 %v2960_v53, %v1477_v47 }
 0x1cd   :  { %v1530_v52 = vmax.f32 %v1517_v61, 0.0  ;;  %v1518_v43 = vadd.f32 %v2972_v36, %v1498_v48 }
 0x1cf   :  { %v1758_v41 = vpack.c.bf16 %v1530_v52, %v1530_v52  ;;  %v1531_v6 = vmax.f32 %v1518_v43, 0.0 }
 0x1d1   :  { %1597 = vst.msk [vmem:[%s3071_s6 + $0x28] sm:$0xf] %vm1586_vm2, %v1758_v41  ;;  %v1759_v51 = vpack.c.bf16 %v1531_v6, %v1531_v6 }
 0x1d3   :  { %1598 = vst.msk [vmem:[%s3071_s6 + $0x2c] sm:$0xf] %vm1586_vm2, %v1759_v51 }

// kernel: simple_cnn_forward.5
= control target key start
LH: loop header
LB: loop body
LE: loop exit
PB: predicated region body
PF: predicated region fallthrough
CT: control target
= control target key end

     0   :  { %vm3113_vm0 = vmmov 0   ;;  %vm1696_vm1 = vcmask 523264   ;;  %vm2333_vm2 = vcmask 80896   ;;  %s3818_s1 = inlined_call_operand.vmem [shape: bf16[3136,128], index: 1, kind: input, shape index: {}]   ;;  %s3819_s0 = inlined_call_operand.vmem [shape: bf16[8,3136], index: 0, kind: input, shape index: {}]   ;;  %s3820_s2 = inlined_call_operand.vmem [shape: f32[1,128], index: 2, kind: input, shape index: {}]   ;;  %s3821_s3 = inlined_call_operand.vmem [shape: bf16[128,10], index: 3, kind: input, shape index: {}]   ;;  %s3822_s4 = inlined_call_operand.vmem [shape: f32[1,10], index: 4, kind: input, shape index: {}]   ;;  %s3823_s5 = inlined_call_operand.vmem [shape: f32[8,10], index: 5, kind: output, shape index: {}]  }
   0x1   :  { %v2883_v0 = vld [vmem:[%s3818_s1 + $0x40] sm:$0xff]   ;;  %v2887_v4 = vld [vmem:[%s3818_s1 + $0x48] sm:$0xff]   ;;  %v2891_v8 = vld [vmem:[%s3818_s1 + $0x50] sm:$0xff]  }
   0x2   :  { %v2884_v1 = vld [vmem:[%s3818_s1] sm:$0xff]   ;;  %2571 = vmatprep.subr.bf16.mxu0 %v2883_v0  ;;  %v2888_v5 = vld [vmem:[%s3818_s1 + $0x8] sm:$0xff]   ;;  %v2892_v9 = vld [vmem:[%s3818_s1 + $0x10] sm:$0xff]  }
   0x3   :  { %v2885_v2 = vld [vmem:[%s3818_s1 + $0xc0] sm:$0xff]   ;;  %2572 = vmatpush3.bf16.msra.mxu0 %v2884_v1  ;;  %v2889_v6 = vld [vmem:[%s3818_s1 + $0xc8] sm:$0xff]   ;;  %v2893_v10 = vld [vmem:[%s3818_s1 + $0xd0] sm:$0xff]  }
   0x4   :  { %v2886_v3 = vld [vmem:[%s3818_s1 + $0x80] sm:$0xff]   ;;  %2593 = vmatprep.subr.bf16.mxu1 %v2885_v2  ;;  %2573 = vmatprep.subr.bf16.mxu0 %v2887_v4  ;;  %v2890_v7 = vld [vmem:[%s3818_s1 + $0x88] sm:$0xff]   ;;  %v2894_v11 = vld [vmem:[%s3818_s1 + $0x90] sm:$0xff]  }
   0x5   :  { %2594 = vmatpush3.bf16.msra.mxu1 %v2886_v3  ;;  %v2895_v12 = vld [vmem:[%s3818_s1 + $0x58] sm:$0xff]   ;;  %v2899_v16 = vld [vmem:[%s3818_s1 + $0x60] sm:$0xff]   ;;  %v2903_v20 = vld [vmem:[%s3818_s1 + $0x68] sm:$0xff]  }
   0x6   :  { %2595 = vmatprep.subr.bf16.mxu1 %v2889_v6  ;;  %v2896_v13 = vld [vmem:[%s3818_s1 + $0x18] sm:$0xff]   ;;  %v2900_v17 = vld [vmem:[%s3818_s1 + $0x20] sm:$0xff]   ;;  %v2904_v21 = vld [vmem:[%s3818_s1 + $0x28] sm:$0xff]  }
   0x7   :  { %2574 = vmatpush3.bf16.msra.mxu0 %v2888_v5  ;;  %v2897_v14 = vld [vmem:[%s3818_s1 + $0xd8] sm:$0xff]   ;;  %v2901_v18 = vld [vmem:[%s3818_s1 + $0xe0] sm:$0xff]   ;;  %v2905_v22 = vld [vmem:[%s3818_s1 + $0xe8] sm:$0xff]  }
   0x8   :  { %2575 = vmatprep.subr.bf16.mxu0 %v2891_v8  ;;  %v2898_v15 = vld [vmem:[%s3818_s1 + $0x98] sm:$0xff]   ;;  %v2902_v19 = vld [vmem:[%s3818_s1 + $0xa0] sm:$0xff]   ;;  %v2906_v23 = vld [vmem:[%s3818_s1 + $0xa8] sm:$0xff]  }
   0x9   :  { %2596 = vmatpush3.bf16.msra.mxu1 %v2890_v7  ;;  %v2907_v24 = vld [vmem:[%s3818_s1 + $0x70] sm:$0xff]   ;;  %v2911_v28 = vld [vmem:[%s3818_s1 + $0x78] sm:$0xff]   ;;  %v21_v31 = vld [vmem:[%s3819_s0] sm:$0xff] }
   0xa   :  { %2597 = vmatprep.subr.bf16.mxu1 %v2893_v10  ;;  %v2908_v25 = vld [vmem:[%s3818_s1 + $0x30] sm:$0xff]   ;;  %v2912_v29 = vld [vmem:[%s3818_s1 + $0x38] sm:$0xff]   ;;  %v2340_v32 = vcombine.low %v21_v31, %v21_v31  ;;  %v2341_v33 = vcombine.high %v21_v31, %v21_v31  ;;  %v2917_v35 = vld [vmem:[%s3818_s1 + $0x140] sm:$0xff]  }
   0xb   :  { %2576 = vmatpush3.bf16.msra.mxu0 %v2892_v9  ;;  %v2909_v26 = vld [vmem:[%s3818_s1 + $0xf0] sm:$0xff]   ;;  %v2913_v30 = vld [vmem:[%s3818_s1 + $0xf8] sm:$0xff]   ;;  %v22_v36 = vld [vmem:[%s3819_s0 + $0x8] sm:$0xff] }
   0xc   :  { %2577 = vmatprep.subr.bf16.mxu0 %v2895_v12  ;;  %v2910_v27 = vld [vmem:[%s3818_s1 + $0xb0] sm:$0xff]   ;;  %v2916_v34 = vld [vmem:[%s3818_s1 + $0xb8] sm:$0xff]   ;;  %1732 = vmatprep.mubr.bf16.mxu0 %v2341_v33  ;;  %v2342_v37 = vcombine.low %v22_v36, %v22_v36  ;;  %v2343_v38 = vcombine.high %v22_v36, %v22_v36  ;;  %v2920_v39 = vld [vmem:[%s3818_s1 + $0x100] sm:$0xff]  }
   0xd   :  { %2598 = vmatpush3.bf16.msra.mxu1 %v2894_v11  ;;  %v2921_v40 = vld [vmem:[%s3818_s1 + $0x1c0] sm:$0xff]   ;;  %v2923_v42 = vld [vmem:[%s3818_s1 + $0x148] sm:$0xff]   ;;  %v2927_v46 = vld [vmem:[%s3818_s1 + $0x150] sm:$0xff]  }
   0xe   :  { %2599 = vmatprep.subr.bf16.mxu1 %v2897_v14  ;;  %1772 = vmatprep.mubr.bf16.mxu1 %v2343_v38  ;;  %v2922_v41 = vld [vmem:[%s3818_s1 + $0x180] sm:$0xff]   ;;  %v2924_v43 = vld [vmem:[%s3818_s1 + $0x108] sm:$0xff]   ;;  %v2928_v47 = vld [vmem:[%s3818_s1 + $0x110] sm:$0xff]  }
   0xf   :  { %2578 = vmatpush3.bf16.msra.mxu0 %v2896_v13  ;;  %v2925_v44 = vld [vmem:[%s3818_s1 + $0x1c8] sm:$0xff]   ;;  %v2929_v48 = vld [vmem:[%s3818_s1 + $0x1d0] sm:$0xff]   ;;  %v2931_v50 = vld [vmem:[%s3818_s1 + $0x158] sm:$0xff]  }
  0x10   :  { %2579 = vmatprep.subr.bf16.mxu0 %v2899_v16  ;;  %v2926_v45 = vld [vmem:[%s3818_s1 + $0x188] sm:$0xff]   ;;  %v2930_v49 = vld [vmem:[%s3818_s1 + $0x190] sm:$0xff]   ;;  %v2932_v51 = vld [vmem:[%s3818_s1 + $0x118] sm:$0xff]  }
  0x11   :  { %2600 = vmatpush3.bf16.msra.mxu1 %v2898_v15  ;;  %v2933_v52 = vld [vmem:[%s3818_s1 + $0x1d8] sm:$0xff]   ;;  %v2935_v54 = vld [vmem:[%s3818_s1 + $0x160] sm:$0xff]   ;;  %v2939_v58 = vld [vmem:[%s3818_s1 + $0x168] sm:$0xff]  }
  0x12   :  { %2601 = vmatprep.subr.bf16.mxu1 %v2901_v18  ;;  %v2934_v53 = vld [vmem:[%s3818_s1 + $0x198] sm:$0xff]   ;;  %v2936_v55 = vld [vmem:[%s3818_s1 + $0x120] sm:$0xff]   ;;  %v2940_v59 = vld [vmem:[%s3818_s1 + $0x128] sm:$0xff]  }
  0x13   :  { %2580 = vmatpush3.bf16.msra.mxu0 %v2900_v17  ;;  %v2937_v56 = vld [vmem:[%s3818_s1 + $0x1e0] sm:$0xff]   ;;  %v2941_v60 = vld [vmem:[%s3818_s1 + $0x1e8] sm:$0xff]   ;;  %v2943_v62 = vld [vmem:[%s3818_s1 + $0x170] sm:$0xff]  }
  0x14   :  { %2581 = vmatprep.subr.bf16.mxu0 %v2903_v20  ;;  %v2938_v57 = vld [vmem:[%s3818_s1 + $0x1a0] sm:$0xff]   ;;  %v2942_v61 = vld [vmem:[%s3818_s1 + $0x1a8] sm:$0xff]   ;;  %v2944_v63 = vld [vmem:[%s3818_s1 + $0x130] sm:$0xff]  }
  0x15   :  { %2602 = vmatpush3.bf16.msra.mxu1 %v2902_v19  ;;  %v2945_v0 = vld [vmem:[%s3818_s1 + $0x1f0] sm:$0xff]   ;;  %v2947_v2 = vld [vmem:[%s3818_s1 + $0x178] sm:$0xff]   ;;  %v2953_v9 = vld [vmem:[%s3818_s1 + $0x240] sm:$0xff]  }
  0x16   :  { %2603 = vmatprep.subr.bf16.mxu1 %v2905_v22  ;;  %v2946_v1 = vld [vmem:[%s3818_s1 + $0x1b0] sm:$0xff]   ;;  %v2948_v3 = vld [vmem:[%s3818_s1 + $0x138] sm:$0xff]   ;;  %v2956_v13 = vld [vmem:[%s3818_s1 + $0x200] sm:$0xff]  }
  0x17   :  { %2582 = vmatpush3.bf16.msra.mxu0 %v2904_v21  ;;  %v2949_v4 = vld [vmem:[%s3818_s1 + $0x1f8] sm:$0xff]   ;;  %v23_v5 = vld [vmem:[%s3819_s0 + $0x10] sm:$0xff]  ;;  %v2957_v14 = vld [vmem:[%s3818_s1 + $0x2c0] sm:$0xff]  }
  0x18   :  { %2583 = vmatprep.subr.bf16.mxu0 %v2907_v24  ;;  %v2344_v6 = vcombine.low %v23_v5, %v23_v5  ;;  %v2345_v7 = vcombine.high %v23_v5, %v23_v5  ;;  %v2952_v8 = vld [vmem:[%s3818_s1 + $0x1b8] sm:$0xff]   ;;  %v2958_v15 = vld [vmem:[%s3818_s1 + $0x280] sm:$0xff]   ;;  %v2959_v16 = vld [vmem:[%s3818_s1 + $0x248] sm:$0xff]  }
  0x19   :  { %2604 = vmatpush3.bf16.msra.mxu1 %v2906_v23  ;;  %v24_v10 = vld [vmem:[%s3819_s0 + $0x18] sm:$0xff]  ;;  %v2960_v17 = vld [vmem:[%s3818_s1 + $0x208] sm:$0xff]   ;;  %v2963_v20 = vld [vmem:[%s3818_s1 + $0x250] sm:$0xff]  }
  0x1a   :  { %2605 = vmatprep.subr.bf16.mxu1 %v2909_v26  ;;  %v2346_v11 = vcombine.low %v24_v10, %v24_v10  ;;  %v2347_v12 = vcombine.high %v24_v10, %v24_v10  ;;  %v2961_v18 = vld [vmem:[%s3818_s1 + $0x2c8] sm:$0xff]   ;;  %v2964_v21 = vld [vmem:[%s3818_s1 + $0x210] sm:$0xff]   ;;  %v2967_v24 = vld [vmem:[%s3818_s1 + $0x258] sm:$0xff]  }
  0x1b   :  { %2584 = vmatpush3.bf16.msra.mxu0 %v2908_v25  ;;  %v2962_v19 = vld [vmem:[%s3818_s1 + $0x288] sm:$0xff]   ;;  %v2965_v22 = vld [vmem:[%s3818_s1 + $0x2d0] sm:$0xff]   ;;  %v2968_v25 = vld [vmem:[%s3818_s1 + $0x218] sm:$0xff]  }
  0x1c   :  { %2585 = vmatprep.subr.bf16.mxu0 %v2911_v28  ;;  %v2966_v23 = vld [vmem:[%s3818_s1 + $0x290] sm:$0xff]   ;;  %v2969_v26 = vld [vmem:[%s3818_s1 + $0x2d8] sm:$0xff]   ;;  %v2971_v28 = vld [vmem:[%s3818_s1 + $0x260] sm:$0xff]  }
  0x1d   :  { %2606 = vmatpush3.bf16.msra.mxu1 %v2910_v27  ;;  %v2970_v27 = vld [vmem:[%s3818_s1 + $0x298] sm:$0xff]   ;;  %v2974_v31 = vld [vmem:[%s3818_s1 + $0x2a0] sm:$0xff]   ;;  %v2976_v33 = vld [vmem:[%s3818_s1 + $0x228] sm:$0xff]  }
  0x1e   :  { %2607 = vmatprep.subr.bf16.mxu1 %v2913_v30  ;;  %v2973_v30 = vld [vmem:[%s3818_s1 + $0x2e0] sm:$0xff]   ;;  %v2979_v36 = vld [vmem:[%s3818_s1 + $0x270] sm:$0xff]  }
  0x1f   :  { %2586 = vmatpush3.bf16.msra.mxu0 %v2912_v29  ;;  %v2972_v29 = vld [vmem:[%s3818_s1 + $0x220] sm:$0xff]   ;;  %v2981_v38 = vld [vmem:[%s3818_s1 + $0x2f0] sm:$0xff]  }
  0x20   :  { %2615 = vmatprep.subr.bf16.mxu0 %v2917_v35  ;;  %v2978_v35 = vld [vmem:[%s3818_s1 + $0x2a8] sm:$0xff]   ;;  %v3010_v5 = vld [vmem:[%s3818_s1 + $0x3a0] sm:$0xff]   ;;  %v3015_v10 = vld [vmem:[%s3818_s1 + $0x370] sm:$0xff]  }
  0x21   :  { %2608 = vmatpush3.bf16.msra.mxu1 %v2916_v34  ;;  %v2977_v34 = vld [vmem:[%s3818_s1 + $0x2e8] sm:$0xff]  }
  0x22   :  { %1733 = vmatmul.mubr.bf16.vlgmr.msra.gmra.mrb[0].mxu0 %v2340_v32  ;;  %2637 = vmatprep.subr.bf16.mxu1 %v2921_v40  ;;  %v2975_v32 = vld [vmem:[%s3818_s1 + $0x268] sm:$0xff]   ;;  %v2983_v40 = vld [vmem:[%s3818_s1 + $0x278] sm:$0xff]  }
  0x23   :  { %2616 = vmatpush3.bf16.msra.mxu0 %v2920_v39  ;;  %1812 = vmatprep.mubr.bf16.mxu0 %v2345_v7  ;;  %v2982_v39 = vld [vmem:[%s3818_s1 + $0x2b0] sm:$0xff]   ;;  %v3012_v7 = vld [vmem:[%s3818_s1 + $0x328] sm:$0xff]  }
  0x24   :  { %1773 = vmatmul.mubr.bf16.vlgmr.msra.gmra.mrb[0].mxu1 %v2342_v37  ;;  %2617 = vmatprep.subr.bf16.mxu0 %v2923_v42  ;;  %v2980_v37 = vld [vmem:[%s3818_s1 + $0x230] sm:$0xff]   ;;  %v2985_v42 = vld [vmem:[%s3818_s1 + $0x2f8] sm:$0xff]  }
  0x25   :  { %2638 = vmatpush3.bf16.msra.mxu1 %v2922_v41  ;;  %1852 = vmatprep.mubr.bf16.mxu1 %v2347_v12  ;;  %v2984_v41 = vld [vmem:[%s3818_s1 + $0x238] sm:$0xff]   ;;  %v3017_v12 = vld [vmem:[%s3818_s1 + $0x3f0] sm:$0xff]  }
  0x26   :  { %2639 = vmatprep.subr.bf16.mxu1 %v2925_v44 }
  0x27   :  { %2618 = vmatpush3.bf16.msra.mxu0 %v2924_v43  ;;  %v25_v43 = vld [vmem:[%s3819_s0 + $0x20] sm:$0xff] }
  0x28   :  { %2619 = vmatprep.subr.bf16.mxu0 %v2927_v46  ;;  %v2348_v44 = vcombine.low %v25_v43, %v25_v43  ;;  %v2988_v46 = vld [vmem:[%s3818_s1 + $0x2b8] sm:$0xff]  }
  0x29   :  { %2640 = vmatpush3.bf16.msra.mxu1 %v2926_v45  ;;  %v2349_v45 = vcombine.high %v25_v43, %v25_v43  ;;  %v3046_v43 = vld [vmem:[%s3818_s1 + $0x4a0] sm:$0xff]  }
  0x2a   :  { %2641 = vmatprep.subr.bf16.mxu1 %v2929_v48  ;;  %v26_v48 = vld [vmem:[%s3819_s0 + $0x28] sm:$0xff] }
  0x2b   :  { %2620 = vmatpush3.bf16.msra.mxu0 %v2928_v47  ;;  %v2989_v47 = vld [vmem:[%s3818_s1 + $0x340] sm:$0xff]  }
  0x2c   :  { %2621 = vmatprep.subr.bf16.mxu0 %v2931_v50  ;;  %v2351_v50 = vcombine.high %v26_v48, %v26_v48 }
  0x2d   :  { %2642 = vmatpush3.bf16.msra.mxu1 %v2930_v49  ;;  %v2350_v49 = vcombine.low %v26_v48, %v26_v48  ;;  %v3051_v48 = vld [vmem:[%s3818_s1 + $0x470] sm:$0xff]  }
  0x2e   :  { %2643 = vmatprep.subr.bf16.mxu1 %v2933_v52  ;;  %v2993_v52 = vld [vmem:[%s3818_s1 + $0x3c0] sm:$0xff]  }
  0x2f   :  { %2622 = vmatpush3.bf16.msra.mxu0 %v2932_v51  ;;  %v2992_v51 = vld [vmem:[%s3818_s1 + $0x300] sm:$0xff]  }
  0x30   :  { %2623 = vmatprep.subr.bf16.mxu0 %v2935_v54  ;;  %v2995_v54 = vld [vmem:[%s3818_s1 + $0x348] sm:$0xff]  }
  0x31   :  { %2644 = vmatpush3.bf16.msra.mxu1 %v2934_v53  ;;  %v2994_v53 = vld [vmem:[%s3818_s1 + $0x380] sm:$0xff]  }
  0x32   :  { %2645 = vmatprep.subr.bf16.mxu1 %v2937_v56  ;;  %v2997_v56 = vld [vmem:[%s3818_s1 + $0x3c8] sm:$0xff]  }
  0x33   :  { %2624 = vmatpush3.bf16.msra.mxu0 %v2936_v55  ;;  %v2996_v55 = vld [vmem:[%s3818_s1 + $0x308] sm:$0xff]  }
  0x34   :  { %2625 = vmatprep.subr.bf16.mxu0 %v2939_v58  ;;  %v2999_v58 = vld [vmem:[%s3818_s1 + $0x350] sm:$0xff]  }
  0x35   :  { %2646 = vmatpush3.bf16.msra.mxu1 %v2938_v57  ;;  %v2998_v57 = vld [vmem:[%s3818_s1 + $0x388] sm:$0xff]  }
  0x36   :  { %2647 = vmatprep.subr.bf16.mxu1 %v2941_v60  ;;  %v3001_v60 = vld [vmem:[%s3818_s1 + $0x3d0] sm:$0xff]  }
  0x37   :  { %2626 = vmatpush3.bf16.msra.mxu0 %v2940_v59  ;;  %v3000_v59 = vld [vmem:[%s3818_s1 + $0x310] sm:$0xff]  }
  0x38   :  { %2627 = vmatprep.subr.bf16.mxu0 %v2943_v62  ;;  %v3003_v62 = vld [vmem:[%s3818_s1 + $0x358] sm:$0xff]  }
  0x39   :  { %2648 = vmatpush3.bf16.msra.mxu1 %v2942_v61  ;;  %v3002_v61 = vld [vmem:[%s3818_s1 + $0x390] sm:$0xff]  }
  0x3a   :  { %2649 = vmatprep.subr.bf16.mxu1 %v2945_v0  ;;  %v3005_v0 = vld [vmem:[%s3818_s1 + $0x3d8] sm:$0xff]  }
  0x3b   :  { %2628 = vmatpush3.bf16.msra.mxu0 %v2944_v63  ;;  %v3004_v63 = vld [vmem:[%s3818_s1 + $0x318] sm:$0xff]  }
  0x3c   :  { %2629 = vmatprep.subr.bf16.mxu0 %v2947_v2  ;;  %v3007_v2 = vld [vmem:[%s3818_s1 + $0x360] sm:$0xff]  }
  0x3d   :  { %2650 = vmatpush3.bf16.msra.mxu1 %v2946_v1  ;;  %v3006_v1 = vld [vmem:[%s3818_s1 + $0x398] sm:$0xff]  }
  0x3e   :  { %2651 = vmatprep.subr.bf16.mxu1 %v2949_v4  ;;  %v3009_v4 = vld [vmem:[%s3818_s1 + $0x3e0] sm:$0xff]  }
  0x3f   :  { %2630 = vmatpush3.bf16.msra.mxu0 %v2948_v3  ;;  %v3008_v3 = vld [vmem:[%s3818_s1 + $0x320] sm:$0xff]  }
  0x40   :  { %2659 = vmatprep.subr.bf16.mxu0 %v2953_v9  ;;  %v3014_v9 = vld [vmem:[%s3818_s1 + $0x3a8] sm:$0xff]  }
  0x41   :  { %2652 = vmatpush3.bf16.msra.mxu1 %v2952_v8  ;;  %v3013_v8 = vld [vmem:[%s3818_s1 + $0x3e8] sm:$0xff]  }
  0x42   :  { %1813 = vmatmul.mubr.bf16.vlgmr.msra.gmra.mrb[4].mxu0 %v2344_v6  ;;  %2681 = vmatprep.subr.bf16.mxu1 %v2957_v14  ;;  %v3011_v6 = vld [vmem:[%s3818_s1 + $0x368] sm:$0xff]   ;;  %v3019_v14 = vld [vmem:[%s3818_s1 + $0x378] sm:$0xff]  }
  0x43   :  { %2660 = vmatpush3.bf16.msra.mxu0 %v2956_v13  ;;  %1892 = vmatprep.mubr.bf16.mxu0 %v2349_v45  ;;  %v3018_v13 = vld [vmem:[%s3818_s1 + $0x3b0] sm:$0xff]   ;;  %v3048_v45 = vld [vmem:[%s3818_s1 + $0x428] sm:$0xff]  }
  0x44   :  { %1853 = vmatmul.mubr.bf16.vlgmr.msra.gmra.mrb[4].mxu1 %v2346_v11  ;;  %2661 = vmatprep.subr.bf16.mxu0 %v2959_v16  ;;  %v3016_v11 = vld [vmem:[%s3818_s1 + $0x330] sm:$0xff]   ;;  %v3021_v16 = vld [vmem:[%s3818_s1 + $0x3f8] sm:$0xff]  }
  0x45   :  { %2682 = vmatpush3.bf16.msra.mxu1 %v2958_v15  ;;  %1932 = vmatprep.mubr.bf16.mxu1 %v2351_v50  ;;  %v3020_v15 = vld [vmem:[%s3818_s1 + $0x338] sm:$0xff]   ;;  %v3053_v50 = vld [vmem:[%s3818_s1 + $0x4f0] sm:$0xff]  }
  0x46   :  { %2683 = vmatprep.subr.bf16.mxu1 %v2961_v18 }
  0x47   :  { %2662 = vmatpush3.bf16.msra.mxu0 %v2960_v17  ;;  %v27_v17 = vld [vmem:[%s3819_s0 + $0x30] sm:$0xff] }
  0x48   :  { %2663 = vmatprep.subr.bf16.mxu0 %v2963_v20  ;;  %v2352_v18 = vcombine.low %v27_v17, %v27_v17  ;;  %v3024_v20 = vld [vmem:[%s3818_s1 + $0x3b8] sm:$0xff]  }
  0x49   :  { %2684 = vmatpush3.bf16.msra.mxu1 %v2962_v19  ;;  %v2353_v19 = vcombine.high %v27_v17, %v27_v17  ;;  %v3082_v17 = vld [vmem:[%s3818_s1 + $0x5a0] sm:$0xff]  }
  0x4a   :  { %2685 = vmatprep.subr.bf16.mxu1 %v2965_v22  ;;  %v28_v22 = vld [vmem:[%s3819_s0 + $0x38] sm:$0xff] }
  0x4b   :  { %2664 = vmatpush3.bf16.msra.mxu0 %v2964_v21  ;;  %v3025_v21 = vld [vmem:[%s3818_s1 + $0x440] sm:$0xff]  }
  0x4c   :  { %2665 = vmatprep.subr.bf16.mxu0 %v2967_v24  ;;  %v2355_v24 = vcombine.high %v28_v22, %v28_v22 }
  0x4d   :  { %2686 = vmatpush3.bf16.msra.mxu1 %v2966_v23  ;;  %v2354_v23 = vcombine.low %v28_v22, %v28_v22  ;;  %v3087_v22 = vld [vmem:[%s3818_s1 + $0x570] sm:$0xff]  }
  0x4e   :  { %2687 = vmatprep.subr.bf16.mxu1 %v2969_v26  ;;  %v3029_v26 = vld [vmem:[%s3818_s1 + $0x4c0] sm:$0xff]  }
  0x4f   :  { %2666 = vmatpush3.bf16.msra.mxu0 %v2968_v25  ;;  %v3028_v25 = vld [vmem:[%s3818_s1 + $0x400] sm:$0xff]  }
  0x50   :  { %2667 = vmatprep.subr.bf16.mxu0 %v2971_v28  ;;  %v3031_v28 = vld [vmem:[%s3818_s1 + $0x448] sm:$0xff]  }
  0x51   :  { %2688 = vmatpush3.bf16.msra.mxu1 %v2970_v27  ;;  %v3030_v27 = vld [vmem:[%s3818_s1 + $0x480] sm:$0xff]  }
  0x52   :  { %2689 = vmatprep.subr.bf16.mxu1 %v2973_v30  ;;  %v3033_v30 = vld [vmem:[%s3818_s1 + $0x4c8] sm:$0xff]  }
  0x53   :  { %2668 = vmatpush3.bf16.msra.mxu0 %v2972_v29  ;;  %v3032_v29 = vld [vmem:[%s3818_s1 + $0x408] sm:$0xff]  }
  0x54   :  { %2669 = vmatprep.subr.bf16.mxu0 %v2975_v32  ;;  %v3035_v32 = vld [vmem:[%s3818_s1 + $0x450] sm:$0xff]  }
  0x55   :  { %2690 = vmatpush3.bf16.msra.mxu1 %v2974_v31  ;;  %v3034_v31 = vld [vmem:[%s3818_s1 + $0x488] sm:$0xff]  }
  0x56   :  { %2691 = vmatprep.subr.bf16.mxu1 %v2977_v34  ;;  %v3037_v34 = vld [vmem:[%s3818_s1 + $0x4d0] sm:$0xff]  }
  0x57   :  { %2670 = vmatpush3.bf16.msra.mxu0 %v2976_v33  ;;  %v3036_v33 = vld [vmem:[%s3818_s1 + $0x410] sm:$0xff]  }
  0x58   :  { %2671 = vmatprep.subr.bf16.mxu0 %v2979_v36  ;;  %v3039_v36 = vld [vmem:[%s3818_s1 + $0x458] sm:$0xff]  }
  0x59   :  { %2692 = vmatpush3.bf16.msra.mxu1 %v2978_v35  ;;  %v3038_v35 = vld [vmem:[%s3818_s1 + $0x490] sm:$0xff]  }
  0x5a   :  { %2693 = vmatprep.subr.bf16.mxu1 %v2981_v38  ;;  %v3041_v38 = vld [vmem:[%s3818_s1 + $0x4d8] sm:$0xff]  }
  0x5b   :  { %2672 = vmatpush3.bf16.msra.mxu0 %v2980_v37  ;;  %v3040_v37 = vld [vmem:[%s3818_s1 + $0x418] sm:$0xff]  }
  0x5c   :  { %2673 = vmatprep.subr.bf16.mxu0 %v2983_v40  ;;  %v3043_v40 = vld [vmem:[%s3818_s1 + $0x460] sm:$0xff]  }
  0x5d   :  { %2694 = vmatpush3.bf16.msra.mxu1 %v2982_v39  ;;  %v3042_v39 = vld [vmem:[%s3818_s1 + $0x498] sm:$0xff]  }
  0x5e   :  { %2695 = vmatprep.subr.bf16.mxu1 %v2985_v42  ;;  %v3045_v42 = vld [vmem:[%s3818_s1 + $0x4e0] sm:$0xff]  }
  0x5f   :  { %2674 = vmatpush3.bf16.msra.mxu0 %v2984_v41  ;;  %v3044_v41 = vld [vmem:[%s3818_s1 + $0x420] sm:$0xff]  }
  0x60   :  { %2703 = vmatprep.subr.bf16.mxu0 %v2989_v47  ;;  %v3050_v47 = vld [vmem:[%s3818_s1 + $0x4a8] sm:$0xff]  }
  0x61   :  { %2696 = vmatpush3.bf16.msra.mxu1 %v2988_v46  ;;  %v3049_v46 = vld [vmem:[%s3818_s1 + $0x4e8] sm:$0xff]  }
  0x62   :  { %1893 = vmatmul.mubr.bf16.vlgmr.msra.gmra.mrb[8].mxu0 %v2348_v44  ;;  %2725 = vmatprep.subr.bf16.mxu1 %v2993_v52  ;;  %v3047_v44 = vld [vmem:[%s3818_s1 + $0x468] sm:$0xff]   ;;  %v3055_v52 = vld [vmem:[%s3818_s1 + $0x478] sm:$0xff]  }
  0x63   :  { %2704 = vmatpush3.bf16.msra.mxu0 %v2992_v51  ;;  %1972 = vmatprep.mubr.bf16.mxu0 %v2353_v19  ;;  %v3054_v51 = vld [vmem:[%s3818_s1 + $0x4b0] sm:$0xff]   ;;  %v3084_v19 = vld [vmem:[%s3818_s1 + $0x528] sm:$0xff]  }
  0x64   :  { %1933 = vmatmul.mubr.bf16.vlgmr.msra.gmra.mrb[8].mxu1 %v2350_v49  ;;  %2705 = vmatprep.subr.bf16.mxu0 %v2995_v54  ;;  %v3052_v49 = vld [vmem:[%s3818_s1 + $0x430] sm:$0xff]   ;;  %v3057_v54 = vld [vmem:[%s3818_s1 + $0x4f8] sm:$0xff]  }
  0x65   :  { %2726 = vmatpush3.bf16.msra.mxu1 %v2994_v53  ;;  %2012 = vmatprep.mubr.bf16.mxu1 %v2355_v24  ;;  %v3056_v53 = vld [vmem:[%s3818_s1 + $0x438] sm:$0xff]   ;;  %v3089_v24 = vld [vmem:[%s3818_s1 + $0x5f0] sm:$0xff]  }
  0x66   :  { %2727 = vmatprep.subr.bf16.mxu1 %v2997_v56 }
  0x67   :  { %2706 = vmatpush3.bf16.msra.mxu0 %v2996_v55  ;;  %v29_v55 = vld [vmem:[%s3819_s0 + $0x40] sm:$0xff] }
  0x68   :  { %2707 = vmatprep.subr.bf16.mxu0 %v2999_v58  ;;  %v2356_v56 = vcombine.low %v29_v55, %v29_v55  ;;  %v3060_v58 = vld [vmem:[%s3818_s1 + $0x4b8] sm:$0xff]  }
  0x69   :  { %2728 = vmatpush3.bf16.msra.mxu1 %v2998_v57  ;;  %v2357_v57 = vcombine.high %v29_v55, %v29_v55  ;;  %v3104_v55 = vld [vmem:[%s3821_s3] sm:$0xff]  }
  0x6a   :  { %2729 = vmatprep.subr.bf16.mxu1 %v3001_v60  ;;  %v30_v60 = vld [vmem:[%s3819_s0 + $0x48] sm:$0xff] }
  0x6b   :  { %2708 = vmatpush3.bf16.msra.mxu0 %v3000_v59  ;;  %v3061_v59 = vld [vmem:[%s3818_s1 + $0x540] sm:$0xff]  }
  0x6c   :  { %2709 = vmatprep.subr.bf16.mxu0 %v3003_v62  ;;  %v2359_v62 = vcombine.high %v30_v60, %v30_v60 }
  0x6d   :  { %2730 = vmatpush3.bf16.msra.mxu1 %v3002_v61  ;;  %v2358_v61 = vcombine.low %v30_v60, %v30_v60 }
  0x6e   :  { %2731 = vmatprep.subr.bf16.mxu1 %v3005_v0  ;;  %v3065_v0 = vld [vmem:[%s3818_s1 + $0x5c0] sm:$0xff]  }
  0x6f   :  { %2710 = vmatpush3.bf16.msra.mxu0 %v3004_v63  ;;  %v3064_v63 = vld [vmem:[%s3818_s1 + $0x500] sm:$0xff]  }
  0x70   :  { %2711 = vmatprep.subr.bf16.mxu0 %v3007_v2  ;;  %v3067_v2 = vld [vmem:[%s3818_s1 + $0x548] sm:$0xff]  }
  0x71   :  { %2732 = vmatpush3.bf16.msra.mxu1 %v3006_v1  ;;  %v3066_v1 = vld [vmem:[%s3818_s1 + $0x580] sm:$0xff]  }
  0x72   :  { %2733 = vmatprep.subr.bf16.mxu1 %v3009_v4  ;;  %v3069_v4 = vld [vmem:[%s3818_s1 + $0x5c8] sm:$0xff]  }
  0x73   :  { %2712 = vmatpush3.bf16.msra.mxu0 %v3008_v3  ;;  %v3068_v3 = vld [vmem:[%s3818_s1 + $0x508] sm:$0xff]  }
  0x74   :  { %2713 = vmatprep.subr.bf16.mxu0 %v3011_v6  ;;  %v3071_v6 = vld [vmem:[%s3818_s1 + $0x550] sm:$0xff]  }
  0x75   :  { %2734 = vmatpush3.bf16.msra.mxu1 %v3010_v5  ;;  %v3070_v5 = vld [vmem:[%s3818_s1 + $0x588] sm:$0xff]  }
  0x76   :  { %2735 = vmatprep.subr.bf16.mxu1 %v3013_v8  ;;  %v3073_v8 = vld [vmem:[%s3818_s1 + $0x5d0] sm:$0xff]  }
  0x77   :  { %2714 = vmatpush3.bf16.msra.mxu0 %v3012_v7  ;;  %v3072_v7 = vld [vmem:[%s3818_s1 + $0x510] sm:$0xff]  }
  0x78   :  { %2715 = vmatprep.subr.bf16.mxu0 %v3015_v10  ;;  %v3075_v10 = vld [vmem:[%s3818_s1 + $0x558] sm:$0xff]  }
  0x79   :  { %2736 = vmatpush3.bf16.msra.mxu1 %v3014_v9  ;;  %v3074_v9 = vld [vmem:[%s3818_s1 + $0x590] sm:$0xff]  }
  0x7a   :  { %2737 = vmatprep.subr.bf16.mxu1 %v3017_v12  ;;  %v3077_v12 = vld [vmem:[%s3818_s1 + $0x5d8] sm:$0xff]  }
  0x7b   :  { %2716 = vmatpush3.bf16.msra.mxu0 %v3016_v11  ;;  %v3076_v11 = vld [vmem:[%s3818_s1 + $0x518] sm:$0xff]  }
  0x7c   :  { %2717 = vmatprep.subr.bf16.mxu0 %v3019_v14  ;;  %v3079_v14 = vld [vmem:[%s3818_s1 + $0x560] sm:$0xff]  }
  0x7d   :  { %2738 = vmatpush3.bf16.msra.mxu1 %v3018_v13  ;;  %v3078_v13 = vld [vmem:[%s3818_s1 + $0x598] sm:$0xff]  }
  0x7e   :  { %2739 = vmatprep.subr.bf16.mxu1 %v3021_v16  ;;  %v3081_v16 = vld [vmem:[%s3818_s1 + $0x5e0] sm:$0xff]  }
  0x7f   :  { %2718 = vmatpush3.bf16.msra.mxu0 %v3020_v15  ;;  %v3080_v15 = vld [vmem:[%s3818_s1 + $0x520] sm:$0xff]  }
  0x80   :  { %2747 = vmatprep.subr.bf16.mxu0 %v3025_v21  ;;  %v3086_v21 = vld [vmem:[%s3818_s1 + $0x5a8] sm:$0xff]  }
  0x81   :  { %2740 = vmatpush3.bf16.msra.mxu1 %v3024_v20  ;;  %v3085_v20 = vld [vmem:[%s3818_s1 + $0x5e8] sm:$0xff]  }
  0x82   :  { %1973 = vmatmul.mubr.bf16.vlgmr.msra.gmra.mrb[12].mxu0 %v2352_v18  ;;  %2769 = vmatprep.subr.bf16.mxu1 %v3029_v26  ;;  %v3083_v18 = vld [vmem:[%s3818_s1 + $0x568] sm:$0xff]   ;;  %v3091_v26 = vld [vmem:[%s3818_s1 + $0x578] sm:$0xff]  }
  0x83   :  { %2748 = vmatpush3.bf16.msra.mxu0 %v3028_v25  ;;  %2052 = vmatprep.mubr.bf16.mxu0 %v2357_v57  ;;  %v3090_v25 = vld [vmem:[%s3818_s1 + $0x5b0] sm:$0xff]  }
  0x84   :  { %2013 = vmatmul.mubr.bf16.vlgmr.msra.gmra.mrb[12].mxu1 %v2354_v23  ;;  %2749 = vmatprep.subr.bf16.mxu0 %v3031_v28  ;;  %v3088_v23 = vld [vmem:[%s3818_s1 + $0x530] sm:$0xff]   ;;  %v3093_v28 = vld [vmem:[%s3818_s1 + $0x5f8] sm:$0xff]  }
  0x85   :  { %2770 = vmatpush3.bf16.msra.mxu1 %v3030_v27  ;;  %2092 = vmatprep.mubr.bf16.mxu1 %v2359_v62  ;;  %v3092_v27 = vld [vmem:[%s3818_s1 + $0x538] sm:$0xff]  }
  0x86   :  { %2771 = vmatprep.subr.bf16.mxu1 %v3033_v30 }
  0x87   :  { %2750 = vmatpush3.bf16.msra.mxu0 %v3032_v29  ;;  %v31_v29 = vld [vmem:[%s3819_s0 + $0x50] sm:$0xff] }
  0x88   :  { %2751 = vmatprep.subr.bf16.mxu0 %v3035_v32  ;;  %v2360_v30 = vcombine.low %v31_v29, %v31_v29  ;;  %v3096_v32 = vld [vmem:[%s3818_s1 + $0x5b8] sm:$0xff]  }
  0x89   :  { %2772 = vmatpush3.bf16.msra.mxu1 %v3034_v31  ;;  %v2361_v31 = vcombine.high %v31_v29, %v31_v29 }
  0x8a   :  { %2773 = vmatprep.subr.bf16.mxu1 %v3037_v34  ;;  %v3112_v34 = vmov 0.0  }
  0x8b   :  { %2752 = vmatpush3.bf16.msra.mxu0 %v3036_v33  ;;  %v32_v33 = vld [vmem:[%s3819_s0 + $0x58] sm:$0xff] }
  0x8c   :  { %2753 = vmatprep.subr.bf16.mxu0 %v3039_v36  ;;  %v2363_v36 = vcombine.high %v32_v33, %v32_v33 }
  0x8d   :  { %2774 = vmatpush3.bf16.msra.mxu1 %v3038_v35  ;;  %v2362_v35 = vcombine.low %v32_v33, %v32_v33 }
  0x8e   :  { %2775 = vmatprep.subr.bf16.mxu1 %v3041_v38  ;;  %v3100_v38 = vld [vmem:[%s3818_s1 + $0x608] sm:$0xff]  }
  0x8f   :  { %2754 = vmatpush3.bf16.msra.mxu0 %v3040_v37  ;;  %v3099_v37 = vld [vmem:[%s3818_s1 + $0x600] sm:$0xff]  }
  0x90   :  { %2755 = vmatprep.subr.bf16.mxu0 %v3043_v40  ;;  %v3102_v40 = vld [vmem:[%s3818_s1 + $0x618] sm:$0xff]  }
  0x91   :  { %2776 = vmatpush3.bf16.msra.mxu1 %v3042_v39  ;;  %v3101_v39 = vld [vmem:[%s3818_s1 + $0x610] sm:$0xff]  }
  0x92   :  { %2777 = vmatprep.subr.bf16.mxu1 %v3045_v42 }
  0x93   :  { %2756 = vmatpush3.bf16.msra.mxu0 %v3044_v41  ;;  %v3103_v41 = vld [vmem:[%s3819_s0 + $0x60] ss:$0 sps:$4 sm:$0xff]  }
  0x94   :  { %2757 = vmatprep.subr.bf16.mxu0 %v3047_v44 }
  0x95   :  { %2778 = vmatpush3.bf16.msra.mxu1 %v3046_v43  ;;  %v2339_v43 = vld [vmem:[%s3820_s2] ss:$0 sm:$0xff] }
  0x96   :  { %2779 = vmatprep.subr.bf16.mxu1 %v3049_v46 }
  0x97   :  { %2758 = vmatpush3.bf16.msra.mxu0 %v3048_v45 }
  0x98   :  { %2759 = vmatprep.subr.bf16.mxu0 %v3051_v48 }
  0x99   :  { %2780 = vmatpush3.bf16.msra.mxu1 %v3050_v47 }
  0x9a   :  { %2781 = vmatprep.subr.bf16.mxu1 %v3053_v50 }
  0x9b   :  { %2760 = vmatpush3.bf16.msra.mxu0 %v3052_v49 }
  0x9c   :  { %2761 = vmatprep.subr.bf16.mxu0 %v3055_v52 }
  0x9d   :  { %2782 = vmatpush3.bf16.msra.mxu1 %v3054_v51 }
  0x9e   :  { %2783 = vmatprep.subr.bf16.mxu1 %v3057_v54 }
  0x9f   :  { %2762 = vmatpush3.bf16.msra.mxu0 %v3056_v53 }
  0xa0   :  { %2791 = vmatprep.subr.bf16.mxu0 %v3061_v59  ;;  %v3106_v59 = vld [vmem:[%s3821_s3 + $0x10] sm:$0xff]  }
  0xa1   :  { %2784 = vmatpush3.bf16.msra.mxu1 %v3060_v58 }
  0xa2   :  { %2053 = vmatmul.mubr.bf16.vlgmr.msra.gmra.mrb[16].mxu0 %v2356_v56  ;;  %2813 = vmatprep.subr.bf16.mxu1 %v3065_v0  ;;  %v3105_v56 = vld [vmem:[%s3821_s3 + $0x8] sm:$0xff]  }
  0xa3   :  { %2792 = vmatpush3.bf16.msra.mxu0 %v3064_v63  ;;  %2132 = vmatprep.mubr.bf16.mxu0 %v2361_v31 }
  0xa4   :  { %2093 = vmatmul.mubr.bf16.vlgmr.msra.gmra.mrb[16].mxu1 %v2358_v61  ;;  %2793 = vmatprep.subr.bf16.mxu0 %v3067_v2 }
  0xa5   :  { %2814 = vmatpush3.bf16.msra.mxu1 %v3066_v1  ;;  %2172 = vmatprep.mubr.bf16.mxu1 %v2363_v36 }
  0xa6   :  { %2815 = vmatprep.subr.bf16.mxu1 %v3069_v4  ;;  %v3107_v4 = vld [vmem:[%s3821_s3 + $0x18] sm:$0xff]  }
  0xa7   :  { %2794 = vmatpush3.bf16.msra.mxu0 %v3068_v3 }
  0xa8   :  { %2795 = vmatprep.subr.bf16.mxu0 %v3071_v6 }
  0xa9   :  { %2816 = vmatpush3.bf16.msra.mxu1 %v3070_v5 }
  0xaa   :  { %2817 = vmatprep.subr.bf16.mxu1 %v3073_v8  ;;  %v3109_v8 = vld [vmem:[%s3821_s3 + $0x28] sm:$0xff]  }
  0xab   :  { %2796 = vmatpush3.bf16.msra.mxu0 %v3072_v7  ;;  %v3108_v7 = vld [vmem:[%s3821_s3 + $0x20] sm:$0xff]  }
  0xac   :  { %2797 = vmatprep.subr.bf16.mxu0 %v3075_v10  ;;  %v3111_v10 = vld [vmem:[%s3821_s3 + $0x38] sm:$0xff]  }
  0xad   :  { %2818 = vmatpush3.bf16.msra.mxu1 %v3074_v9  ;;  %v3110_v9 = vld [vmem:[%s3821_s3 + $0x30] sm:$0xff]  }
  0xae   :  { %2819 = vmatprep.subr.bf16.mxu1 %v3077_v12 }
  0xaf   :  { %2798 = vmatpush3.bf16.msra.mxu0 %v3076_v11 }
  0xb0   :  { %2799 = vmatprep.subr.bf16.mxu0 %v3079_v14 }
  0xb1   :  { %2820 = vmatpush3.bf16.msra.mxu1 %v3078_v13 }
  0xb2   :  { %2821 = vmatprep.subr.bf16.mxu1 %v3081_v16 }
  0xb3   :  { %2800 = vmatpush3.bf16.msra.mxu0 %v3080_v15 }
  0xb4   :  { %2801 = vmatprep.subr.bf16.mxu0 %v3083_v18 }
  0xb5   :  { %2822 = vmatpush3.bf16.msra.mxu1 %v3082_v17 }
  0xb6   :  { %2823 = vmatprep.subr.bf16.mxu1 %v3085_v20 }
  0xb7   :  { %2802 = vmatpush3.bf16.msra.mxu0 %v3084_v19 }
  0xb8   :  { %2803 = vmatprep.subr.bf16.mxu0 %v3087_v22 }
  0xb9   :  { %2824 = vmatpush3.bf16.msra.mxu1 %v3086_v21 }
  0xba   :  { %2825 = vmatprep.subr.bf16.mxu1 %v3089_v24 }
  0xbb   :  { %2804 = vmatpush3.bf16.msra.mxu0 %v3088_v23 }
  0xbc   :  { %2805 = vmatprep.subr.bf16.mxu0 %v3091_v26 }
  0xbd   :  { %2826 = vmatpush3.bf16.msra.mxu1 %v3090_v25 }
  0xbe   :  { %2827 = vmatprep.subr.bf16.mxu1 %v3093_v28 }
  0xbf   :  { %2806 = vmatpush3.bf16.msra.mxu0 %v3092_v27 }
  0xc0   :  { %2849 = vmatprep.subr.bf16.mxu0 %v3112_v34 }
  0xc1   :  { %2828 = vmatpush3.bf16.msra.mxu1 %v3096_v32 }
  0xc2   :  { %2133 = vmatmul.mubr.bf16.vlgmr.msra.gmra.mrb[20].mxu0 %v2360_v30  ;;  %2861 = vmatprep.subr.bf16.mxu1 %v3112_v34 }
  0xc3   :  { %2850 = vmatpush3.bf16.msra.mxu0 %v3099_v37  ;;  %2857 = vmatprep.mubr.msk.bf16.mxu0 %vm3113_vm0, %v3112_v34 }
  0xc4   :  { %2173 = vmatmul.mubr.bf16.vlgmr.msra.gmra.mrb[20].mxu1 %v2362_v35  ;;  %2851 = vmatprep.subr.bf16.mxu0 %v3112_v34 }
  0xc5   :  { %2877 = vmatprep.mubr.msk.bf16.mxu1 %vm3113_vm0, %v3112_v34  ;;  %2862 = vmatpush3.bf16.msra.mxu1 %v3104_v55 }
  0xc6   :  { %2863 = vmatprep.subr.bf16.mxu1 %v3112_v34 }
  0xc7   :  { %2852 = vmatpush3.bf16.msra.mxu0 %v3100_v38 }
  0xc8   :  { %2853 = vmatprep.subr.bf16.mxu0 %v3112_v34 }
  0xc9   :  { %2864 = vmatpush3.bf16.msra.mxu1 %v3105_v56 }
  0xca   :  { %2865 = vmatprep.subr.bf16.mxu1 %v3112_v34 }
  0xcb   :  { %2854 = vmatpush3.bf16.msra.mxu0 %v3101_v39 }
  0xcc   :  { %2855 = vmatprep.subr.bf16.mxu0 %v3112_v34 }
  0xcd   :  { %2866 = vmatpush3.bf16.msra.mxu1 %v3106_v59 }
  0xce   :  { %2867 = vmatprep.subr.bf16.mxu1 %v3112_v34 }
  0xcf   :  { %2856 = vmatpush3.bf16.msra.mxu0 %v3102_v40 }
  0xd1   :  { %2868 = vmatpush3.bf16.msra.mxu1 %v3107_v4 }
  0xd2   :  { %2858 = vmatmul.mubr.msk.bf16.vlgmr.msra.gmra.mrb[24].mxu0 %vm1696_vm1, %v3103_v41  ;;  %2869 = vmatprep.subr.bf16.mxu1 %v3112_v34 }
  0xd5   :  { %2870 = vmatpush3.bf16.msra.mxu1 %v3108_v7 }
  0xd6   :  { %2871 = vmatprep.subr.bf16.mxu1 %v3112_v34 }
  0xd9   :  { %2872 = vmatpush3.bf16.msra.mxu1 %v3109_v8 }
  0xda   :  { %2873 = vmatprep.subr.bf16.mxu1 %v3112_v34 }
  0xdd   :  { %2874 = vmatpush3.bf16.msra.mxu1 %v3110_v9 }
  0xde   :  { %2875 = vmatprep.subr.bf16.mxu1 %v3112_v34 }
  0xe1   :  { %2876 = vmatpush3.bf16.msra.mxu1 %v3111_v10 }
  0xf5   :  { %v2587_v42 = vpop.f32.mrb[0].mxu0 }
  0xf6   :  { %v2588_v44 = vpop.f32.mrb[1].mxu0 }
  0xf7   :  { %v2589_v45 = vadd.f32 %v2588_v44, %v2587_v42  ;;  %v2590_v46 = vpop.f32.mrb[2].mxu0  ;;  %v2609_v47 = vpop.f32.mrb[0].mxu1 }
  0xf8   :  { %v2591_v48 = vpop.f32.mrb[3].mxu0  ;;  %v2610_v49 = vpop.f32.mrb[1].mxu1 }
  0xf9   :  { %v1735_v50 = vadd.f32 %v2589_v45, %v2339_v43  ;;  %v2611_v51 = vadd.f32 %v2610_v49, %v2609_v47  ;;  %v2612_v52 = vpop.f32.mrb[2].mxu1 }
  0xfa   :  { %v2613_v53 = vpop.f32.mrb[3].mxu1 }
  0xfb   :  { %v1775_v54 = vadd.f32 %v2611_v51, %v1735_v50 }
 0x115   :  { %v2631_v57 = vpop.f32.mrb[4].mxu0 }
 0x116   :  { %v2632_v58 = vpop.f32.mrb[5].mxu0 }
 0x117   :  { %v2633_v60 = vadd.f32 %v2632_v58, %v2631_v57  ;;  %v2634_v61 = vpop.f32.mrb[6].mxu0  ;;  %v2653_v62 = vpop.f32.mrb[4].mxu1 }
 0x118   :  { %v2635_v63 = vpop.f32.mrb[7].mxu0  ;;  %v2654_v1 = vpop.f32.mrb[5].mxu1 }
 0x119   :  { %v1815_v0 = vadd.f32 %v2633_v60, %v1775_v54  ;;  %v2655_v2 = vadd.f32 %v2654_v1, %v2653_v62  ;;  %v2656_v3 = vpop.f32.mrb[6].mxu1 }
 0x11a   :  { %v2657_v5 = vpop.f32.mrb[7].mxu1 }
 0x11b   :  { %v1855_v6 = vadd.f32 %v2655_v2, %v1815_v0  ;;  %v2562_v2 = vld [vmem:[%s3822_s4] ss:$0 sm:$0xff] }
 0x135   :  { %v2675_v11 = vpop.f32.mrb[8].mxu0 }
 0x136   :  { %v2676_v12 = vpop.f32.mrb[9].mxu0 }
 0x137   :  { %v2677_v13 = vadd.f32 %v2676_v12, %v2675_v11  ;;  %v2678_v14 = vpop.f32.mrb[10].mxu0  ;;  %v2697_v15 = vpop.f32.mrb[8].mxu1 }
 0x138   :  { %v2679_v16 = vpop.f32.mrb[11].mxu0  ;;  %v2698_v17 = vpop.f32.mrb[9].mxu1 }
 0x139   :  { %v1895_v18 = vadd.f32 %v2677_v13, %v1855_v6  ;;  %v2699_v19 = vadd.f32 %v2698_v17, %v2697_v15  ;;  %v2700_v20 = vpop.f32.mrb[10].mxu1 }
 0x13a   :  { %v2701_v21 = vpop.f32.mrb[11].mxu1 }
 0x13b   :  { %v1935_v22 = vadd.f32 %v2699_v19, %v1895_v18 }
 0x155   :  { %v2719_v23 = vpop.f32.mrb[12].mxu0 }
 0x156   :  { %v2720_v24 = vpop.f32.mrb[13].mxu0 }
 0x157   :  { %v2721_v25 = vadd.f32 %v2720_v24, %v2719_v23  ;;  %v2722_v26 = vpop.f32.mrb[14].mxu0  ;;  %v2741_v27 = vpop.f32.mrb[12].mxu1 }
 0x158   :  { %v2723_v28 = vpop.f32.mrb[15].mxu0  ;;  %v2742_v29 = vpop.f32.mrb[13].mxu1 }
 0x159   :  { %v1975_v30 = vadd.f32 %v2721_v25, %v1935_v22  ;;  %v2743_v31 = vadd.f32 %v2742_v29, %v2741_v27  ;;  %v2744_v32 = vpop.f32.mrb[14].mxu1 }
 0x15a   :  { %v2745_v33 = vpop.f32.mrb[15].mxu1 }
 0x15b   :  { %v2015_v34 = vadd.f32 %v2743_v31, %v1975_v30 }
 0x175   :  { %v2763_v35 = vpop.f32.mrb[16].mxu0 }
 0x176   :  { %v2764_v36 = vpop.f32.mrb[17].mxu0 }
 0x177   :  { %v2765_v37 = vadd.f32 %v2764_v36, %v2763_v35  ;;  %v2766_v38 = vpop.f32.mrb[18].mxu0  ;;  %v2785_v39 = vpop.f32.mrb[16].mxu1 }
 0x178   :  { %v2767_v40 = vpop.f32.mrb[19].mxu0  ;;  %v2786_v42 = vpop.f32.mrb[17].mxu1 }
 0x179   :  { %v2055_v41 = vadd.f32 %v2765_v37, %v2015_v34  ;;  %v2787_v43 = vadd.f32 %v2786_v42, %v2785_v39  ;;  %v2788_v44 = vpop.f32.mrb[18].mxu1 }
 0x17a   :  { %v2789_v45 = vpop.f32.mrb[19].mxu1 }
 0x17b   :  { %v2095_v46 = vadd.f32 %v2787_v43, %v2055_v41 }
 0x195   :  { %v2807_v47 = vpop.f32.mrb[20].mxu0 }
 0x196   :  { %v2808_v48 = vpop.f32.mrb[21].mxu0 }
 0x197   :  { %v2809_v49 = vadd.f32 %v2808_v48, %v2807_v47  ;;  %v2810_v50 = vpop.f32.mrb[22].mxu0  ;;  %v2829_v51 = vpop.f32.mrb[20].mxu1 }
 0x198   :  { %v2811_v52 = vpop.f32.mrb[23].mxu0  ;;  %v2830_v53 = vpop.f32.mrb[21].mxu1 }
 0x199   :  { %v2135_v54 = vadd.f32 %v2809_v49, %v2095_v46  ;;  %v2831_v55 = vadd.f32 %v2830_v53, %v2829_v51  ;;  %v2832_v56 = vpop.f32.mrb[22].mxu1 }
 0x19a   :  { %v2833_v57 = vpop.f32.mrb[23].mxu1 }
 0x19b   :  { %v2175_v58 = vadd.f32 %v2831_v55, %v2135_v54 }
 0x1a5   :  { %v2214_v59 = vpop.f32.mrb[24].mxu0 }
 0x1a6   :  { %v2215_v60 = vadd.f32 %v2214_v59, %v2175_v58  ;;  %v2859_v61 = vpop.f32.mrb[25].mxu0 }
 0x1a7   :  { %v2217_v62 = vpop.f32.mrb[26].mxu0 }
 0x1a8   :  { %v2220_v63 = vmax.f32 %v2215_v60, 0.0  ;;  %v2860_v0 = vpop.f32.mrb[27].mxu0 }
 0x1aa   :  { %v2221_v1 = vpack.c.bf16 %v2220_v63, %v2220_v63 }
 0x1ac   :  { %2878 = vmatmul.mubr.bf16.vlgmr.msra.gmra.mrb[24].mxu1 %v2221_v1 }
 0x27f   :  { %v2327_v3 = vpop.f32.mrb[24].mxu1 }
 0x280   :  { %v2328_v4 = vadd.f32 %v2562_v2, %v2327_v3  ;;  %v2879_v5 = vpop.f32.mrb[25].mxu1 }
 0x281   :  { %v2330_v6 = vpop.f32.mrb[26].mxu1 }
 0x282   :  { %2334 = vst.msk [vmem:[%s3823_s5] sm:$0xff] %vm2333_vm2, %v2328_v4  ;;  %v2880_v7 = vpop.f32.mrb[27].mxu1 }

</bundles_post_ra>
